<compile_context>
chip_gen: v6e
topology: v6e:2x2x1
jax: 0.10.0
libtpu: 0.0.40
codegen_flags: <defaults>
</compile_context>

<pallas_src>
import math

import jax
import jax.numpy as jnp
from jax import lax
from jax.experimental import pallas as pl
from jax.experimental.pallas import tpu as pltpu


# ----------------------------- fused Pallas kernel -------------------------- #

def fused_ner_kernel(
    x_ref,        # [T*B, 2E]  bf16, row t*B+b = [emb(t,b) | emb(T-1-t,b)]
    mask_ref,     # [T, B, 2H] f32,  [t,:,0:H]=mask(t), [t,:,H:2H]=mask(T-1-t)
    wih_ref,      # [2E, 6H]   bf16, block weights, cols [r_f|r_b|z_f|z_b|n_f|n_b]
    bgx_ref,      # [1, 6H]    f32,  b_ih (+ folded b_hh for r,z)
    whh_ref,      # [2H, 6H]   bf16, block-diagonal hidden weights, same col layout
    bhhn_ref,     # [1, 2H]    f32,  b_hn (fwd | bwd) — stays inside r*(...)
    wp_ref,       # [2H, 49]   bf16
    bp_ref,       # [1, 49]    f32
    wnf_ref,      # [H, 5]     bf16
    wnb_ref,      # [H, 5]     bf16
    wnp_ref,      # [49, 5]    bf16
    bner_ref,     # [1, 5]     f32
    cs_ref,       # [1, 5]     f32  CRF start
    ce_ref,       # [1, 5]     f32  CRF end
    ct_ref,       # [5, 5]     f32  CRF transitions, ct[i, j] = score(i -> j)
    tags_ref,     # [B, T]     int32 output
):
    T, B, H2 = mask_ref.shape
    H = H2 // 2
    K = ct_ref.shape[0]
    f32 = jnp.float32
    bf16 = jnp.bfloat16

    # ---- 1) hoisted input projection: ONE matmul for both directions & gates,
    #         r/z hidden biases already folded into bgx.
    gx_all = (jnp.dot(x_ref[...], wih_ref[...], preferred_element_type=f32)
              + bgx_ref[...])                                 # [T*B, 6H] f32

    whh = whh_ref[...]                                        # [2H, 6H] bf16
    bhh_n = bhhn_ref[...]                                     # [1, 2H]  f32

    # ---- 2) recurrence: combined [B, 2H] carry (fwd lanes 0:H at time t,
    #         bwd lanes H:2H at time T-1-t) -> one MXU push per step.
    h = jnp.zeros((B, 2 * H), f32)
    h_steps = []                                              # states stay in vregs
    for t in range(T):                                        # static, T is small
        gx = gx_all[t * B:(t + 1) * B, :]                     # [B, 6H]
        gh = jnp.dot(h.astype(bf16), whh, preferred_element_type=f32)   # [B, 6H]
        r = jax.nn.sigmoid(gx[:, 0:2 * H] + gh[:, 0:2 * H])
        z = jax.nn.sigmoid(gx[:, 2 * H:4 * H] + gh[:, 2 * H:4 * H])
        n = jnp.tanh(gx[:, 4 * H:6 * H] + r * (gh[:, 4 * H:6 * H] + bhh_n))
        h_new = (1.0 - z) * n + z * h
        h = jnp.where(mask_ref[t] > 0.0, h_new, h)            # single select gate
        h_steps.append(h)

    # ---- 3) head. Time mean works directly on the combined states (both lane
    #         halves sum over all timesteps).
    mean_comb = h_steps[0]
    for t in range(1, T):
        mean_comb = mean_comb + h_steps[t]
    mean_comb = mean_comb * (1.0 / T)                         # [B, 2H]
    p_vec = jax.nn.sigmoid(
        jnp.dot(mean_comb.astype(bf16), wp_ref[...], preferred_element_type=f32)
        + bp_ref[...])                                        # [B, 49]
    p_contrib = (jnp.dot(p_vec.astype(bf16), wnp_ref[...],
                         preferred_element_type=f32)
                 + bner_ref[...])                             # [B, K]

    # Batched emissions: two matmuls on the stacked states instead of 2T tiny ones.
    h_all = jnp.concatenate(h_steps, axis=0).astype(bf16)     # [T*B, 2H] loop order
    emis_f = jnp.dot(h_all[:, 0:H], wnf_ref[...],
                     preferred_element_type=f32)              # row t*B+b -> time t
    emis_b = jnp.dot(h_all[:, H:2 * H], wnb_ref[...],
                     preferred_element_type=f32)              # row t*B+b -> time T-1-t

    def emis_at(t):
        tb = T - 1 - t
        return (emis_f[t * B:(t + 1) * B, :]
                + emis_b[tb * B:(tb + 1) * B, :]
                + p_contrib)                                  # [B, K]

    # ---- 4) CRF Viterbi decode. Transition step is pure elementwise max over
    #         previous tags (no cross-lane reduces); strict '>' keeps the FIRST
    #         max index on ties, matching torchcrf argmax.
    ct = ct_ref[...]                                          # [K, K]
    lane_k = lax.broadcasted_iota(jnp.int32, (B, K), 1).astype(f32)

    score = cs_ref[...] + emis_at(0)                          # [B, K]
    backs = []
    for t in range(1, T):
        best = score[:, 0:1] + ct[0:1, :]                     # prev tag i = 0
        arg = jnp.zeros((B, K), f32)
        for i in range(1, K):                                 # K == 5, static
            cand = score[:, i:i + 1] + ct[i:i + 1, :]
            take = cand > best
            best = jnp.where(take, cand, best)
            arg = jnp.where(take, float(i), arg)
        backs.append(arg)
        m_t = mask_ref[t][:, 0:1]                             # mask at time t
        score = jnp.where(m_t > 0.0, best + emis_at(t), score)
    score = score + ce_ref[...]

    best_last = jnp.max(score, axis=1, keepdims=True)
    cur = jnp.min(jnp.where(score == best_last, lane_k, float(K)),
                  axis=1, keepdims=True)                      # first argmax, [B, 1]

    # Backtrack, assembling the whole [B, T] tag slab in registers; store once.
    colT = lax.broadcasted_iota(jnp.int32, (B, T), 1)
    tags = jnp.where(colT == T - 1, cur, jnp.zeros((B, T), f32))
    for t in range(T - 2, -1, -1):
        cur = jnp.sum(jnp.where(lane_k == cur, backs[t], 0.0),
                      axis=1, keepdims=True)
        tags = jnp.where(colT == t, cur, tags)
    tags_ref[...] = tags.astype(jnp.int32)


# ----------------------------- wrapper -------------------------------------- #

@jax.jit
def model_ner_forward(text, kp):
    """text: [B, T] int32 token ids (0 = padding). Returns decoded tags [B, T]."""
    B, T = text.shape
    H = kp["bhh_n"].shape[1] // 2
    # Pad batch to a multiple of 8 (f32 sublane count); padded rows are mask 0.
    B_pad = ((B + 7) // 8) * 8
    text_p = jnp.pad(text, ((0, B_pad - B), (0, 0)))
    mask = (text_p != 0).astype(jnp.float32)                  # [B_pad, T]

    # Combined time-major input: left half = x(t), right half = x(T-1-t), so the
    # fused fwd/bwd projection + recurrence share one row slice per step.
    x_f = jnp.take(kp["embedding"], text_p.T, axis=0)         # [T, B_pad, E]
    x_b = x_f[::-1]
    x2d = jnp.concatenate([x_f, x_b], axis=-1).reshape(
        T * B_pad, -1).astype(jnp.bfloat16)                   # [T*B_pad, 2E]

    mask_t = mask.T                                           # [T, B_pad]
    mask_comb = jnp.concatenate(
        [jnp.broadcast_to(mask_t[:, :, None], (T, B_pad, H)),
         jnp.broadcast_to(mask_t[::-1, :, None], (T, B_pad, H))],
        axis=-1)                                              # [T, B_pad, 2H]

    tags = pl.pallas_call(
        fused_ner_kernel,
        out_shape=jax.ShapeDtypeStruct((B_pad, T), jnp.int32),
        compiler_params=pltpu.CompilerParams(vmem_limit_bytes=32 * 1024 * 1024),
    )(x2d, mask_comb,
      kp["wih_comb"], kp["b_gx"], kp["whh_comb"], kp["bhh_n"],
      kp["wp_comb"], kp["bp"],
      kp["wner_f"], kp["wner_b"], kp["wner_p"], kp["bner"],
      kp["crf_start"], kp["crf_end"], kp["crf_trans"])
    return tags[:B, :]                                        # [B, T], lane-dense


# ----------------------------- parameter prep -------------------------------- #

def prepare_params(p):
    """Pre-concat/fold weights OUTSIDE the kernel (done once):
       - block-diagonal hidden weights [2H, 6H] (one matmul per step, both dirs)
       - combined input weights [2E, 6H] (one hoisted matmul, both dirs)
       - b_hr / b_hz folded into the hoisted-projection bias; b_hn kept apart
       - matmul operands cast to bf16 (f32 accumulation in-kernel)."""
    f32, bf16 = jnp.float32, jnp.bfloat16
    H = p["whh_f"].shape[-1]
    E = p["wih_f"].shape[0]
    ZEH = jnp.zeros((E, H), f32)
    ZHH = jnp.zeros((H, H), f32)

    wf, wb = p["wih_f"], p["wih_b"]                 # [E, 3H], cols r|z|n
    wih_comb = jnp.concatenate([
        jnp.concatenate([wf[:, 0:H], ZEH, wf[:, H:2*H], ZEH, wf[:, 2*H:3*H], ZEH], axis=1),
        jnp.concatenate([ZEH, wb[:, 0:H], ZEH, wb[:, H:2*H], ZEH, wb[:, 2*H:3*H]], axis=1),
    ], axis=0).astype(bf16)                          # [2E, 6H]

    hf, hb = p["whh_f"], p["whh_b"]                  # [3, H, H] gates r,z,n
    whh_comb = jnp.concatenate([
        jnp.concatenate([hf[0], ZHH, hf[1], ZHH, hf[2], ZHH], axis=1),
        jnp.concatenate([ZHH, hb[0], ZHH, hb[1], ZHH, hb[2]], axis=1),
    ], axis=0).astype(bf16)                          # [2H, 6H]

    bif, bib = p["bih_f"], p["bih_b"]                # [1, 3H]
    bhf, bhb = p["bhh_f"], p["bhh_b"]                # [3, 1, H]
    b_gx = jnp.concatenate([
        bif[:, 0:H] + bhf[0], bib[:, 0:H] + bhb[0],          # r (b_hr folded)
        bif[:, H:2*H] + bhf[1], bib[:, H:2*H] + bhb[1],      # z (b_hz folded)
        bif[:, 2*H:3*H], bib[:, 2*H:3*H],                    # n (b_hn NOT folded)
    ], axis=1).astype(f32)                           # [1, 6H]
    bhh_n = jnp.concatenate([bhf[2], bhb[2]], axis=1).astype(f32)   # [1, 2H]

    return {
        "embedding": p["embedding"],
        "wih_comb": wih_comb, "b_gx": b_gx,
        "whh_comb": whh_comb, "bhh_n": bhh_n,
        "wp_comb": jnp.concatenate([p["wp_f"], p["wp_b"]], axis=0).astype(bf16),
        "bp": p["bp"],
        "wner_f": p["wner_f"].astype(bf16),
        "wner_b": p["wner_b"].astype(bf16),
        "wner_p": p["wner_p"].astype(bf16),
        "bner": p["bner"],
        "crf_start": p["crf_start"], "crf_end": p["crf_end"],
        "crf_trans": p["crf_trans"],
    }


def init_params(key, vocab, emb_dim, hidden, n_p, n_tags):
    ks = jax.random.split(key, 18)
    H = hidden
    k_gru = 1.0 / math.sqrt(H)
    k_p = 1.0 / math.sqrt(2 * H)
    k_ner = math.sqrt(6.0 / (2 * H + n_p + n_tags))   # xavier_uniform

    def unif(k, shape, lim):
        return jax.random.uniform(k, shape, jnp.float32, -lim, lim)

    emb = jax.random.normal(ks[0], (vocab, emb_dim), jnp.float32) * 0.1
    emb = emb.at[0].set(0.0)                          # padding_idx=0

    return {
        "embedding": emb,
        "wih_f": unif(ks[1], (emb_dim, 3 * H), k_gru),
        "bih_f": unif(ks[2], (1, 3 * H), k_gru),
        "whh_f": unif(ks[3], (3, H, H), k_gru),
        "bhh_f": unif(ks[4], (3, 1, H), k_gru),
        "wih_b": unif(ks[5], (emb_dim, 3 * H), k_gru),
        "bih_b": unif(ks[6], (1, 3 * H), k_gru),
        "whh_b": unif(ks[7], (3, H, H), k_gru),
        "bhh_b": unif(ks[8], (3, 1, H), k_gru),
        "wp_f": unif(ks[9], (H, n_p), k_p),
        "wp_b": unif(ks[10], (H, n_p), k_p),
        "bp": unif(ks[11], (1, n_p), k_p),
        "wner_f": unif(ks[12], (H, n_tags), k_ner),
        "wner_b": unif(ks[13], (H, n_tags), k_ner),
        "wner_p": unif(ks[14], (n_p, n_tags), k_ner),
        "bner": jnp.zeros((1, n_tags), jnp.float32),
        "crf_start": unif(ks[15], (1, n_tags), 0.1),
        "crf_end": unif(ks[16], (1, n_tags), 0.1),
        "crf_trans": unif(ks[17], (n_tags, n_tags), 0.1),
    }


# ----------------------------- main ------------------------------------------ #

if __name__ == "__main__":
    VOCAB = 97
    EMB_DIM = 256
    HIDDEN = 32      # param['hidden_size']
    N_P = 49
    N_TAGS = 5
    B, T = 2, 8

    key = jax.random.PRNGKey(0)
    k_param, k_text = jax.random.split(key)
    params = init_params(k_param, VOCAB, EMB_DIM, HIDDEN, N_P, N_TAGS)
    kernel_params = prepare_params(params)

    # All tokens nonzero -> mask is all ones and max_len == T (no dynamic trunc).
    text = jax.random.randint(k_text, (B, T), 1, VOCAB, dtype=jnp.int32)

    tags = model_ner_forward(text, kernel_params)
    jax.block_until_ready(tags)

    assert tags.shape == (B, T)
    assert tags.dtype == jnp.int32
    assert bool(jnp.all((tags >= 0) & (tags < N_TAGS)))
    print("KERNEL_OK")
</pallas_src>

<mosaic_0001>
module attributes {stable_mosaic.version = 11 : i64} {
  func.func @fused_ner_kernel(%arg0: memref<64x512xbf16, #tpu.memory_space<vmem>>, %arg1: memref<8x8x64xf32, #tpu.memory_space<vmem>>, %arg2: memref<512x192xbf16, #tpu.memory_space<vmem>>, %arg3: memref<1x192xf32, #tpu.memory_space<vmem>>, %arg4: memref<64x192xbf16, #tpu.memory_space<vmem>>, %arg5: memref<1x64xf32, #tpu.memory_space<vmem>>, %arg6: memref<64x49xbf16, #tpu.memory_space<vmem>>, %arg7: memref<1x49xf32, #tpu.memory_space<vmem>>, %arg8: memref<32x5xbf16, #tpu.memory_space<vmem>>, %arg9: memref<32x5xbf16, #tpu.memory_space<vmem>>, %arg10: memref<49x5xbf16, #tpu.memory_space<vmem>>, %arg11: memref<1x5xf32, #tpu.memory_space<vmem>>, %arg12: memref<1x5xf32, #tpu.memory_space<vmem>>, %arg13: memref<1x5xf32, #tpu.memory_space<vmem>>, %arg14: memref<5x5xf32, #tpu.memory_space<vmem>>, %arg15: memref<8x8xi32, #tpu.memory_space<vmem>>) attributes {dimension_semantics = [], scalar_prefetch = 0 : i64, scratch_operands = 0 : i64, tpu.core_type = #tpu.core_type<tc>} {
    %c0 = arith.constant 0 : index
    %c0_0 = arith.constant 0 : index
    %0 = vector.load %arg0[%c0, %c0_0] : memref<64x512xbf16, #tpu.memory_space<vmem>>, vector<64x512xbf16>
    %c0_1 = arith.constant 0 : index
    %c0_2 = arith.constant 0 : index
    %1 = vector.load %arg2[%c0_1, %c0_2] : memref<512x192xbf16, #tpu.memory_space<vmem>>, vector<512x192xbf16>
    %cst = arith.constant dense<0.000000e+00> : vector<64x192xf32>
    %2 = tpu.matmul %0, %1, %cst {dimension_numbers = #tpu.dot_dimension_numbers<[1], [0], [0], [1], [0, 0, 1, 1], [], []>} : vector<64x512xbf16>, vector<512x192xbf16>, vector<64x192xf32> -> vector<64x192xf32>
    %c0_3 = arith.constant 0 : index
    %c0_4 = arith.constant 0 : index
    %3 = vector.load %arg3[%c0_3, %c0_4] : memref<1x192xf32, #tpu.memory_space<vmem>>, vector<1x192xf32>
    %4 = vector.broadcast %3 : vector<1x192xf32> to vector<64x192xf32>
    %5 = arith.addf %2, %4 : vector<64x192xf32>
    %c0_5 = arith.constant 0 : index
    %c0_6 = arith.constant 0 : index
    %6 = vector.load %arg4[%c0_5, %c0_6] : memref<64x192xbf16, #tpu.memory_space<vmem>>, vector<64x192xbf16>
    %c0_7 = arith.constant 0 : index
    %c0_8 = arith.constant 0 : index
    %7 = vector.load %arg5[%c0_7, %c0_8] : memref<1x64xf32, #tpu.memory_space<vmem>>, vector<1x64xf32>
    %cst_9 = arith.constant 0.000000e+00 : f32
    %8 = vector.broadcast %cst_9 : f32 to vector<8x64xf32>
    %9 = vector.extract_strided_slice %5 {offsets = [0, 0], sizes = [8, 192], strides = [1, 1]} : vector<64x192xf32> to vector<8x192xf32>
    %10 = arith.truncf %8 : vector<8x64xf32> to vector<8x64xbf16>
    %cst_10 = arith.constant dense<0.000000e+00> : vector<8x192xf32>
    %11 = tpu.matmul %10, %6, %cst_10 {dimension_numbers = #tpu.dot_dimension_numbers<[1], [0], [0], [1], [0, 0, 1, 1], [], []>} : vector<8x64xbf16>, vector<64x192xbf16>, vector<8x192xf32> -> vector<8x192xf32>
    %12 = vector.extract_strided_slice %9 {offsets = [0, 0], sizes = [8, 64], strides = [1, 1]} : vector<8x192xf32> to vector<8x64xf32>
    %13 = vector.extract_strided_slice %11 {offsets = [0, 0], sizes = [8, 64], strides = [1, 1]} : vector<8x192xf32> to vector<8x64xf32>
    %14 = arith.addf %12, %13 : vector<8x64xf32>
    %15 = arith.negf %14 : vector<8x64xf32>
    %16 = math.exp %15 : vector<8x64xf32>
    %cst_11 = arith.constant 1.000000e+00 : f32
    %17 = vector.broadcast %cst_11 : f32 to vector<8x64xf32>
    %18 = arith.addf %17, %16 : vector<8x64xf32>
    %19 = arith.divf %17, %18 : vector<8x64xf32>
    %20 = vector.extract_strided_slice %9 {offsets = [0, 64], sizes = [8, 64], strides = [1, 1]} : vector<8x192xf32> to vector<8x64xf32>
    %21 = vector.extract_strided_slice %11 {offsets = [0, 64], sizes = [8, 64], strides = [1, 1]} : vector<8x192xf32> to vector<8x64xf32>
    %22 = arith.addf %20, %21 : vector<8x64xf32>
    %23 = arith.negf %22 : vector<8x64xf32>
    %24 = math.exp %23 : vector<8x64xf32>
    %cst_12 = arith.constant 1.000000e+00 : f32
    %25 = vector.broadcast %cst_12 : f32 to vector<8x64xf32>
    %26 = arith.addf %25, %24 : vector<8x64xf32>
    %27 = arith.divf %25, %26 : vector<8x64xf32>
    %28 = vector.extract_strided_slice %9 {offsets = [0, 128], sizes = [8, 64], strides = [1, 1]} : vector<8x192xf32> to vector<8x64xf32>
    %29 = vector.extract_strided_slice %11 {offsets = [0, 128], sizes = [8, 64], strides = [1, 1]} : vector<8x192xf32> to vector<8x64xf32>
    %30 = vector.broadcast %7 : vector<1x64xf32> to vector<8x64xf32>
    %31 = arith.addf %29, %30 : vector<8x64xf32>
    %32 = arith.mulf %19, %31 : vector<8x64xf32>
    %33 = arith.addf %28, %32 : vector<8x64xf32>
    %34 = math.tanh %33 : vector<8x64xf32>
    %cst_13 = arith.constant 1.000000e+00 : f32
    %35 = vector.broadcast %cst_13 : f32 to vector<8x64xf32>
    %36 = arith.subf %35, %27 : vector<8x64xf32>
    %37 = arith.mulf %36, %34 : vector<8x64xf32>
    %38 = arith.mulf %27, %8 : vector<8x64xf32>
    %39 = arith.addf %37, %38 : vector<8x64xf32>
    %c0_14 = arith.constant 0 : index
    %c0_15 = arith.constant 0 : index
    %c0_16 = arith.constant 0 : index
    %40 = vector.load %arg1[%c0_14, %c0_15, %c0_16] : memref<8x8x64xf32, #tpu.memory_space<vmem>>, vector<1x8x64xf32>
    %41 = vector.shape_cast %40 : vector<1x8x64xf32> to vector<8x64xf32>
    %cst_17 = arith.constant 0.000000e+00 : f32
    %42 = vector.broadcast %cst_17 : f32 to vector<8x64xf32>
    %43 = arith.cmpf ogt, %41, %42 : vector<8x64xf32>
    %44 = arith.select %43, %39, %8 : vector<8x64xi1>, vector<8x64xf32>
    %45 = vector.extract_strided_slice %5 {offsets = [8, 0], sizes = [8, 192], strides = [1, 1]} : vector<64x192xf32> to vector<8x192xf32>
    %46 = arith.truncf %44 : vector<8x64xf32> to vector<8x64xbf16>
    %cst_18 = arith.constant dense<0.000000e+00> : vector<8x192xf32>
    %47 = tpu.matmul %46, %6, %cst_18 {dimension_numbers = #tpu.dot_dimension_numbers<[1], [0], [0], [1], [0, 0, 1, 1], [], []>} : vector<8x64xbf16>, vector<64x192xbf16>, vector<8x192xf32> -> vector<8x192xf32>
    %48 = vector.extract_strided_slice %45 {offsets = [0, 0], sizes = [8, 64], strides = [1, 1]} : vector<8x192xf32> to vector<8x64xf32>
    %49 = vector.extract_strided_slice %47 {offsets = [0, 0], sizes = [8, 64], strides = [1, 1]} : vector<8x192xf32> to vector<8x64xf32>
    %50 = arith.addf %48, %49 : vector<8x64xf32>
    %51 = arith.negf %50 : vector<8x64xf32>
    %52 = math.exp %51 : vector<8x64xf32>
    %cst_19 = arith.constant 1.000000e+00 : f32
    %53 = vector.broadcast %cst_19 : f32 to vector<8x64xf32>
    %54 = arith.addf %53, %52 : vector<8x64xf32>
    %55 = arith.divf %53, %54 : vector<8x64xf32>
    %56 = vector.extract_strided_slice %45 {offsets = [0, 64], sizes = [8, 64], strides = [1, 1]} : vector<8x192xf32> to vector<8x64xf32>
    %57 = vector.extract_strided_slice %47 {offsets = [0, 64], sizes = [8, 64], strides = [1, 1]} : vector<8x192xf32> to vector<8x64xf32>
    %58 = arith.addf %56, %57 : vector<8x64xf32>
    %59 = arith.negf %58 : vector<8x64xf32>
    %60 = math.exp %59 : vector<8x64xf32>
    %cst_20 = arith.constant 1.000000e+00 : f32
    %61 = vector.broadcast %cst_20 : f32 to vector<8x64xf32>
    %62 = arith.addf %61, %60 : vector<8x64xf32>
    %63 = arith.divf %61, %62 : vector<8x64xf32>
    %64 = vector.extract_strided_slice %45 {offsets = [0, 128], sizes = [8, 64], strides = [1, 1]} : vector<8x192xf32> to vector<8x64xf32>
    %65 = vector.extract_strided_slice %47 {offsets = [0, 128], sizes = [8, 64], strides = [1, 1]} : vector<8x192xf32> to vector<8x64xf32>
    %66 = vector.broadcast %7 : vector<1x64xf32> to vector<8x64xf32>
    %67 = arith.addf %65, %66 : vector<8x64xf32>
    %68 = arith.mulf %55, %67 : vector<8x64xf32>
    %69 = arith.addf %64, %68 : vector<8x64xf32>
    %70 = math.tanh %69 : vector<8x64xf32>
    %cst_21 = arith.constant 1.000000e+00 : f32
    %71 = vector.broadcast %cst_21 : f32 to vector<8x64xf32>
    %72 = arith.subf %71, %63 : vector<8x64xf32>
    %73 = arith.mulf %72, %70 : vector<8x64xf32>
    %74 = arith.mulf %63, %44 : vector<8x64xf32>
    %75 = arith.addf %73, %74 : vector<8x64xf32>
    %c1 = arith.constant 1 : index
    %c0_22 = arith.constant 0 : index
    %c0_23 = arith.constant 0 : index
    %76 = vector.load %arg1[%c1, %c0_22, %c0_23] : memref<8x8x64xf32, #tpu.memory_space<vmem>>, vector<1x8x64xf32>
    %77 = vector.shape_cast %76 : vector<1x8x64xf32> to vector<8x64xf32>
    %cst_24 = arith.constant 0.000000e+00 : f32
    %78 = vector.broadcast %cst_24 : f32 to vector<8x64xf32>
    %79 = arith.cmpf ogt, %77, %78 : vector<8x64xf32>
    %80 = arith.select %79, %75, %44 : vector<8x64xi1>, vector<8x64xf32>
    %81 = vector.extract_strided_slice %5 {offsets = [16, 0], sizes = [8, 192], strides = [1, 1]} : vector<64x192xf32> to vector<8x192xf32>
    %82 = arith.truncf %80 : vector<8x64xf32> to vector<8x64xbf16>
    %cst_25 = arith.constant dense<0.000000e+00> : vector<8x192xf32>
    %83 = tpu.matmul %82, %6, %cst_25 {dimension_numbers = #tpu.dot_dimension_numbers<[1], [0], [0], [1], [0, 0, 1, 1], [], []>} : vector<8x64xbf16>, vector<64x192xbf16>, vector<8x192xf32> -> vector<8x192xf32>
    %84 = vector.extract_strided_slice %81 {offsets = [0, 0], sizes = [8, 64], strides = [1, 1]} : vector<8x192xf32> to vector<8x64xf32>
    %85 = vector.extract_strided_slice %83 {offsets = [0, 0], sizes = [8, 64], strides = [1, 1]} : vector<8x192xf32> to vector<8x64xf32>
    %86 = arith.addf %84, %85 : vector<8x64xf32>
    %87 = arith.negf %86 : vector<8x64xf32>
    %88 = math.exp %87 : vector<8x64xf32>
    %cst_26 = arith.constant 1.000000e+00 : f32
    %89 = vector.broadcast %cst_26 : f32 to vector<8x64xf32>
    %90 = arith.addf %89, %88 : vector<8x64xf32>
    %91 = arith.divf %89, %90 : vector<8x64xf32>
    %92 = vector.extract_strided_slice %81 {offsets = [0, 64], sizes = [8, 64], strides = [1, 1]} : vector<8x192xf32> to vector<8x64xf32>
    %93 = vector.extract_strided_slice %83 {offsets = [0, 64], sizes = [8, 64], strides = [1, 1]} : vector<8x192xf32> to vector<8x64xf32>
    %94 = arith.addf %92, %93 : vector<8x64xf32>
    %95 = arith.negf %94 : vector<8x64xf32>
    %96 = math.exp %95 : vector<8x64xf32>
    %cst_27 = arith.constant 1.000000e+00 : f32
    %97 = vector.broadcast %cst_27 : f32 to vector<8x64xf32>
    %98 = arith.addf %97, %96 : vector<8x64xf32>
    %99 = arith.divf %97, %98 : vector<8x64xf32>
    %100 = vector.extract_strided_slice %81 {offsets = [0, 128], sizes = [8, 64], strides = [1, 1]} : vector<8x192xf32> to vector<8x64xf32>
    %101 = vector.extract_strided_slice %83 {offsets = [0, 128], sizes = [8, 64], strides = [1, 1]} : vector<8x192xf32> to vector<8x64xf32>
    %102 = vector.broadcast %7 : vector<1x64xf32> to vector<8x64xf32>
    %103 = arith.addf %101, %102 : vector<8x64xf32>
    %104 = arith.mulf %91, %103 : vector<8x64xf32>
    %105 = arith.addf %100, %104 : vector<8x64xf32>
    %106 = math.tanh %105 : vector<8x64xf32>
    %cst_28 = arith.constant 1.000000e+00 : f32
    %107 = vector.broadcast %cst_28 : f32 to vector<8x64xf32>
    %108 = arith.subf %107, %99 : vector<8x64xf32>
    %109 = arith.mulf %108, %106 : vector<8x64xf32>
    %110 = arith.mulf %99, %80 : vector<8x64xf32>
    %111 = arith.addf %109, %110 : vector<8x64xf32>
    %c2 = arith.constant 2 : index
    %c0_29 = arith.constant 0 : index
    %c0_30 = arith.constant 0 : index
    %112 = vector.load %arg1[%c2, %c0_29, %c0_30] : memref<8x8x64xf32, #tpu.memory_space<vmem>>, vector<1x8x64xf32>
    %113 = vector.shape_cast %112 : vector<1x8x64xf32> to vector<8x64xf32>
    %cst_31 = arith.constant 0.000000e+00 : f32
    %114 = vector.broadcast %cst_31 : f32 to vector<8x64xf32>
    %115 = arith.cmpf ogt, %113, %114 : vector<8x64xf32>
    %116 = arith.select %115, %111, %80 : vector<8x64xi1>, vector<8x64xf32>
    %117 = vector.extract_strided_slice %5 {offsets = [24, 0], sizes = [8, 192], strides = [1, 1]} : vector<64x192xf32> to vector<8x192xf32>
    %118 = arith.truncf %116 : vector<8x64xf32> to vector<8x64xbf16>
    %cst_32 = arith.constant dense<0.000000e+00> : vector<8x192xf32>
    %119 = tpu.matmul %118, %6, %cst_32 {dimension_numbers = #tpu.dot_dimension_numbers<[1], [0], [0], [1], [0, 0, 1, 1], [], []>} : vector<8x64xbf16>, vector<64x192xbf16>, vector<8x192xf32> -> vector<8x192xf32>
    %120 = vector.extract_strided_slice %117 {offsets = [0, 0], sizes = [8, 64], strides = [1, 1]} : vector<8x192xf32> to vector<8x64xf32>
    %121 = vector.extract_strided_slice %119 {offsets = [0, 0], sizes = [8, 64], strides = [1, 1]} : vector<8x192xf32> to vector<8x64xf32>
    %122 = arith.addf %120, %121 : vector<8x64xf32>
    %123 = arith.negf %122 : vector<8x64xf32>
    %124 = math.exp %123 : vector<8x64xf32>
    %cst_33 = arith.constant 1.000000e+00 : f32
    %125 = vector.broadcast %cst_33 : f32 to vector<8x64xf32>
    %126 = arith.addf %125, %124 : vector<8x64xf32>
    %127 = arith.divf %125, %126 : vector<8x64xf32>
    %128 = vector.extract_strided_slice %117 {offsets = [0, 64], sizes = [8, 64], strides = [1, 1]} : vector<8x192xf32> to vector<8x64xf32>
    %129 = vector.extract_strided_slice %119 {offsets = [0, 64], sizes = [8, 64], strides = [1, 1]} : vector<8x192xf32> to vector<8x64xf32>
    %130 = arith.addf %128, %129 : vector<8x64xf32>
    %131 = arith.negf %130 : vector<8x64xf32>
    %132 = math.exp %131 : vector<8x64xf32>
    %cst_34 = arith.constant 1.000000e+00 : f32
    %133 = vector.broadcast %cst_34 : f32 to vector<8x64xf32>
    %134 = arith.addf %133, %132 : vector<8x64xf32>
    %135 = arith.divf %133, %134 : vector<8x64xf32>
    %136 = vector.extract_strided_slice %117 {offsets = [0, 128], sizes = [8, 64], strides = [1, 1]} : vector<8x192xf32> to vector<8x64xf32>
    %137 = vector.extract_strided_slice %119 {offsets = [0, 128], sizes = [8, 64], strides = [1, 1]} : vector<8x192xf32> to vector<8x64xf32>
    %138 = vector.broadcast %7 : vector<1x64xf32> to vector<8x64xf32>
    %139 = arith.addf %137, %138 : vector<8x64xf32>
    %140 = arith.mulf %127, %139 : vector<8x64xf32>
    %141 = arith.addf %136, %140 : vector<8x64xf32>
    %142 = math.tanh %141 : vector<8x64xf32>
    %cst_35 = arith.constant 1.000000e+00 : f32
    %143 = vector.broadcast %cst_35 : f32 to vector<8x64xf32>
    %144 = arith.subf %143, %135 : vector<8x64xf32>
    %145 = arith.mulf %144, %142 : vector<8x64xf32>
    %146 = arith.mulf %135, %116 : vector<8x64xf32>
    %147 = arith.addf %145, %146 : vector<8x64xf32>
    %c3 = arith.constant 3 : index
    %c0_36 = arith.constant 0 : index
    %c0_37 = arith.constant 0 : index
    %148 = vector.load %arg1[%c3, %c0_36, %c0_37] : memref<8x8x64xf32, #tpu.memory_space<vmem>>, vector<1x8x64xf32>
    %149 = vector.shape_cast %148 : vector<1x8x64xf32> to vector<8x64xf32>
    %cst_38 = arith.constant 0.000000e+00 : f32
    %150 = vector.broadcast %cst_38 : f32 to vector<8x64xf32>
    %151 = arith.cmpf ogt, %149, %150 : vector<8x64xf32>
    %152 = arith.select %151, %147, %116 : vector<8x64xi1>, vector<8x64xf32>
    %153 = vector.extract_strided_slice %5 {offsets = [32, 0], sizes = [8, 192], strides = [1, 1]} : vector<64x192xf32> to vector<8x192xf32>
    %154 = arith.truncf %152 : vector<8x64xf32> to vector<8x64xbf16>
    %cst_39 = arith.constant dense<0.000000e+00> : vector<8x192xf32>
    %155 = tpu.matmul %154, %6, %cst_39 {dimension_numbers = #tpu.dot_dimension_numbers<[1], [0], [0], [1], [0, 0, 1, 1], [], []>} : vector<8x64xbf16>, vector<64x192xbf16>, vector<8x192xf32> -> vector<8x192xf32>
    %156 = vector.extract_strided_slice %153 {offsets = [0, 0], sizes = [8, 64], strides = [1, 1]} : vector<8x192xf32> to vector<8x64xf32>
    %157 = vector.extract_strided_slice %155 {offsets = [0, 0], sizes = [8, 64], strides = [1, 1]} : vector<8x192xf32> to vector<8x64xf32>
    %158 = arith.addf %156, %157 : vector<8x64xf32>
    %159 = arith.negf %158 : vector<8x64xf32>
    %160 = math.exp %159 : vector<8x64xf32>
    %cst_40 = arith.constant 1.000000e+00 : f32
    %161 = vector.broadcast %cst_40 : f32 to vector<8x64xf32>
    %162 = arith.addf %161, %160 : vector<8x64xf32>
    %163 = arith.divf %161, %162 : vector<8x64xf32>
    %164 = vector.extract_strided_slice %153 {offsets = [0, 64], sizes = [8, 64], strides = [1, 1]} : vector<8x192xf32> to vector<8x64xf32>
    %165 = vector.extract_strided_slice %155 {offsets = [0, 64], sizes = [8, 64], strides = [1, 1]} : vector<8x192xf32> to vector<8x64xf32>
    %166 = arith.addf %164, %165 : vector<8x64xf32>
    %167 = arith.negf %166 : vector<8x64xf32>
    %168 = math.exp %167 : vector<8x64xf32>
    %cst_41 = arith.constant 1.000000e+00 : f32
    %169 = vector.broadcast %cst_41 : f32 to vector<8x64xf32>
    %170 = arith.addf %169, %168 : vector<8x64xf32>
    %171 = arith.divf %169, %170 : vector<8x64xf32>
    %172 = vector.extract_strided_slice %153 {offsets = [0, 128], sizes = [8, 64], strides = [1, 1]} : vector<8x192xf32> to vector<8x64xf32>
    %173 = vector.extract_strided_slice %155 {offsets = [0, 128], sizes = [8, 64], strides = [1, 1]} : vector<8x192xf32> to vector<8x64xf32>
    %174 = vector.broadcast %7 : vector<1x64xf32> to vector<8x64xf32>
    %175 = arith.addf %173, %174 : vector<8x64xf32>
    %176 = arith.mulf %163, %175 : vector<8x64xf32>
    %177 = arith.addf %172, %176 : vector<8x64xf32>
    %178 = math.tanh %177 : vector<8x64xf32>
    %cst_42 = arith.constant 1.000000e+00 : f32
    %179 = vector.broadcast %cst_42 : f32 to vector<8x64xf32>
    %180 = arith.subf %179, %171 : vector<8x64xf32>
    %181 = arith.mulf %180, %178 : vector<8x64xf32>
    %182 = arith.mulf %171, %152 : vector<8x64xf32>
    %183 = arith.addf %181, %182 : vector<8x64xf32>
    %c4 = arith.constant 4 : index
    %c0_43 = arith.constant 0 : index
    %c0_44 = arith.constant 0 : index
    %184 = vector.load %arg1[%c4, %c0_43, %c0_44] : memref<8x8x64xf32, #tpu.memory_space<vmem>>, vector<1x8x64xf32>
    %185 = vector.shape_cast %184 : vector<1x8x64xf32> to vector<8x64xf32>
    %cst_45 = arith.constant 0.000000e+00 : f32
    %186 = vector.broadcast %cst_45 : f32 to vector<8x64xf32>
    %187 = arith.cmpf ogt, %185, %186 : vector<8x64xf32>
    %188 = arith.select %187, %183, %152 : vector<8x64xi1>, vector<8x64xf32>
    %189 = vector.extract_strided_slice %5 {offsets = [40, 0], sizes = [8, 192], strides = [1, 1]} : vector<64x192xf32> to vector<8x192xf32>
    %190 = arith.truncf %188 : vector<8x64xf32> to vector<8x64xbf16>
    %cst_46 = arith.constant dense<0.000000e+00> : vector<8x192xf32>
    %191 = tpu.matmul %190, %6, %cst_46 {dimension_numbers = #tpu.dot_dimension_numbers<[1], [0], [0], [1], [0, 0, 1, 1], [], []>} : vector<8x64xbf16>, vector<64x192xbf16>, vector<8x192xf32> -> vector<8x192xf32>
    %192 = vector.extract_strided_slice %189 {offsets = [0, 0], sizes = [8, 64], strides = [1, 1]} : vector<8x192xf32> to vector<8x64xf32>
    %193 = vector.extract_strided_slice %191 {offsets = [0, 0], sizes = [8, 64], strides = [1, 1]} : vector<8x192xf32> to vector<8x64xf32>
    %194 = arith.addf %192, %193 : vector<8x64xf32>
    %195 = arith.negf %194 : vector<8x64xf32>
    %196 = math.exp %195 : vector<8x64xf32>
    %cst_47 = arith.constant 1.000000e+00 : f32
    %197 = vector.broadcast %cst_47 : f32 to vector<8x64xf32>
    %198 = arith.addf %197, %196 : vector<8x64xf32>
    %199 = arith.divf %197, %198 : vector<8x64xf32>
    %200 = vector.extract_strided_slice %189 {offsets = [0, 64], sizes = [8, 64], strides = [1, 1]} : vector<8x192xf32> to vector<8x64xf32>
    %201 = vector.extract_strided_slice %191 {offsets = [0, 64], sizes = [8, 64], strides = [1, 1]} : vector<8x192xf32> to vector<8x64xf32>
    %202 = arith.addf %200, %201 : vector<8x64xf32>
    %203 = arith.negf %202 : vector<8x64xf32>
    %204 = math.exp %203 : vector<8x64xf32>
    %cst_48 = arith.constant 1.000000e+00 : f32
    %205 = vector.broadcast %cst_48 : f32 to vector<8x64xf32>
    %206 = arith.addf %205, %204 : vector<8x64xf32>
    %207 = arith.divf %205, %206 : vector<8x64xf32>
    %208 = vector.extract_strided_slice %189 {offsets = [0, 128], sizes = [8, 64], strides = [1, 1]} : vector<8x192xf32> to vector<8x64xf32>
    %209 = vector.extract_strided_slice %191 {offsets = [0, 128], sizes = [8, 64], strides = [1, 1]} : vector<8x192xf32> to vector<8x64xf32>
    %210 = vector.broadcast %7 : vector<1x64xf32> to vector<8x64xf32>
    %211 = arith.addf %209, %210 : vector<8x64xf32>
    %212 = arith.mulf %199, %211 : vector<8x64xf32>
    %213 = arith.addf %208, %212 : vector<8x64xf32>
    %214 = math.tanh %213 : vector<8x64xf32>
    %cst_49 = arith.constant 1.000000e+00 : f32
    %215 = vector.broadcast %cst_49 : f32 to vector<8x64xf32>
    %216 = arith.subf %215, %207 : vector<8x64xf32>
    %217 = arith.mulf %216, %214 : vector<8x64xf32>
    %218 = arith.mulf %207, %188 : vector<8x64xf32>
    %219 = arith.addf %217, %218 : vector<8x64xf32>
    %c5 = arith.constant 5 : index
    %c0_50 = arith.constant 0 : index
    %c0_51 = arith.constant 0 : index
    %220 = vector.load %arg1[%c5, %c0_50, %c0_51] : memref<8x8x64xf32, #tpu.memory_space<vmem>>, vector<1x8x64xf32>
    %221 = vector.shape_cast %220 : vector<1x8x64xf32> to vector<8x64xf32>
    %cst_52 = arith.constant 0.000000e+00 : f32
    %222 = vector.broadcast %cst_52 : f32 to vector<8x64xf32>
    %223 = arith.cmpf ogt, %221, %222 : vector<8x64xf32>
    %224 = arith.select %223, %219, %188 : vector<8x64xi1>, vector<8x64xf32>
    %225 = vector.extract_strided_slice %5 {offsets = [48, 0], sizes = [8, 192], strides = [1, 1]} : vector<64x192xf32> to vector<8x192xf32>
    %226 = arith.truncf %224 : vector<8x64xf32> to vector<8x64xbf16>
    %cst_53 = arith.constant dense<0.000000e+00> : vector<8x192xf32>
    %227 = tpu.matmul %226, %6, %cst_53 {dimension_numbers = #tpu.dot_dimension_numbers<[1], [0], [0], [1], [0, 0, 1, 1], [], []>} : vector<8x64xbf16>, vector<64x192xbf16>, vector<8x192xf32> -> vector<8x192xf32>
    %228 = vector.extract_strided_slice %225 {offsets = [0, 0], sizes = [8, 64], strides = [1, 1]} : vector<8x192xf32> to vector<8x64xf32>
    %229 = vector.extract_strided_slice %227 {offsets = [0, 0], sizes = [8, 64], strides = [1, 1]} : vector<8x192xf32> to vector<8x64xf32>
    %230 = arith.addf %228, %229 : vector<8x64xf32>
    %231 = arith.negf %230 : vector<8x64xf32>
    %232 = math.exp %231 : vector<8x64xf32>
    %cst_54 = arith.constant 1.000000e+00 : f32
    %233 = vector.broadcast %cst_54 : f32 to vector<8x64xf32>
    %234 = arith.addf %233, %232 : vector<8x64xf32>
    %235 = arith.divf %233, %234 : vector<8x64xf32>
    %236 = vector.extract_strided_slice %225 {offsets = [0, 64], sizes = [8, 64], strides = [1, 1]} : vector<8x192xf32> to vector<8x64xf32>
    %237 = vector.extract_strided_slice %227 {offsets = [0, 64], sizes = [8, 64], strides = [1, 1]} : vector<8x192xf32> to vector<8x64xf32>
    %238 = arith.addf %236, %237 : vector<8x64xf32>
    %239 = arith.negf %238 : vector<8x64xf32>
    %240 = math.exp %239 : vector<8x64xf32>
    %cst_55 = arith.constant 1.000000e+00 : f32
    %241 = vector.broadcast %cst_55 : f32 to vector<8x64xf32>
    %242 = arith.addf %241, %240 : vector<8x64xf32>
    %243 = arith.divf %241, %242 : vector<8x64xf32>
    %244 = vector.extract_strided_slice %225 {offsets = [0, 128], sizes = [8, 64], strides = [1, 1]} : vector<8x192xf32> to vector<8x64xf32>
    %245 = vector.extract_strided_slice %227 {offsets = [0, 128], sizes = [8, 64], strides = [1, 1]} : vector<8x192xf32> to vector<8x64xf32>
    %246 = vector.broadcast %7 : vector<1x64xf32> to vector<8x64xf32>
    %247 = arith.addf %245, %246 : vector<8x64xf32>
    %248 = arith.mulf %235, %247 : vector<8x64xf32>
    %249 = arith.addf %244, %248 : vector<8x64xf32>
    %250 = math.tanh %249 : vector<8x64xf32>
    %cst_56 = arith.constant 1.000000e+00 : f32
    %251 = vector.broadcast %cst_56 : f32 to vector<8x64xf32>
    %252 = arith.subf %251, %243 : vector<8x64xf32>
    %253 = arith.mulf %252, %250 : vector<8x64xf32>
    %254 = arith.mulf %243, %224 : vector<8x64xf32>
    %255 = arith.addf %253, %254 : vector<8x64xf32>
    %c6 = arith.constant 6 : index
    %c0_57 = arith.constant 0 : index
    %c0_58 = arith.constant 0 : index
    %256 = vector.load %arg1[%c6, %c0_57, %c0_58] : memref<8x8x64xf32, #tpu.memory_space<vmem>>, vector<1x8x64xf32>
    %257 = vector.shape_cast %256 : vector<1x8x64xf32> to vector<8x64xf32>
    %cst_59 = arith.constant 0.000000e+00 : f32
    %258 = vector.broadcast %cst_59 : f32 to vector<8x64xf32>
    %259 = arith.cmpf ogt, %257, %258 : vector<8x64xf32>
    %260 = arith.select %259, %255, %224 : vector<8x64xi1>, vector<8x64xf32>
    %261 = vector.extract_strided_slice %5 {offsets = [56, 0], sizes = [8, 192], strides = [1, 1]} : vector<64x192xf32> to vector<8x192xf32>
    %262 = arith.truncf %260 : vector<8x64xf32> to vector<8x64xbf16>
    %cst_60 = arith.constant dense<0.000000e+00> : vector<8x192xf32>
    %263 = tpu.matmul %262, %6, %cst_60 {dimension_numbers = #tpu.dot_dimension_numbers<[1], [0], [0], [1], [0, 0, 1, 1], [], []>} : vector<8x64xbf16>, vector<64x192xbf16>, vector<8x192xf32> -> vector<8x192xf32>
    %264 = vector.extract_strided_slice %261 {offsets = [0, 0], sizes = [8, 64], strides = [1, 1]} : vector<8x192xf32> to vector<8x64xf32>
    %265 = vector.extract_strided_slice %263 {offsets = [0, 0], sizes = [8, 64], strides = [1, 1]} : vector<8x192xf32> to vector<8x64xf32>
    %266 = arith.addf %264, %265 : vector<8x64xf32>
    %267 = arith.negf %266 : vector<8x64xf32>
    %268 = math.exp %267 : vector<8x64xf32>
    %cst_61 = arith.constant 1.000000e+00 : f32
    %269 = vector.broadcast %cst_61 : f32 to vector<8x64xf32>
    %270 = arith.addf %269, %268 : vector<8x64xf32>
    %271 = arith.divf %269, %270 : vector<8x64xf32>
    %272 = vector.extract_strided_slice %261 {offsets = [0, 64], sizes = [8, 64], strides = [1, 1]} : vector<8x192xf32> to vector<8x64xf32>
    %273 = vector.extract_strided_slice %263 {offsets = [0, 64], sizes = [8, 64], strides = [1, 1]} : vector<8x192xf32> to vector<8x64xf32>
    %274 = arith.addf %272, %273 : vector<8x64xf32>
    %275 = arith.negf %274 : vector<8x64xf32>
    %276 = math.exp %275 : vector<8x64xf32>
    %cst_62 = arith.constant 1.000000e+00 : f32
    %277 = vector.broadcast %cst_62 : f32 to vector<8x64xf32>
    %278 = arith.addf %277, %276 : vector<8x64xf32>
    %279 = arith.divf %277, %278 : vector<8x64xf32>
    %280 = vector.extract_strided_slice %261 {offsets = [0, 128], sizes = [8, 64], strides = [1, 1]} : vector<8x192xf32> to vector<8x64xf32>
    %281 = vector.extract_strided_slice %263 {offsets = [0, 128], sizes = [8, 64], strides = [1, 1]} : vector<8x192xf32> to vector<8x64xf32>
    %282 = vector.broadcast %7 : vector<1x64xf32> to vector<8x64xf32>
    %283 = arith.addf %281, %282 : vector<8x64xf32>
    %284 = arith.mulf %271, %283 : vector<8x64xf32>
    %285 = arith.addf %280, %284 : vector<8x64xf32>
    %286 = math.tanh %285 : vector<8x64xf32>
    %cst_63 = arith.constant 1.000000e+00 : f32
    %287 = vector.broadcast %cst_63 : f32 to vector<8x64xf32>
    %288 = arith.subf %287, %279 : vector<8x64xf32>
    %289 = arith.mulf %288, %286 : vector<8x64xf32>
    %290 = arith.mulf %279, %260 : vector<8x64xf32>
    %291 = arith.addf %289, %290 : vector<8x64xf32>
    %c7 = arith.constant 7 : index
    %c0_64 = arith.constant 0 : index
    %c0_65 = arith.constant 0 : index
    %292 = vector.load %arg1[%c7, %c0_64, %c0_65] : memref<8x8x64xf32, #tpu.memory_space<vmem>>, vector<1x8x64xf32>
    %293 = vector.shape_cast %292 : vector<1x8x64xf32> to vector<8x64xf32>
    %cst_66 = arith.constant 0.000000e+00 : f32
    %294 = vector.broadcast %cst_66 : f32 to vector<8x64xf32>
    %295 = arith.cmpf ogt, %293, %294 : vector<8x64xf32>
    %296 = arith.select %295, %291, %260 : vector<8x64xi1>, vector<8x64xf32>
    %297 = arith.addf %44, %80 : vector<8x64xf32>
    %298 = arith.addf %297, %116 : vector<8x64xf32>
    %299 = arith.addf %298, %152 : vector<8x64xf32>
    %300 = arith.addf %299, %188 : vector<8x64xf32>
    %301 = arith.addf %300, %224 : vector<8x64xf32>
    %302 = arith.addf %301, %260 : vector<8x64xf32>
    %303 = arith.addf %302, %296 : vector<8x64xf32>
    %cst_67 = arith.constant 1.250000e-01 : f32
    %304 = vector.broadcast %cst_67 : f32 to vector<8x64xf32>
    %305 = arith.mulf %303, %304 : vector<8x64xf32>
    %306 = arith.truncf %305 : vector<8x64xf32> to vector<8x64xbf16>
    %c0_68 = arith.constant 0 : index
    %c0_69 = arith.constant 0 : index
    %307 = vector.load %arg6[%c0_68, %c0_69] : memref<64x49xbf16, #tpu.memory_space<vmem>>, vector<64x49xbf16>
    %cst_70 = arith.constant dense<0.000000e+00> : vector<8x49xf32>
    %308 = tpu.matmul %306, %307, %cst_70 {dimension_numbers = #tpu.dot_dimension_numbers<[1], [0], [0], [1], [0, 0, 1, 1], [], []>} : vector<8x64xbf16>, vector<64x49xbf16>, vector<8x49xf32> -> vector<8x49xf32>
    %c0_71 = arith.constant 0 : index
    %c0_72 = arith.constant 0 : index
    %309 = vector.load %arg7[%c0_71, %c0_72] : memref<1x49xf32, #tpu.memory_space<vmem>>, vector<1x49xf32>
    %310 = vector.broadcast %309 : vector<1x49xf32> to vector<8x49xf32>
    %311 = arith.addf %308, %310 : vector<8x49xf32>
    %312 = arith.negf %311 : vector<8x49xf32>
    %313 = math.exp %312 : vector<8x49xf32>
    %cst_73 = arith.constant 1.000000e+00 : f32
    %314 = vector.broadcast %cst_73 : f32 to vector<8x49xf32>
    %315 = arith.addf %314, %313 : vector<8x49xf32>
    %316 = arith.divf %314, %315 : vector<8x49xf32>
    %317 = arith.truncf %316 : vector<8x49xf32> to vector<8x49xbf16>
    %c0_74 = arith.constant 0 : index
    %c0_75 = arith.constant 0 : index
    %318 = vector.load %arg10[%c0_74, %c0_75] : memref<49x5xbf16, #tpu.memory_space<vmem>>, vector<49x5xbf16>
    %cst_76 = arith.constant dense<0.000000e+00> : vector<8x5xf32>
    %319 = tpu.matmul %317, %318, %cst_76 {dimension_numbers = #tpu.dot_dimension_numbers<[1], [0], [0], [1], [0, 0, 1, 1], [], []>} : vector<8x49xbf16>, vector<49x5xbf16>, vector<8x5xf32> -> vector<8x5xf32>
    %c0_77 = arith.constant 0 : index
    %c0_78 = arith.constant 0 : index
    %320 = vector.load %arg11[%c0_77, %c0_78] : memref<1x5xf32, #tpu.memory_space<vmem>>, vector<1x5xf32>
    %321 = vector.broadcast %320 : vector<1x5xf32> to vector<8x5xf32>
    %322 = arith.addf %319, %321 : vector<8x5xf32>
    %323 = tpu.concatenate %44, %80, %116, %152, %188, %224, %260, %296 in 0 : vector<8x64xf32>, vector<8x64xf32>, vector<8x64xf32>, vector<8x64xf32>, vector<8x64xf32>, vector<8x64xf32>, vector<8x64xf32>, vector<8x64xf32> -> vector<64x64xf32>
    %324 = arith.truncf %323 : vector<64x64xf32> to vector<64x64xbf16>
    %325 = vector.extract_strided_slice %324 {offsets = [0, 0], sizes = [64, 32], strides = [1, 1]} : vector<64x64xbf16> to vector<64x32xbf16>
    %c0_79 = arith.constant 0 : index
    %c0_80 = arith.constant 0 : index
    %326 = vector.load %arg8[%c0_79, %c0_80] : memref<32x5xbf16, #tpu.memory_space<vmem>>, vector<32x5xbf16>
    %cst_81 = arith.constant dense<0.000000e+00> : vector<64x5xf32>
    %327 = tpu.matmul %325, %326, %cst_81 {dimension_numbers = #tpu.dot_dimension_numbers<[1], [0], [0], [1], [0, 0, 1, 1], [], []>} : vector<64x32xbf16>, vector<32x5xbf16>, vector<64x5xf32> -> vector<64x5xf32>
    %328 = vector.extract_strided_slice %324 {offsets = [0, 32], sizes = [64, 32], strides = [1, 1]} : vector<64x64xbf16> to vector<64x32xbf16>
    %c0_82 = arith.constant 0 : index
    %c0_83 = arith.constant 0 : index
    %329 = vector.load %arg9[%c0_82, %c0_83] : memref<32x5xbf16, #tpu.memory_space<vmem>>, vector<32x5xbf16>
    %cst_84 = arith.constant dense<0.000000e+00> : vector<64x5xf32>
    %330 = tpu.matmul %328, %329, %cst_84 {dimension_numbers = #tpu.dot_dimension_numbers<[1], [0], [0], [1], [0, 0, 1, 1], [], []>} : vector<64x32xbf16>, vector<32x5xbf16>, vector<64x5xf32> -> vector<64x5xf32>
    %c0_85 = arith.constant 0 : index
    %c0_86 = arith.constant 0 : index
    %331 = vector.load %arg14[%c0_85, %c0_86] : memref<5x5xf32, #tpu.memory_space<vmem>>, vector<5x5xf32>
    %332 = tpu.iota {dimensions = array<i32: 1>} : vector<8x5xi32>
    %333 = arith.sitofp %332 : vector<8x5xi32> to vector<8x5xf32>
    %c0_87 = arith.constant 0 : index
    %c0_88 = arith.constant 0 : index
    %334 = vector.load %arg12[%c0_87, %c0_88] : memref<1x5xf32, #tpu.memory_space<vmem>>, vector<1x5xf32>
    %335 = vector.extract_strided_slice %327 {offsets = [0, 0], sizes = [8, 5], strides = [1, 1]} : vector<64x5xf32> to vector<8x5xf32>
    %336 = vector.extract_strided_slice %330 {offsets = [56, 0], sizes = [8, 5], strides = [1, 1]} : vector<64x5xf32> to vector<8x5xf32>
    %337 = arith.addf %335, %336 : vector<8x5xf32>
    %338 = arith.addf %337, %322 : vector<8x5xf32>
    %339 = vector.broadcast %334 : vector<1x5xf32> to vector<8x5xf32>
    %340 = arith.addf %339, %338 : vector<8x5xf32>
    %341 = vector.extract_strided_slice %340 {offsets = [0, 0], sizes = [8, 1], strides = [1, 1]} : vector<8x5xf32> to vector<8x1xf32>
    %342 = vector.extract_strided_slice %331 {offsets = [0, 0], sizes = [1, 5], strides = [1, 1]} : vector<5x5xf32> to vector<1x5xf32>
    %343 = vector.broadcast %341 : vector<8x1xf32> to vector<8x5xf32>
    %344 = vector.broadcast %342 : vector<1x5xf32> to vector<8x5xf32>
    %345 = arith.addf %343, %344 : vector<8x5xf32>
    %cst_89 = arith.constant 0.000000e+00 : f32
    %346 = vector.broadcast %cst_89 : f32 to vector<8x5xf32>
    %347 = vector.extract_strided_slice %340 {offsets = [0, 1], sizes = [8, 1], strides = [1, 1]} : vector<8x5xf32> to vector<8x1xf32>
    %348 = vector.extract_strided_slice %331 {offsets = [1, 0], sizes = [1, 5], strides = [1, 1]} : vector<5x5xf32> to vector<1x5xf32>
    %349 = vector.broadcast %347 : vector<8x1xf32> to vector<8x5xf32>
    %350 = vector.broadcast %348 : vector<1x5xf32> to vector<8x5xf32>
    %351 = arith.addf %349, %350 : vector<8x5xf32>
    %352 = arith.cmpf ogt, %351, %345 : vector<8x5xf32>
    %353 = arith.select %352, %351, %345 : vector<8x5xi1>, vector<8x5xf32>
    %cst_90 = arith.constant 1.000000e+00 : f32
    %354 = vector.broadcast %cst_90 : f32 to vector<8x5xf32>
    %355 = arith.select %352, %354, %346 : vector<8x5xi1>, vector<8x5xf32>
    %356 = vector.extract_strided_slice %340 {offsets = [0, 2], sizes = [8, 1], strides = [1, 1]} : vector<8x5xf32> to vector<8x1xf32>
    %357 = vector.extract_strided_slice %331 {offsets = [2, 0], sizes = [1, 5], strides = [1, 1]} : vector<5x5xf32> to vector<1x5xf32>
    %358 = vector.broadcast %356 : vector<8x1xf32> to vector<8x5xf32>
    %359 = vector.broadcast %357 : vector<1x5xf32> to vector<8x5xf32>
    %360 = arith.addf %358, %359 : vector<8x5xf32>
    %361 = arith.cmpf ogt, %360, %353 : vector<8x5xf32>
    %362 = arith.select %361, %360, %353 : vector<8x5xi1>, vector<8x5xf32>
    %cst_91 = arith.constant 2.000000e+00 : f32
    %363 = vector.broadcast %cst_91 : f32 to vector<8x5xf32>
    %364 = arith.select %361, %363, %355 : vector<8x5xi1>, vector<8x5xf32>
    %365 = vector.extract_strided_slice %340 {offsets = [0, 3], sizes = [8, 1], strides = [1, 1]} : vector<8x5xf32> to vector<8x1xf32>
    %366 = vector.extract_strided_slice %331 {offsets = [3, 0], sizes = [1, 5], strides = [1, 1]} : vector<5x5xf32> to vector<1x5xf32>
    %367 = vector.broadcast %365 : vector<8x1xf32> to vector<8x5xf32>
    %368 = vector.broadcast %366 : vector<1x5xf32> to vector<8x5xf32>
    %369 = arith.addf %367, %368 : vector<8x5xf32>
    %370 = arith.cmpf ogt, %369, %362 : vector<8x5xf32>
    %371 = arith.select %370, %369, %362 : vector<8x5xi1>, vector<8x5xf32>
    %cst_92 = arith.constant 3.000000e+00 : f32
    %372 = vector.broadcast %cst_92 : f32 to vector<8x5xf32>
    %373 = arith.select %370, %372, %364 : vector<8x5xi1>, vector<8x5xf32>
    %374 = vector.extract_strided_slice %340 {offsets = [0, 4], sizes = [8, 1], strides = [1, 1]} : vector<8x5xf32> to vector<8x1xf32>
    %375 = vector.extract_strided_slice %331 {offsets = [4, 0], sizes = [1, 5], strides = [1, 1]} : vector<5x5xf32> to vector<1x5xf32>
    %376 = vector.broadcast %374 : vector<8x1xf32> to vector<8x5xf32>
    %377 = vector.broadcast %375 : vector<1x5xf32> to vector<8x5xf32>
    %378 = arith.addf %376, %377 : vector<8x5xf32>
    %379 = arith.cmpf ogt, %378, %371 : vector<8x5xf32>
    %380 = arith.select %379, %378, %371 : vector<8x5xi1>, vector<8x5xf32>
    %cst_93 = arith.constant 4.000000e+00 : f32
    %381 = vector.broadcast %cst_93 : f32 to vector<8x5xf32>
    %382 = arith.select %379, %381, %373 : vector<8x5xi1>, vector<8x5xf32>
    %c1_94 = arith.constant 1 : index
    %c0_95 = arith.constant 0 : index
    %c0_96 = arith.constant 0 : index
    %383 = vector.load %arg1[%c1_94, %c0_95, %c0_96] : memref<8x8x64xf32, #tpu.memory_space<vmem>>, vector<1x8x64xf32>
    %384 = vector.shape_cast %383 : vector<1x8x64xf32> to vector<8x64xf32>
    %385 = vector.extract_strided_slice %384 {offsets = [0, 0], sizes = [8, 1], strides = [1, 1]} : vector<8x64xf32> to vector<8x1xf32>
    %cst_97 = arith.constant 0.000000e+00 : f32
    %386 = vector.broadcast %cst_97 : f32 to vector<8x1xf32>
    %387 = arith.cmpf ogt, %385, %386 : vector<8x1xf32>
    %388 = vector.extract_strided_slice %327 {offsets = [8, 0], sizes = [8, 5], strides = [1, 1]} : vector<64x5xf32> to vector<8x5xf32>
    %389 = vector.extract_strided_slice %330 {offsets = [48, 0], sizes = [8, 5], strides = [1, 1]} : vector<64x5xf32> to vector<8x5xf32>
    %390 = arith.addf %388, %389 : vector<8x5xf32>
    %391 = arith.addf %390, %322 : vector<8x5xf32>
    %392 = arith.addf %380, %391 : vector<8x5xf32>
    %393 = vector.shape_cast %387 : vector<8x1xi1> to vector<8x1xi1>
    %394 = vector.broadcast %393 : vector<8x1xi1> to vector<8x5xi1>
    %395 = arith.select %394, %392, %340 : vector<8x5xi1>, vector<8x5xf32>
    %396 = vector.extract_strided_slice %395 {offsets = [0, 0], sizes = [8, 1], strides = [1, 1]} : vector<8x5xf32> to vector<8x1xf32>
    %397 = vector.extract_strided_slice %331 {offsets = [0, 0], sizes = [1, 5], strides = [1, 1]} : vector<5x5xf32> to vector<1x5xf32>
    %398 = vector.broadcast %396 : vector<8x1xf32> to vector<8x5xf32>
    %399 = vector.broadcast %397 : vector<1x5xf32> to vector<8x5xf32>
    %400 = arith.addf %398, %399 : vector<8x5xf32>
    %cst_98 = arith.constant 0.000000e+00 : f32
    %401 = vector.broadcast %cst_98 : f32 to vector<8x5xf32>
    %402 = vector.extract_strided_slice %395 {offsets = [0, 1], sizes = [8, 1], strides = [1, 1]} : vector<8x5xf32> to vector<8x1xf32>
    %403 = vector.extract_strided_slice %331 {offsets = [1, 0], sizes = [1, 5], strides = [1, 1]} : vector<5x5xf32> to vector<1x5xf32>
    %404 = vector.broadcast %402 : vector<8x1xf32> to vector<8x5xf32>
    %405 = vector.broadcast %403 : vector<1x5xf32> to vector<8x5xf32>
    %406 = arith.addf %404, %405 : vector<8x5xf32>
    %407 = arith.cmpf ogt, %406, %400 : vector<8x5xf32>
    %408 = arith.select %407, %406, %400 : vector<8x5xi1>, vector<8x5xf32>
    %cst_99 = arith.constant 1.000000e+00 : f32
    %409 = vector.broadcast %cst_99 : f32 to vector<8x5xf32>
    %410 = arith.select %407, %409, %401 : vector<8x5xi1>, vector<8x5xf32>
    %411 = vector.extract_strided_slice %395 {offsets = [0, 2], sizes = [8, 1], strides = [1, 1]} : vector<8x5xf32> to vector<8x1xf32>
    %412 = vector.extract_strided_slice %331 {offsets = [2, 0], sizes = [1, 5], strides = [1, 1]} : vector<5x5xf32> to vector<1x5xf32>
    %413 = vector.broadcast %411 : vector<8x1xf32> to vector<8x5xf32>
    %414 = vector.broadcast %412 : vector<1x5xf32> to vector<8x5xf32>
    %415 = arith.addf %413, %414 : vector<8x5xf32>
    %416 = arith.cmpf ogt, %415, %408 : vector<8x5xf32>
    %417 = arith.select %416, %415, %408 : vector<8x5xi1>, vector<8x5xf32>
    %cst_100 = arith.constant 2.000000e+00 : f32
    %418 = vector.broadcast %cst_100 : f32 to vector<8x5xf32>
    %419 = arith.select %416, %418, %410 : vector<8x5xi1>, vector<8x5xf32>
    %420 = vector.extract_strided_slice %395 {offsets = [0, 3], sizes = [8, 1], strides = [1, 1]} : vector<8x5xf32> to vector<8x1xf32>
    %421 = vector.extract_strided_slice %331 {offsets = [3, 0], sizes = [1, 5], strides = [1, 1]} : vector<5x5xf32> to vector<1x5xf32>
    %422 = vector.broadcast %420 : vector<8x1xf32> to vector<8x5xf32>
    %423 = vector.broadcast %421 : vector<1x5xf32> to vector<8x5xf32>
    %424 = arith.addf %422, %423 : vector<8x5xf32>
    %425 = arith.cmpf ogt, %424, %417 : vector<8x5xf32>
    %426 = arith.select %425, %424, %417 : vector<8x5xi1>, vector<8x5xf32>
    %cst_101 = arith.constant 3.000000e+00 : f32
    %427 = vector.broadcast %cst_101 : f32 to vector<8x5xf32>
    %428 = arith.select %425, %427, %419 : vector<8x5xi1>, vector<8x5xf32>
    %429 = vector.extract_strided_slice %395 {offsets = [0, 4], sizes = [8, 1], strides = [1, 1]} : vector<8x5xf32> to vector<8x1xf32>
    %430 = vector.extract_strided_slice %331 {offsets = [4, 0], sizes = [1, 5], strides = [1, 1]} : vector<5x5xf32> to vector<1x5xf32>
    %431 = vector.broadcast %429 : vector<8x1xf32> to vector<8x5xf32>
    %432 = vector.broadcast %430 : vector<1x5xf32> to vector<8x5xf32>
    %433 = arith.addf %431, %432 : vector<8x5xf32>
    %434 = arith.cmpf ogt, %433, %426 : vector<8x5xf32>
    %435 = arith.select %434, %433, %426 : vector<8x5xi1>, vector<8x5xf32>
    %cst_102 = arith.constant 4.000000e+00 : f32
    %436 = vector.broadcast %cst_102 : f32 to vector<8x5xf32>
    %437 = arith.select %434, %436, %428 : vector<8x5xi1>, vector<8x5xf32>
    %c2_103 = arith.constant 2 : index
    %c0_104 = arith.constant 0 : index
    %c0_105 = arith.constant 0 : index
    %438 = vector.load %arg1[%c2_103, %c0_104, %c0_105] : memref<8x8x64xf32, #tpu.memory_space<vmem>>, vector<1x8x64xf32>
    %439 = vector.shape_cast %438 : vector<1x8x64xf32> to vector<8x64xf32>
    %440 = vector.extract_strided_slice %439 {offsets = [0, 0], sizes = [8, 1], strides = [1, 1]} : vector<8x64xf32> to vector<8x1xf32>
    %cst_106 = arith.constant 0.000000e+00 : f32
    %441 = vector.broadcast %cst_106 : f32 to vector<8x1xf32>
    %442 = arith.cmpf ogt, %440, %441 : vector<8x1xf32>
    %443 = vector.extract_strided_slice %327 {offsets = [16, 0], sizes = [8, 5], strides = [1, 1]} : vector<64x5xf32> to vector<8x5xf32>
    %444 = vector.extract_strided_slice %330 {offsets = [40, 0], sizes = [8, 5], strides = [1, 1]} : vector<64x5xf32> to vector<8x5xf32>
    %445 = arith.addf %443, %444 : vector<8x5xf32>
    %446 = arith.addf %445, %322 : vector<8x5xf32>
    %447 = arith.addf %435, %446 : vector<8x5xf32>
    %448 = vector.shape_cast %442 : vector<8x1xi1> to vector<8x1xi1>
    %449 = vector.broadcast %448 : vector<8x1xi1> to vector<8x5xi1>
    %450 = arith.select %449, %447, %395 : vector<8x5xi1>, vector<8x5xf32>
    %451 = vector.extract_strided_slice %450 {offsets = [0, 0], sizes = [8, 1], strides = [1, 1]} : vector<8x5xf32> to vector<8x1xf32>
    %452 = vector.extract_strided_slice %331 {offsets = [0, 0], sizes = [1, 5], strides = [1, 1]} : vector<5x5xf32> to vector<1x5xf32>
    %453 = vector.broadcast %451 : vector<8x1xf32> to vector<8x5xf32>
    %454 = vector.broadcast %452 : vector<1x5xf32> to vector<8x5xf32>
    %455 = arith.addf %453, %454 : vector<8x5xf32>
    %cst_107 = arith.constant 0.000000e+00 : f32
    %456 = vector.broadcast %cst_107 : f32 to vector<8x5xf32>
    %457 = vector.extract_strided_slice %450 {offsets = [0, 1], sizes = [8, 1], strides = [1, 1]} : vector<8x5xf32> to vector<8x1xf32>
    %458 = vector.extract_strided_slice %331 {offsets = [1, 0], sizes = [1, 5], strides = [1, 1]} : vector<5x5xf32> to vector<1x5xf32>
    %459 = vector.broadcast %457 : vector<8x1xf32> to vector<8x5xf32>
    %460 = vector.broadcast %458 : vector<1x5xf32> to vector<8x5xf32>
    %461 = arith.addf %459, %460 : vector<8x5xf32>
    %462 = arith.cmpf ogt, %461, %455 : vector<8x5xf32>
    %463 = arith.select %462, %461, %455 : vector<8x5xi1>, vector<8x5xf32>
    %cst_108 = arith.constant 1.000000e+00 : f32
    %464 = vector.broadcast %cst_108 : f32 to vector<8x5xf32>
    %465 = arith.select %462, %464, %456 : vector<8x5xi1>, vector<8x5xf32>
    %466 = vector.extract_strided_slice %450 {offsets = [0, 2], sizes = [8, 1], strides = [1, 1]} : vector<8x5xf32> to vector<8x1xf32>
    %467 = vector.extract_strided_slice %331 {offsets = [2, 0], sizes = [1, 5], strides = [1, 1]} : vector<5x5xf32> to vector<1x5xf32>
    %468 = vector.broadcast %466 : vector<8x1xf32> to vector<8x5xf32>
    %469 = vector.broadcast %467 : vector<1x5xf32> to vector<8x5xf32>
    %470 = arith.addf %468, %469 : vector<8x5xf32>
    %471 = arith.cmpf ogt, %470, %463 : vector<8x5xf32>
    %472 = arith.select %471, %470, %463 : vector<8x5xi1>, vector<8x5xf32>
    %cst_109 = arith.constant 2.000000e+00 : f32
    %473 = vector.broadcast %cst_109 : f32 to vector<8x5xf32>
    %474 = arith.select %471, %473, %465 : vector<8x5xi1>, vector<8x5xf32>
    %475 = vector.extract_strided_slice %450 {offsets = [0, 3], sizes = [8, 1], strides = [1, 1]} : vector<8x5xf32> to vector<8x1xf32>
    %476 = vector.extract_strided_slice %331 {offsets = [3, 0], sizes = [1, 5], strides = [1, 1]} : vector<5x5xf32> to vector<1x5xf32>
    %477 = vector.broadcast %475 : vector<8x1xf32> to vector<8x5xf32>
    %478 = vector.broadcast %476 : vector<1x5xf32> to vector<8x5xf32>
    %479 = arith.addf %477, %478 : vector<8x5xf32>
    %480 = arith.cmpf ogt, %479, %472 : vector<8x5xf32>
    %481 = arith.select %480, %479, %472 : vector<8x5xi1>, vector<8x5xf32>
    %cst_110 = arith.constant 3.000000e+00 : f32
    %482 = vector.broadcast %cst_110 : f32 to vector<8x5xf32>
    %483 = arith.select %480, %482, %474 : vector<8x5xi1>, vector<8x5xf32>
    %484 = vector.extract_strided_slice %450 {offsets = [0, 4], sizes = [8, 1], strides = [1, 1]} : vector<8x5xf32> to vector<8x1xf32>
    %485 = vector.extract_strided_slice %331 {offsets = [4, 0], sizes = [1, 5], strides = [1, 1]} : vector<5x5xf32> to vector<1x5xf32>
    %486 = vector.broadcast %484 : vector<8x1xf32> to vector<8x5xf32>
    %487 = vector.broadcast %485 : vector<1x5xf32> to vector<8x5xf32>
    %488 = arith.addf %486, %487 : vector<8x5xf32>
    %489 = arith.cmpf ogt, %488, %481 : vector<8x5xf32>
    %490 = arith.select %489, %488, %481 : vector<8x5xi1>, vector<8x5xf32>
    %cst_111 = arith.constant 4.000000e+00 : f32
    %491 = vector.broadcast %cst_111 : f32 to vector<8x5xf32>
    %492 = arith.select %489, %491, %483 : vector<8x5xi1>, vector<8x5xf32>
    %c3_112 = arith.constant 3 : index
    %c0_113 = arith.constant 0 : index
    %c0_114 = arith.constant 0 : index
    %493 = vector.load %arg1[%c3_112, %c0_113, %c0_114] : memref<8x8x64xf32, #tpu.memory_space<vmem>>, vector<1x8x64xf32>
    %494 = vector.shape_cast %493 : vector<1x8x64xf32> to vector<8x64xf32>
    %495 = vector.extract_strided_slice %494 {offsets = [0, 0], sizes = [8, 1], strides = [1, 1]} : vector<8x64xf32> to vector<8x1xf32>
    %cst_115 = arith.constant 0.000000e+00 : f32
    %496 = vector.broadcast %cst_115 : f32 to vector<8x1xf32>
    %497 = arith.cmpf ogt, %495, %496 : vector<8x1xf32>
    %498 = vector.extract_strided_slice %327 {offsets = [24, 0], sizes = [8, 5], strides = [1, 1]} : vector<64x5xf32> to vector<8x5xf32>
    %499 = vector.extract_strided_slice %330 {offsets = [32, 0], sizes = [8, 5], strides = [1, 1]} : vector<64x5xf32> to vector<8x5xf32>
    %500 = arith.addf %498, %499 : vector<8x5xf32>
    %501 = arith.addf %500, %322 : vector<8x5xf32>
    %502 = arith.addf %490, %501 : vector<8x5xf32>
    %503 = vector.shape_cast %497 : vector<8x1xi1> to vector<8x1xi1>
    %504 = vector.broadcast %503 : vector<8x1xi1> to vector<8x5xi1>
    %505 = arith.select %504, %502, %450 : vector<8x5xi1>, vector<8x5xf32>
    %506 = vector.extract_strided_slice %505 {offsets = [0, 0], sizes = [8, 1], strides = [1, 1]} : vector<8x5xf32> to vector<8x1xf32>
    %507 = vector.extract_strided_slice %331 {offsets = [0, 0], sizes = [1, 5], strides = [1, 1]} : vector<5x5xf32> to vector<1x5xf32>
    %508 = vector.broadcast %506 : vector<8x1xf32> to vector<8x5xf32>
    %509 = vector.broadcast %507 : vector<1x5xf32> to vector<8x5xf32>
    %510 = arith.addf %508, %509 : vector<8x5xf32>
    %cst_116 = arith.constant 0.000000e+00 : f32
    %511 = vector.broadcast %cst_116 : f32 to vector<8x5xf32>
    %512 = vector.extract_strided_slice %505 {offsets = [0, 1], sizes = [8, 1], strides = [1, 1]} : vector<8x5xf32> to vector<8x1xf32>
    %513 = vector.extract_strided_slice %331 {offsets = [1, 0], sizes = [1, 5], strides = [1, 1]} : vector<5x5xf32> to vector<1x5xf32>
    %514 = vector.broadcast %512 : vector<8x1xf32> to vector<8x5xf32>
    %515 = vector.broadcast %513 : vector<1x5xf32> to vector<8x5xf32>
    %516 = arith.addf %514, %515 : vector<8x5xf32>
    %517 = arith.cmpf ogt, %516, %510 : vector<8x5xf32>
    %518 = arith.select %517, %516, %510 : vector<8x5xi1>, vector<8x5xf32>
    %cst_117 = arith.constant 1.000000e+00 : f32
    %519 = vector.broadcast %cst_117 : f32 to vector<8x5xf32>
    %520 = arith.select %517, %519, %511 : vector<8x5xi1>, vector<8x5xf32>
    %521 = vector.extract_strided_slice %505 {offsets = [0, 2], sizes = [8, 1], strides = [1, 1]} : vector<8x5xf32> to vector<8x1xf32>
    %522 = vector.extract_strided_slice %331 {offsets = [2, 0], sizes = [1, 5], strides = [1, 1]} : vector<5x5xf32> to vector<1x5xf32>
    %523 = vector.broadcast %521 : vector<8x1xf32> to vector<8x5xf32>
    %524 = vector.broadcast %522 : vector<1x5xf32> to vector<8x5xf32>
    %525 = arith.addf %523, %524 : vector<8x5xf32>
    %526 = arith.cmpf ogt, %525, %518 : vector<8x5xf32>
    %527 = arith.select %526, %525, %518 : vector<8x5xi1>, vector<8x5xf32>
    %cst_118 = arith.constant 2.000000e+00 : f32
    %528 = vector.broadcast %cst_118 : f32 to vector<8x5xf32>
    %529 = arith.select %526, %528, %520 : vector<8x5xi1>, vector<8x5xf32>
    %530 = vector.extract_strided_slice %505 {offsets = [0, 3], sizes = [8, 1], strides = [1, 1]} : vector<8x5xf32> to vector<8x1xf32>
    %531 = vector.extract_strided_slice %331 {offsets = [3, 0], sizes = [1, 5], strides = [1, 1]} : vector<5x5xf32> to vector<1x5xf32>
    %532 = vector.broadcast %530 : vector<8x1xf32> to vector<8x5xf32>
    %533 = vector.broadcast %531 : vector<1x5xf32> to vector<8x5xf32>
    %534 = arith.addf %532, %533 : vector<8x5xf32>
    %535 = arith.cmpf ogt, %534, %527 : vector<8x5xf32>
    %536 = arith.select %535, %534, %527 : vector<8x5xi1>, vector<8x5xf32>
    %cst_119 = arith.constant 3.000000e+00 : f32
    %537 = vector.broadcast %cst_119 : f32 to vector<8x5xf32>
    %538 = arith.select %535, %537, %529 : vector<8x5xi1>, vector<8x5xf32>
    %539 = vector.extract_strided_slice %505 {offsets = [0, 4], sizes = [8, 1], strides = [1, 1]} : vector<8x5xf32> to vector<8x1xf32>
    %540 = vector.extract_strided_slice %331 {offsets = [4, 0], sizes = [1, 5], strides = [1, 1]} : vector<5x5xf32> to vector<1x5xf32>
    %541 = vector.broadcast %539 : vector<8x1xf32> to vector<8x5xf32>
    %542 = vector.broadcast %540 : vector<1x5xf32> to vector<8x5xf32>
    %543 = arith.addf %541, %542 : vector<8x5xf32>
    %544 = arith.cmpf ogt, %543, %536 : vector<8x5xf32>
    %545 = arith.select %544, %543, %536 : vector<8x5xi1>, vector<8x5xf32>
    %cst_120 = arith.constant 4.000000e+00 : f32
    %546 = vector.broadcast %cst_120 : f32 to vector<8x5xf32>
    %547 = arith.select %544, %546, %538 : vector<8x5xi1>, vector<8x5xf32>
    %c4_121 = arith.constant 4 : index
    %c0_122 = arith.constant 0 : index
    %c0_123 = arith.constant 0 : index
    %548 = vector.load %arg1[%c4_121, %c0_122, %c0_123] : memref<8x8x64xf32, #tpu.memory_space<vmem>>, vector<1x8x64xf32>
    %549 = vector.shape_cast %548 : vector<1x8x64xf32> to vector<8x64xf32>
    %550 = vector.extract_strided_slice %549 {offsets = [0, 0], sizes = [8, 1], strides = [1, 1]} : vector<8x64xf32> to vector<8x1xf32>
    %cst_124 = arith.constant 0.000000e+00 : f32
    %551 = vector.broadcast %cst_124 : f32 to vector<8x1xf32>
    %552 = arith.cmpf ogt, %550, %551 : vector<8x1xf32>
    %553 = vector.extract_strided_slice %327 {offsets = [32, 0], sizes = [8, 5], strides = [1, 1]} : vector<64x5xf32> to vector<8x5xf32>
    %554 = vector.extract_strided_slice %330 {offsets = [24, 0], sizes = [8, 5], strides = [1, 1]} : vector<64x5xf32> to vector<8x5xf32>
    %555 = arith.addf %553, %554 : vector<8x5xf32>
    %556 = arith.addf %555, %322 : vector<8x5xf32>
    %557 = arith.addf %545, %556 : vector<8x5xf32>
    %558 = vector.shape_cast %552 : vector<8x1xi1> to vector<8x1xi1>
    %559 = vector.broadcast %558 : vector<8x1xi1> to vector<8x5xi1>
    %560 = arith.select %559, %557, %505 : vector<8x5xi1>, vector<8x5xf32>
    %561 = vector.extract_strided_slice %560 {offsets = [0, 0], sizes = [8, 1], strides = [1, 1]} : vector<8x5xf32> to vector<8x1xf32>
    %562 = vector.extract_strided_slice %331 {offsets = [0, 0], sizes = [1, 5], strides = [1, 1]} : vector<5x5xf32> to vector<1x5xf32>
    %563 = vector.broadcast %561 : vector<8x1xf32> to vector<8x5xf32>
    %564 = vector.broadcast %562 : vector<1x5xf32> to vector<8x5xf32>
    %565 = arith.addf %563, %564 : vector<8x5xf32>
    %cst_125 = arith.constant 0.000000e+00 : f32
    %566 = vector.broadcast %cst_125 : f32 to vector<8x5xf32>
    %567 = vector.extract_strided_slice %560 {offsets = [0, 1], sizes = [8, 1], strides = [1, 1]} : vector<8x5xf32> to vector<8x1xf32>
    %568 = vector.extract_strided_slice %331 {offsets = [1, 0], sizes = [1, 5], strides = [1, 1]} : vector<5x5xf32> to vector<1x5xf32>
    %569 = vector.broadcast %567 : vector<8x1xf32> to vector<8x5xf32>
    %570 = vector.broadcast %568 : vector<1x5xf32> to vector<8x5xf32>
    %571 = arith.addf %569, %570 : vector<8x5xf32>
    %572 = arith.cmpf ogt, %571, %565 : vector<8x5xf32>
    %573 = arith.select %572, %571, %565 : vector<8x5xi1>, vector<8x5xf32>
    %cst_126 = arith.constant 1.000000e+00 : f32
    %574 = vector.broadcast %cst_126 : f32 to vector<8x5xf32>
    %575 = arith.select %572, %574, %566 : vector<8x5xi1>, vector<8x5xf32>
    %576 = vector.extract_strided_slice %560 {offsets = [0, 2], sizes = [8, 1], strides = [1, 1]} : vector<8x5xf32> to vector<8x1xf32>
    %577 = vector.extract_strided_slice %331 {offsets = [2, 0], sizes = [1, 5], strides = [1, 1]} : vector<5x5xf32> to vector<1x5xf32>
    %578 = vector.broadcast %576 : vector<8x1xf32> to vector<8x5xf32>
    %579 = vector.broadcast %577 : vector<1x5xf32> to vector<8x5xf32>
    %580 = arith.addf %578, %579 : vector<8x5xf32>
    %581 = arith.cmpf ogt, %580, %573 : vector<8x5xf32>
    %582 = arith.select %581, %580, %573 : vector<8x5xi1>, vector<8x5xf32>
    %cst_127 = arith.constant 2.000000e+00 : f32
    %583 = vector.broadcast %cst_127 : f32 to vector<8x5xf32>
    %584 = arith.select %581, %583, %575 : vector<8x5xi1>, vector<8x5xf32>
    %585 = vector.extract_strided_slice %560 {offsets = [0, 3], sizes = [8, 1], strides = [1, 1]} : vector<8x5xf32> to vector<8x1xf32>
    %586 = vector.extract_strided_slice %331 {offsets = [3, 0], sizes = [1, 5], strides = [1, 1]} : vector<5x5xf32> to vector<1x5xf32>
    %587 = vector.broadcast %585 : vector<8x1xf32> to vector<8x5xf32>
    %588 = vector.broadcast %586 : vector<1x5xf32> to vector<8x5xf32>
    %589 = arith.addf %587, %588 : vector<8x5xf32>
    %590 = arith.cmpf ogt, %589, %582 : vector<8x5xf32>
    %591 = arith.select %590, %589, %582 : vector<8x5xi1>, vector<8x5xf32>
    %cst_128 = arith.constant 3.000000e+00 : f32
    %592 = vector.broadcast %cst_128 : f32 to vector<8x5xf32>
    %593 = arith.select %590, %592, %584 : vector<8x5xi1>, vector<8x5xf32>
    %594 = vector.extract_strided_slice %560 {offsets = [0, 4], sizes = [8, 1], strides = [1, 1]} : vector<8x5xf32> to vector<8x1xf32>
    %595 = vector.extract_strided_slice %331 {offsets = [4, 0], sizes = [1, 5], strides = [1, 1]} : vector<5x5xf32> to vector<1x5xf32>
    %596 = vector.broadcast %594 : vector<8x1xf32> to vector<8x5xf32>
    %597 = vector.broadcast %595 : vector<1x5xf32> to vector<8x5xf32>
    %598 = arith.addf %596, %597 : vector<8x5xf32>
    %599 = arith.cmpf ogt, %598, %591 : vector<8x5xf32>
    %600 = arith.select %599, %598, %591 : vector<8x5xi1>, vector<8x5xf32>
    %cst_129 = arith.constant 4.000000e+00 : f32
    %601 = vector.broadcast %cst_129 : f32 to vector<8x5xf32>
    %602 = arith.select %599, %601, %593 : vector<8x5xi1>, vector<8x5xf32>
    %c5_130 = arith.constant 5 : index
    %c0_131 = arith.constant 0 : index
    %c0_132 = arith.constant 0 : index
    %603 = vector.load %arg1[%c5_130, %c0_131, %c0_132] : memref<8x8x64xf32, #tpu.memory_space<vmem>>, vector<1x8x64xf32>
    %604 = vector.shape_cast %603 : vector<1x8x64xf32> to vector<8x64xf32>
    %605 = vector.extract_strided_slice %604 {offsets = [0, 0], sizes = [8, 1], strides = [1, 1]} : vector<8x64xf32> to vector<8x1xf32>
    %cst_133 = arith.constant 0.000000e+00 : f32
    %606 = vector.broadcast %cst_133 : f32 to vector<8x1xf32>
    %607 = arith.cmpf ogt, %605, %606 : vector<8x1xf32>
    %608 = vector.extract_strided_slice %327 {offsets = [40, 0], sizes = [8, 5], strides = [1, 1]} : vector<64x5xf32> to vector<8x5xf32>
    %609 = vector.extract_strided_slice %330 {offsets = [16, 0], sizes = [8, 5], strides = [1, 1]} : vector<64x5xf32> to vector<8x5xf32>
    %610 = arith.addf %608, %609 : vector<8x5xf32>
    %611 = arith.addf %610, %322 : vector<8x5xf32>
    %612 = arith.addf %600, %611 : vector<8x5xf32>
    %613 = vector.shape_cast %607 : vector<8x1xi1> to vector<8x1xi1>
    %614 = vector.broadcast %613 : vector<8x1xi1> to vector<8x5xi1>
    %615 = arith.select %614, %612, %560 : vector<8x5xi1>, vector<8x5xf32>
    %616 = vector.extract_strided_slice %615 {offsets = [0, 0], sizes = [8, 1], strides = [1, 1]} : vector<8x5xf32> to vector<8x1xf32>
    %617 = vector.extract_strided_slice %331 {offsets = [0, 0], sizes = [1, 5], strides = [1, 1]} : vector<5x5xf32> to vector<1x5xf32>
    %618 = vector.broadcast %616 : vector<8x1xf32> to vector<8x5xf32>
    %619 = vector.broadcast %617 : vector<1x5xf32> to vector<8x5xf32>
    %620 = arith.addf %618, %619 : vector<8x5xf32>
    %cst_134 = arith.constant 0.000000e+00 : f32
    %621 = vector.broadcast %cst_134 : f32 to vector<8x5xf32>
    %622 = vector.extract_strided_slice %615 {offsets = [0, 1], sizes = [8, 1], strides = [1, 1]} : vector<8x5xf32> to vector<8x1xf32>
    %623 = vector.extract_strided_slice %331 {offsets = [1, 0], sizes = [1, 5], strides = [1, 1]} : vector<5x5xf32> to vector<1x5xf32>
    %624 = vector.broadcast %622 : vector<8x1xf32> to vector<8x5xf32>
    %625 = vector.broadcast %623 : vector<1x5xf32> to vector<8x5xf32>
    %626 = arith.addf %624, %625 : vector<8x5xf32>
    %627 = arith.cmpf ogt, %626, %620 : vector<8x5xf32>
    %628 = arith.select %627, %626, %620 : vector<8x5xi1>, vector<8x5xf32>
    %cst_135 = arith.constant 1.000000e+00 : f32
    %629 = vector.broadcast %cst_135 : f32 to vector<8x5xf32>
    %630 = arith.select %627, %629, %621 : vector<8x5xi1>, vector<8x5xf32>
    %631 = vector.extract_strided_slice %615 {offsets = [0, 2], sizes = [8, 1], strides = [1, 1]} : vector<8x5xf32> to vector<8x1xf32>
    %632 = vector.extract_strided_slice %331 {offsets = [2, 0], sizes = [1, 5], strides = [1, 1]} : vector<5x5xf32> to vector<1x5xf32>
    %633 = vector.broadcast %631 : vector<8x1xf32> to vector<8x5xf32>
    %634 = vector.broadcast %632 : vector<1x5xf32> to vector<8x5xf32>
    %635 = arith.addf %633, %634 : vector<8x5xf32>
    %636 = arith.cmpf ogt, %635, %628 : vector<8x5xf32>
    %637 = arith.select %636, %635, %628 : vector<8x5xi1>, vector<8x5xf32>
    %cst_136 = arith.constant 2.000000e+00 : f32
    %638 = vector.broadcast %cst_136 : f32 to vector<8x5xf32>
    %639 = arith.select %636, %638, %630 : vector<8x5xi1>, vector<8x5xf32>
    %640 = vector.extract_strided_slice %615 {offsets = [0, 3], sizes = [8, 1], strides = [1, 1]} : vector<8x5xf32> to vector<8x1xf32>
    %641 = vector.extract_strided_slice %331 {offsets = [3, 0], sizes = [1, 5], strides = [1, 1]} : vector<5x5xf32> to vector<1x5xf32>
    %642 = vector.broadcast %640 : vector<8x1xf32> to vector<8x5xf32>
    %643 = vector.broadcast %641 : vector<1x5xf32> to vector<8x5xf32>
    %644 = arith.addf %642, %643 : vector<8x5xf32>
    %645 = arith.cmpf ogt, %644, %637 : vector<8x5xf32>
    %646 = arith.select %645, %644, %637 : vector<8x5xi1>, vector<8x5xf32>
    %cst_137 = arith.constant 3.000000e+00 : f32
    %647 = vector.broadcast %cst_137 : f32 to vector<8x5xf32>
    %648 = arith.select %645, %647, %639 : vector<8x5xi1>, vector<8x5xf32>
    %649 = vector.extract_strided_slice %615 {offsets = [0, 4], sizes = [8, 1], strides = [1, 1]} : vector<8x5xf32> to vector<8x1xf32>
    %650 = vector.extract_strided_slice %331 {offsets = [4, 0], sizes = [1, 5], strides = [1, 1]} : vector<5x5xf32> to vector<1x5xf32>
    %651 = vector.broadcast %649 : vector<8x1xf32> to vector<8x5xf32>
    %652 = vector.broadcast %650 : vector<1x5xf32> to vector<8x5xf32>
    %653 = arith.addf %651, %652 : vector<8x5xf32>
    %654 = arith.cmpf ogt, %653, %646 : vector<8x5xf32>
    %655 = arith.select %654, %653, %646 : vector<8x5xi1>, vector<8x5xf32>
    %cst_138 = arith.constant 4.000000e+00 : f32
    %656 = vector.broadcast %cst_138 : f32 to vector<8x5xf32>
    %657 = arith.select %654, %656, %648 : vector<8x5xi1>, vector<8x5xf32>
    %c6_139 = arith.constant 6 : index
    %c0_140 = arith.constant 0 : index
    %c0_141 = arith.constant 0 : index
    %658 = vector.load %arg1[%c6_139, %c0_140, %c0_141] : memref<8x8x64xf32, #tpu.memory_space<vmem>>, vector<1x8x64xf32>
    %659 = vector.shape_cast %658 : vector<1x8x64xf32> to vector<8x64xf32>
    %660 = vector.extract_strided_slice %659 {offsets = [0, 0], sizes = [8, 1], strides = [1, 1]} : vector<8x64xf32> to vector<8x1xf32>
    %cst_142 = arith.constant 0.000000e+00 : f32
    %661 = vector.broadcast %cst_142 : f32 to vector<8x1xf32>
    %662 = arith.cmpf ogt, %660, %661 : vector<8x1xf32>
    %663 = vector.extract_strided_slice %327 {offsets = [48, 0], sizes = [8, 5], strides = [1, 1]} : vector<64x5xf32> to vector<8x5xf32>
    %664 = vector.extract_strided_slice %330 {offsets = [8, 0], sizes = [8, 5], strides = [1, 1]} : vector<64x5xf32> to vector<8x5xf32>
    %665 = arith.addf %663, %664 : vector<8x5xf32>
    %666 = arith.addf %665, %322 : vector<8x5xf32>
    %667 = arith.addf %655, %666 : vector<8x5xf32>
    %668 = vector.shape_cast %662 : vector<8x1xi1> to vector<8x1xi1>
    %669 = vector.broadcast %668 : vector<8x1xi1> to vector<8x5xi1>
    %670 = arith.select %669, %667, %615 : vector<8x5xi1>, vector<8x5xf32>
    %671 = vector.extract_strided_slice %670 {offsets = [0, 0], sizes = [8, 1], strides = [1, 1]} : vector<8x5xf32> to vector<8x1xf32>
    %672 = vector.extract_strided_slice %331 {offsets = [0, 0], sizes = [1, 5], strides = [1, 1]} : vector<5x5xf32> to vector<1x5xf32>
    %673 = vector.broadcast %671 : vector<8x1xf32> to vector<8x5xf32>
    %674 = vector.broadcast %672 : vector<1x5xf32> to vector<8x5xf32>
    %675 = arith.addf %673, %674 : vector<8x5xf32>
    %cst_143 = arith.constant 0.000000e+00 : f32
    %676 = vector.broadcast %cst_143 : f32 to vector<8x5xf32>
    %677 = vector.extract_strided_slice %670 {offsets = [0, 1], sizes = [8, 1], strides = [1, 1]} : vector<8x5xf32> to vector<8x1xf32>
    %678 = vector.extract_strided_slice %331 {offsets = [1, 0], sizes = [1, 5], strides = [1, 1]} : vector<5x5xf32> to vector<1x5xf32>
    %679 = vector.broadcast %677 : vector<8x1xf32> to vector<8x5xf32>
    %680 = vector.broadcast %678 : vector<1x5xf32> to vector<8x5xf32>
    %681 = arith.addf %679, %680 : vector<8x5xf32>
    %682 = arith.cmpf ogt, %681, %675 : vector<8x5xf32>
    %683 = arith.select %682, %681, %675 : vector<8x5xi1>, vector<8x5xf32>
    %cst_144 = arith.constant 1.000000e+00 : f32
    %684 = vector.broadcast %cst_144 : f32 to vector<8x5xf32>
    %685 = arith.select %682, %684, %676 : vector<8x5xi1>, vector<8x5xf32>
    %686 = vector.extract_strided_slice %670 {offsets = [0, 2], sizes = [8, 1], strides = [1, 1]} : vector<8x5xf32> to vector<8x1xf32>
    %687 = vector.extract_strided_slice %331 {offsets = [2, 0], sizes = [1, 5], strides = [1, 1]} : vector<5x5xf32> to vector<1x5xf32>
    %688 = vector.broadcast %686 : vector<8x1xf32> to vector<8x5xf32>
    %689 = vector.broadcast %687 : vector<1x5xf32> to vector<8x5xf32>
    %690 = arith.addf %688, %689 : vector<8x5xf32>
    %691 = arith.cmpf ogt, %690, %683 : vector<8x5xf32>
    %692 = arith.select %691, %690, %683 : vector<8x5xi1>, vector<8x5xf32>
    %cst_145 = arith.constant 2.000000e+00 : f32
    %693 = vector.broadcast %cst_145 : f32 to vector<8x5xf32>
    %694 = arith.select %691, %693, %685 : vector<8x5xi1>, vector<8x5xf32>
    %695 = vector.extract_strided_slice %670 {offsets = [0, 3], sizes = [8, 1], strides = [1, 1]} : vector<8x5xf32> to vector<8x1xf32>
    %696 = vector.extract_strided_slice %331 {offsets = [3, 0], sizes = [1, 5], strides = [1, 1]} : vector<5x5xf32> to vector<1x5xf32>
    %697 = vector.broadcast %695 : vector<8x1xf32> to vector<8x5xf32>
    %698 = vector.broadcast %696 : vector<1x5xf32> to vector<8x5xf32>
    %699 = arith.addf %697, %698 : vector<8x5xf32>
    %700 = arith.cmpf ogt, %699, %692 : vector<8x5xf32>
    %701 = arith.select %700, %699, %692 : vector<8x5xi1>, vector<8x5xf32>
    %cst_146 = arith.constant 3.000000e+00 : f32
    %702 = vector.broadcast %cst_146 : f32 to vector<8x5xf32>
    %703 = arith.select %700, %702, %694 : vector<8x5xi1>, vector<8x5xf32>
    %704 = vector.extract_strided_slice %670 {offsets = [0, 4], sizes = [8, 1], strides = [1, 1]} : vector<8x5xf32> to vector<8x1xf32>
    %705 = vector.extract_strided_slice %331 {offsets = [4, 0], sizes = [1, 5], strides = [1, 1]} : vector<5x5xf32> to vector<1x5xf32>
    %706 = vector.broadcast %704 : vector<8x1xf32> to vector<8x5xf32>
    %707 = vector.broadcast %705 : vector<1x5xf32> to vector<8x5xf32>
    %708 = arith.addf %706, %707 : vector<8x5xf32>
    %709 = arith.cmpf ogt, %708, %701 : vector<8x5xf32>
    %710 = arith.select %709, %708, %701 : vector<8x5xi1>, vector<8x5xf32>
    %cst_147 = arith.constant 4.000000e+00 : f32
    %711 = vector.broadcast %cst_147 : f32 to vector<8x5xf32>
    %712 = arith.select %709, %711, %703 : vector<8x5xi1>, vector<8x5xf32>
    %c7_148 = arith.constant 7 : index
    %c0_149 = arith.constant 0 : index
    %c0_150 = arith.constant 0 : index
    %713 = vector.load %arg1[%c7_148, %c0_149, %c0_150] : memref<8x8x64xf32, #tpu.memory_space<vmem>>, vector<1x8x64xf32>
    %714 = vector.shape_cast %713 : vector<1x8x64xf32> to vector<8x64xf32>
    %715 = vector.extract_strided_slice %714 {offsets = [0, 0], sizes = [8, 1], strides = [1, 1]} : vector<8x64xf32> to vector<8x1xf32>
    %cst_151 = arith.constant 0.000000e+00 : f32
    %716 = vector.broadcast %cst_151 : f32 to vector<8x1xf32>
    %717 = arith.cmpf ogt, %715, %716 : vector<8x1xf32>
    %718 = vector.extract_strided_slice %327 {offsets = [56, 0], sizes = [8, 5], strides = [1, 1]} : vector<64x5xf32> to vector<8x5xf32>
    %719 = vector.extract_strided_slice %330 {offsets = [0, 0], sizes = [8, 5], strides = [1, 1]} : vector<64x5xf32> to vector<8x5xf32>
    %720 = arith.addf %718, %719 : vector<8x5xf32>
    %721 = arith.addf %720, %322 : vector<8x5xf32>
    %722 = arith.addf %710, %721 : vector<8x5xf32>
    %723 = vector.shape_cast %717 : vector<8x1xi1> to vector<8x1xi1>
    %724 = vector.broadcast %723 : vector<8x1xi1> to vector<8x5xi1>
    %725 = arith.select %724, %722, %670 : vector<8x5xi1>, vector<8x5xf32>
    %c0_152 = arith.constant 0 : index
    %c0_153 = arith.constant 0 : index
    %726 = vector.load %arg13[%c0_152, %c0_153] : memref<1x5xf32, #tpu.memory_space<vmem>>, vector<1x5xf32>
    %727 = vector.broadcast %726 : vector<1x5xf32> to vector<8x5xf32>
    %728 = arith.addf %725, %727 : vector<8x5xf32>
    %cst_154 = arith.constant dense<0xFF800000> : vector<8xf32>
    %729 = vector.multi_reduction <maximumf>, %728, %cst_154 [1] : vector<8x5xf32> to vector<8xf32>
    %730 = vector.shape_cast %729 : vector<8xf32> to vector<8x1xf32>
    %731 = vector.broadcast %730 : vector<8x1xf32> to vector<8x5xf32>
    %732 = arith.cmpf oeq, %728, %731 : vector<8x5xf32>
    %cst_155 = arith.constant 5.000000e+00 : f32
    %733 = vector.broadcast %cst_155 : f32 to vector<8x5xf32>
    %734 = arith.select %732, %333, %733 : vector<8x5xi1>, vector<8x5xf32>
    %cst_156 = arith.constant dense<0x7F800000> : vector<8xf32>
    %735 = vector.multi_reduction <minimumf>, %734, %cst_156 [1] : vector<8x5xf32> to vector<8xf32>
    %736 = vector.shape_cast %735 : vector<8xf32> to vector<8x1xf32>
    %737 = tpu.iota {dimensions = array<i32: 1>} : vector<8x8xi32>
    %c7_i32 = arith.constant 7 : i32
    %738 = vector.broadcast %c7_i32 : i32 to vector<8x8xi32>
    %739 = arith.cmpi eq, %737, %738 : vector<8x8xi32>
    %cst_157 = arith.constant 0.000000e+00 : f32
    %740 = vector.broadcast %cst_157 : f32 to vector<8x8xf32>
    %741 = vector.shape_cast %736 : vector<8x1xf32> to vector<8x1xf32>
    %742 = vector.broadcast %741 : vector<8x1xf32> to vector<8x8xf32>
    %743 = arith.select %739, %742, %740 : vector<8x8xi1>, vector<8x8xf32>
    %744 = vector.broadcast %736 : vector<8x1xf32> to vector<8x5xf32>
    %745 = arith.cmpf oeq, %333, %744 : vector<8x5xf32>
    %cst_158 = arith.constant 0.000000e+00 : f32
    %746 = vector.broadcast %cst_158 : f32 to vector<8x5xf32>
    %747 = arith.select %745, %712, %746 : vector<8x5xi1>, vector<8x5xf32>
    %cst_159 = arith.constant dense<0.000000e+00> : vector<8xf32>
    %748 = vector.multi_reduction <add>, %747, %cst_159 [1] : vector<8x5xf32> to vector<8xf32>
    %749 = vector.shape_cast %748 : vector<8xf32> to vector<8x1xf32>
    %c6_i32 = arith.constant 6 : i32
    %750 = vector.broadcast %c6_i32 : i32 to vector<8x8xi32>
    %751 = arith.cmpi eq, %737, %750 : vector<8x8xi32>
    %752 = vector.shape_cast %749 : vector<8x1xf32> to vector<8x1xf32>
    %753 = vector.broadcast %752 : vector<8x1xf32> to vector<8x8xf32>
    %754 = arith.select %751, %753, %743 : vector<8x8xi1>, vector<8x8xf32>
    %755 = vector.broadcast %749 : vector<8x1xf32> to vector<8x5xf32>
    %756 = arith.cmpf oeq, %333, %755 : vector<8x5xf32>
    %cst_160 = arith.constant 0.000000e+00 : f32
    %757 = vector.broadcast %cst_160 : f32 to vector<8x5xf32>
    %758 = arith.select %756, %657, %757 : vector<8x5xi1>, vector<8x5xf32>
    %cst_161 = arith.constant dense<0.000000e+00> : vector<8xf32>
    %759 = vector.multi_reduction <add>, %758, %cst_161 [1] : vector<8x5xf32> to vector<8xf32>
    %760 = vector.shape_cast %759 : vector<8xf32> to vector<8x1xf32>
    %c5_i32 = arith.constant 5 : i32
    %761 = vector.broadcast %c5_i32 : i32 to vector<8x8xi32>
    %762 = arith.cmpi eq, %737, %761 : vector<8x8xi32>
    %763 = vector.shape_cast %760 : vector<8x1xf32> to vector<8x1xf32>
    %764 = vector.broadcast %763 : vector<8x1xf32> to vector<8x8xf32>
    %765 = arith.select %762, %764, %754 : vector<8x8xi1>, vector<8x8xf32>
    %766 = vector.broadcast %760 : vector<8x1xf32> to vector<8x5xf32>
    %767 = arith.cmpf oeq, %333, %766 : vector<8x5xf32>
    %cst_162 = arith.constant 0.000000e+00 : f32
    %768 = vector.broadcast %cst_162 : f32 to vector<8x5xf32>
    %769 = arith.select %767, %602, %768 : vector<8x5xi1>, vector<8x5xf32>
    %cst_163 = arith.constant dense<0.000000e+00> : vector<8xf32>
    %770 = vector.multi_reduction <add>, %769, %cst_163 [1] : vector<8x5xf32> to vector<8xf32>
    %771 = vector.shape_cast %770 : vector<8xf32> to vector<8x1xf32>
    %c4_i32 = arith.constant 4 : i32
    %772 = vector.broadcast %c4_i32 : i32 to vector<8x8xi32>
    %773 = arith.cmpi eq, %737, %772 : vector<8x8xi32>
    %774 = vector.shape_cast %771 : vector<8x1xf32> to vector<8x1xf32>
    %775 = vector.broadcast %774 : vector<8x1xf32> to vector<8x8xf32>
    %776 = arith.select %773, %775, %765 : vector<8x8xi1>, vector<8x8xf32>
    %777 = vector.broadcast %771 : vector<8x1xf32> to vector<8x5xf32>
    %778 = arith.cmpf oeq, %333, %777 : vector<8x5xf32>
    %cst_164 = arith.constant 0.000000e+00 : f32
    %779 = vector.broadcast %cst_164 : f32 to vector<8x5xf32>
    %780 = arith.select %778, %547, %779 : vector<8x5xi1>, vector<8x5xf32>
    %cst_165 = arith.constant dense<0.000000e+00> : vector<8xf32>
    %781 = vector.multi_reduction <add>, %780, %cst_165 [1] : vector<8x5xf32> to vector<8xf32>
    %782 = vector.shape_cast %781 : vector<8xf32> to vector<8x1xf32>
    %c3_i32 = arith.constant 3 : i32
    %783 = vector.broadcast %c3_i32 : i32 to vector<8x8xi32>
    %784 = arith.cmpi eq, %737, %783 : vector<8x8xi32>
    %785 = vector.shape_cast %782 : vector<8x1xf32> to vector<8x1xf32>
    %786 = vector.broadcast %785 : vector<8x1xf32> to vector<8x8xf32>
    %787 = arith.select %784, %786, %776 : vector<8x8xi1>, vector<8x8xf32>
    %788 = vector.broadcast %782 : vector<8x1xf32> to vector<8x5xf32>
    %789 = arith.cmpf oeq, %333, %788 : vector<8x5xf32>
    %cst_166 = arith.constant 0.000000e+00 : f32
    %790 = vector.broadcast %cst_166 : f32 to vector<8x5xf32>
    %791 = arith.select %789, %492, %790 : vector<8x5xi1>, vector<8x5xf32>
    %cst_167 = arith.constant dense<0.000000e+00> : vector<8xf32>
    %792 = vector.multi_reduction <add>, %791, %cst_167 [1] : vector<8x5xf32> to vector<8xf32>
    %793 = vector.shape_cast %792 : vector<8xf32> to vector<8x1xf32>
    %c2_i32 = arith.constant 2 : i32
    %794 = vector.broadcast %c2_i32 : i32 to vector<8x8xi32>
    %795 = arith.cmpi eq, %737, %794 : vector<8x8xi32>
    %796 = vector.shape_cast %793 : vector<8x1xf32> to vector<8x1xf32>
    %797 = vector.broadcast %796 : vector<8x1xf32> to vector<8x8xf32>
    %798 = arith.select %795, %797, %787 : vector<8x8xi1>, vector<8x8xf32>
    %799 = vector.broadcast %793 : vector<8x1xf32> to vector<8x5xf32>
    %800 = arith.cmpf oeq, %333, %799 : vector<8x5xf32>
    %cst_168 = arith.constant 0.000000e+00 : f32
    %801 = vector.broadcast %cst_168 : f32 to vector<8x5xf32>
    %802 = arith.select %800, %437, %801 : vector<8x5xi1>, vector<8x5xf32>
    %cst_169 = arith.constant dense<0.000000e+00> : vector<8xf32>
    %803 = vector.multi_reduction <add>, %802, %cst_169 [1] : vector<8x5xf32> to vector<8xf32>
    %804 = vector.shape_cast %803 : vector<8xf32> to vector<8x1xf32>
    %c1_i32 = arith.constant 1 : i32
    %805 = vector.broadcast %c1_i32 : i32 to vector<8x8xi32>
    %806 = arith.cmpi eq, %737, %805 : vector<8x8xi32>
    %807 = vector.shape_cast %804 : vector<8x1xf32> to vector<8x1xf32>
    %808 = vector.broadcast %807 : vector<8x1xf32> to vector<8x8xf32>
    %809 = arith.select %806, %808, %798 : vector<8x8xi1>, vector<8x8xf32>
    %810 = vector.broadcast %804 : vector<8x1xf32> to vector<8x5xf32>
    %811 = arith.cmpf oeq, %333, %810 : vector<8x5xf32>
    %cst_170 = arith.constant 0.000000e+00 : f32
    %812 = vector.broadcast %cst_170 : f32 to vector<8x5xf32>
    %813 = arith.select %811, %382, %812 : vector<8x5xi1>, vector<8x5xf32>
    %cst_171 = arith.constant dense<0.000000e+00> : vector<8xf32>
    %814 = vector.multi_reduction <add>, %813, %cst_171 [1] : vector<8x5xf32> to vector<8xf32>
    %815 = vector.shape_cast %814 : vector<8xf32> to vector<8x1xf32>
    %c0_i32 = arith.constant 0 : i32
    %816 = vector.broadcast %c0_i32 : i32 to vector<8x8xi32>
    %817 = arith.cmpi eq, %737, %816 : vector<8x8xi32>
    %818 = vector.shape_cast %815 : vector<8x1xf32> to vector<8x1xf32>
    %819 = vector.broadcast %818 : vector<8x1xf32> to vector<8x8xf32>
    %820 = arith.select %817, %819, %809 : vector<8x8xi1>, vector<8x8xf32>
    %821 = arith.fptosi %820 : vector<8x8xf32> to vector<8x8xi32>
    %c0_172 = arith.constant 0 : index
    %c0_173 = arith.constant 0 : index
    %822 = vector.load %arg15[%c0_172, %c0_173] : memref<8x8xi32, #tpu.memory_space<vmem>>, vector<8x8xi32>
    tpu.vector_store %arg15[%c0_172, %c0_173], %821 {strides = array<i32>} : memref<8x8xi32, #tpu.memory_space<vmem>>, vector<8x8xi32>,
    return
  }
}

</mosaic_0001>

<bundles_post_ra>
// kernel: model_ner_forward.1
= control target key start
LH: loop header
LB: loop body
LE: loop exit
PB: predicated region body
PF: predicated region fallthrough
CT: control target
= control target key end

     0   :  { %v2623_v1 = vmov 0   ;;  %s2624_s27 = smov 64   ;;  %vm738_vm1 = vcmask 523264   ;;  %vm2627_vm8 = vmmov 0   ;;  %vm1550_vm10 = vcmask 261120   ;;  %s3558_s2 = inlined_call_operand.vmem [shape: bf16[512,192], index: 2, kind: input, shape index: {}]   ;;  %s3559_s0 = inlined_call_operand.vmem [shape: bf16[64,512], index: 0, kind: input, shape index: {}]   ;;  %s3560_s4 = inlined_call_operand.vmem [shape: bf16[64,192], index: 4, kind: input, shape index: {}]   ;;  %s3561_s3 = inlined_call_operand.vmem [shape: f32[1,192], index: 3, kind: input, shape index: {}]   ;;  %s3562_s5 = inlined_call_operand.vmem [shape: f32[1,64], index: 5, kind: input, shape index: {}]   ;;  %s3563_s1 = inlined_call_operand.vmem [shape: f32[8,8,64], index: 1, kind: input, shape index: {}]   ;;  %s3564_s6 = inlined_call_operand.vmem [shape: bf16[64,49], index: 6, kind: input, shape index: {}]   ;;  %s3565_s8 = inlined_call_operand.vmem [shape: bf16[32,5], index: 8, kind: input, shape index: {}]   ;;  %s3566_s10 = inlined_call_operand.vmem [shape: bf16[49,5], index: 10, kind: input, shape index: {}]   ;;  %s3567_s9 = inlined_call_operand.vmem [shape: bf16[32,5], index: 9, kind: input, shape index: {}]   ;;  %s3568_s7 = inlined_call_operand.vmem [shape: f32[1,49], index: 7, kind: input, shape index: {}]   ;;  %s3569_s11 = inlined_call_operand.vmem [shape: f32[1,5], index: 11, kind: input, shape index: {}]   ;;  %s3570_s12 = inlined_call_operand.vmem [shape: f32[1,5], index: 12, kind: input, shape index: {}]   ;;  %s3571_s14 = inlined_call_operand.vmem [shape: f32[5,5], index: 14, kind: input, shape index: {}]   ;;  %s3572_s13 = inlined_call_operand.vmem [shape: f32[1,5], index: 13, kind: input, shape index: {}]   ;;  %s3573_s15 = inlined_call_operand.vmem [shape: s32[8,8], index: 15, kind: output, shape index: {}]  }
   0x1   :  { %v2427_v0 = vld [vmem:[%s3558_s2 + $0x74] ss:$8 sps:$4 sm:$0xff]   ;;  %2390 = vset.pattern.permute.xlu1 %v2623_v1  ;;  %v2429_v2 = vld [vmem:[%s3558_s2 + $0x70] ss:$8 sps:$4 sm:$0xff]   ;;  %v2433_v5 = vld [vmem:[%s3558_s2 + $0x64] ss:$8 sps:$4 sm:$0xff]  }
   0x2   :  { %543 = vmatprep.subr.bf16.mxu0 %v2427_v0  ;;  %v2430_v3 = vld [vmem:[%s3558_s2 + $0x174] ss:$8 sps:$4 sm:$0xff]   ;;  %v2432_v4 = vld [vmem:[%s3558_s2 + $0x170] ss:$8 sps:$4 sm:$0xff]   ;;  %v2435_v6 = vld [vmem:[%s3558_s2 + $0x60] ss:$8 sps:$4 sm:$0xff]  }
   0x3   :  { %544 = vmatpush1.bf16.msra.mxu0 %v2429_v2  ;;  %616 = vmatprep.subr.bf16.mxu1 %v2430_v3  ;;  %v2436_v7 = vld [vmem:[%s3558_s2 + $0x164] ss:$8 sps:$4 sm:$0xff]   ;;  %v2438_v8 = vld [vmem:[%s3558_s2 + $0x160] ss:$8 sps:$4 sm:$0xff]   ;;  %v2439_v9 = vld [vmem:[%s3558_s2 + $0x54] ss:$8 sps:$4 sm:$0xff]  }
   0x4   :  { %617 = vmatpush1.bf16.msra.mxu1 %v2432_v4  ;;  %545 = vmatprep.subr.bf16.mxu0 %v2433_v5  ;;  %v2441_v10 = vld [vmem:[%s3558_s2 + $0x50] ss:$8 sps:$4 sm:$0xff]   ;;  %v2442_v11 = vld [vmem:[%s3558_s2 + $0x154] ss:$8 sps:$4 sm:$0xff]   ;;  %v2445_v12 = vld [vmem:[%s3558_s2 + $0x44] ss:$8 sps:$4 sm:$0xff]  }
   0x5   :  { %618 = vmatprep.subr.bf16.mxu1 %v2436_v7  ;;  %v2444_v13 = vld [vmem:[%s3558_s2 + $0x150] ss:$8 sps:$4 sm:$0xff]   ;;  %v2448_v14 = vld [vmem:[%s3558_s2 + $0x144] ss:$8 sps:$4 sm:$0xff]   ;;  %v2447_v15 = vld [vmem:[%s3558_s2 + $0x40] ss:$8 sps:$4 sm:$0xff]  }
   0x6   :  { %v2451_v16 = vld [vmem:[%s3558_s2 + $0x34] ss:$8 sps:$4 sm:$0xff]   ;;  %v2450_v17 = vld [vmem:[%s3558_s2 + $0x140] ss:$8 sps:$4 sm:$0xff]   ;;  %v2453_v19 = vld [vmem:[%s3558_s2 + $0x30] ss:$8 sps:$4 sm:$0xff]  }
   0x7   :  { %546 = vmatpush1.bf16.msra.mxu0 %v2435_v6  ;;  %v2454_v18 = vld [vmem:[%s3558_s2 + $0x134] ss:$8 sps:$4 sm:$0xff]   ;;  %v2457_v20 = vld [vmem:[%s3558_s2 + $0x24] ss:$8 sps:$4 sm:$0xff]   ;;  %v2456_v21 = vld [vmem:[%s3558_s2 + $0x130] ss:$8 sps:$4 sm:$0xff]  }
   0x8   :  { %547 = vmatprep.subr.bf16.mxu0 %v2439_v9  ;;  %619 = vmatpush1.bf16.msra.mxu1 %v2438_v8  ;;  %v2460_v22 = vld [vmem:[%s3558_s2 + $0x124] ss:$8 sps:$4 sm:$0xff]   ;;  %v2459_v23 = vld [vmem:[%s3558_s2 + $0x20] ss:$8 sps:$4 sm:$0xff]   ;;  %v2463_v24 = vld [vmem:[%s3558_s2 + $0x14] ss:$8 sps:$4 sm:$0xff]  }
   0x9   :  { %620 = vmatprep.subr.bf16.mxu1 %v2442_v11  ;;  %v2462_v25 = vld [vmem:[%s3558_s2 + $0x120] ss:$8 sps:$4 sm:$0xff]   ;;  %v2466_v26 = vld [vmem:[%s3558_s2 + $0x114] ss:$8 sps:$4 sm:$0xff]   ;;  %v2465_v27 = vld [vmem:[%s3558_s2 + $0x10] ss:$8 sps:$4 sm:$0xff]  }
   0xa   :  { %v2469_v28 = vld [vmem:[%s3558_s2 + $0x4] ss:$8 sps:$4 sm:$0xff]   ;;  %v2468_v29 = vld [vmem:[%s3558_s2 + $0x110] ss:$8 sps:$4 sm:$0xff]   ;;  %v2471_v31 = vld [vmem:[%s3558_s2] ss:$8 sps:$4 sm:$0xff]  }
   0xb   :  { %548 = vmatpush1.bf16.msra.mxu0 %v2441_v10  ;;  %v2472_v30 = vld [vmem:[%s3558_s2 + $0x104] ss:$8 sps:$4 sm:$0xff]   ;;  %v2475_v32 = vld [vmem:[%s3558_s2 + $0xf4] ss:$8 sps:$4 sm:$0xff]   ;;  %v2474_v33 = vld [vmem:[%s3558_s2 + $0x100] ss:$8 sps:$4 sm:$0xff]  }
   0xc   :  { %549 = vmatprep.subr.bf16.mxu0 %v2445_v12  ;;  %621 = vmatpush1.bf16.msra.mxu1 %v2444_v13  ;;  %v2478_v34 = vld [vmem:[%s3558_s2 + $0x1f4] ss:$8 sps:$4 sm:$0xff]   ;;  %v2477_v35 = vld [vmem:[%s3558_s2 + $0xf0] ss:$8 sps:$4 sm:$0xff]   ;;  %v2481_v36 = vld [vmem:[%s3558_s2 + $0xe4] ss:$8 sps:$4 sm:$0xff]  }
   0xd   :  { %622 = vmatprep.subr.bf16.mxu1 %v2448_v14  ;;  %v2480_v37 = vld [vmem:[%s3558_s2 + $0x1f0] ss:$8 sps:$4 sm:$0xff]   ;;  %v2484_v38 = vld [vmem:[%s3558_s2 + $0x1e4] ss:$8 sps:$4 sm:$0xff]   ;;  %v2483_v39 = vld [vmem:[%s3558_s2 + $0xe0] ss:$8 sps:$4 sm:$0xff]  }
   0xe   :  { %v2487_v40 = vld [vmem:[%s3558_s2 + $0xd4] ss:$8 sps:$4 sm:$0xff]   ;;  %v2486_v41 = vld [vmem:[%s3558_s2 + $0x1e0] ss:$8 sps:$4 sm:$0xff]   ;;  %v2489_v43 = vld [vmem:[%s3558_s2 + $0xd0] ss:$8 sps:$4 sm:$0xff]  }
   0xf   :  { %550 = vmatpush1.bf16.msra.mxu0 %v2447_v15  ;;  %v2490_v42 = vld [vmem:[%s3558_s2 + $0x1d4] ss:$8 sps:$4 sm:$0xff]   ;;  %v2493_v44 = vld [vmem:[%s3558_s2 + $0xc4] ss:$8 sps:$4 sm:$0xff]   ;;  %v2492_v45 = vld [vmem:[%s3558_s2 + $0x1d0] ss:$8 sps:$4 sm:$0xff]  }
  0x10   :  { %551 = vmatprep.subr.bf16.mxu0 %v2451_v16  ;;  %623 = vmatpush1.bf16.msra.mxu1 %v2450_v17  ;;  %v2496_v46 = vld [vmem:[%s3558_s2 + $0x1c4] ss:$8 sps:$4 sm:$0xff]   ;;  %v2495_v47 = vld [vmem:[%s3558_s2 + $0xc0] ss:$8 sps:$4 sm:$0xff]   ;;  %v2499_v49 = vld [vmem:[%s3558_s2 + $0xb4] ss:$8 sps:$4 sm:$0xff]  }
  0x11   :  { %624 = vmatprep.subr.bf16.mxu1 %v2454_v18  ;;  %v2524_v48 = vld [vmem:[%s3559_s0 + $0x4] ss:$16 sps:$4 sm:$0xff]   ;;  %v2498_v50 = vld [vmem:[%s3558_s2 + $0x1c0] ss:$8 sps:$4 sm:$0xff]   ;;  %v2530_v52 = vld [vmem:[%s3559_s0 + $0xc] ss:$16 sps:$4 sm:$0xff]  }
  0x12   :  { %575 = vmatprep.mubr.bf16.mxu0 %v2524_v48  ;;  %v2502_v51 = vld [vmem:[%s3558_s2 + $0x1b4] ss:$8 sps:$4 sm:$0xff]   ;;  %v2501_v53 = vld [vmem:[%s3558_s2 + $0xb0] ss:$8 sps:$4 sm:$0xff]   ;;  %v2505_v54 = vld [vmem:[%s3558_s2 + $0xa4] ss:$8 sps:$4 sm:$0xff]   ;;  %648 = vmatprep.mubr.bf16.mxu1 %v2530_v52 }
  0x13   :  { %552 = vmatpush1.bf16.msra.mxu0 %v2453_v19  ;;  %v2504_v55 = vld [vmem:[%s3558_s2 + $0x1b0] ss:$8 sps:$4 sm:$0xff]   ;;  %v2508_v56 = vld [vmem:[%s3558_s2 + $0x1a4] ss:$8 sps:$4 sm:$0xff]   ;;  %v2507_v57 = vld [vmem:[%s3558_s2 + $0xa0] ss:$8 sps:$4 sm:$0xff]  }
  0x14   :  { %553 = vmatprep.subr.bf16.mxu0 %v2457_v20  ;;  %625 = vmatpush1.bf16.msra.mxu1 %v2456_v21  ;;  %v2511_v58 = vld [vmem:[%s3558_s2 + $0x94] ss:$8 sps:$4 sm:$0xff]   ;;  %v2510_v59 = vld [vmem:[%s3558_s2 + $0x1a0] ss:$8 sps:$4 sm:$0xff]   ;;  %v2513_v61 = vld [vmem:[%s3558_s2 + $0x90] ss:$8 sps:$4 sm:$0xff]  }
  0x15   :  { %626 = vmatprep.subr.bf16.mxu1 %v2460_v22  ;;  %v2514_v60 = vld [vmem:[%s3558_s2 + $0x194] ss:$8 sps:$4 sm:$0xff]   ;;  %v2517_v62 = vld [vmem:[%s3558_s2 + $0x84] ss:$8 sps:$4 sm:$0xff]   ;;  %v2516_v63 = vld [vmem:[%s3558_s2 + $0x190] ss:$8 sps:$4 sm:$0xff]  }
  0x16   :  { %v2520_v0 = vld [vmem:[%s3558_s2 + $0x184] ss:$8 sps:$4 sm:$0xff]   ;;  %v2519_v2 = vld [vmem:[%s3558_s2 + $0x80] ss:$8 sps:$4 sm:$0xff]   ;;  %v2911_v3 = vld [vmem:[%s3560_s4 + $0x34] ss:$8 sps:$4 sm:$0xff]  }
  0x17   :  { %554 = vmatpush1.bf16.msra.mxu0 %v2459_v23  ;;  %v2525_v4 = vld [vmem:[%s3558_s2 + $0x180] ss:$8 sps:$4 sm:$0xff]   ;;  %v2922_v6 = vld [vmem:[%s3560_s4 + $0x30] ss:$8 sps:$4 sm:$0xff]   ;;  %v2532_v7 = vld [vmem:[%s3559_s0 + $0x24] ss:$16 sps:$4 sm:$0xff]  }
  0x18   :  { %555 = vmatprep.subr.bf16.mxu0 %v2463_v24  ;;  %627 = vmatpush1.bf16.msra.mxu1 %v2462_v25  ;;  %v2522_v5 = vld [vmem:[%s3559_s0] ss:$16 sps:$4 sm:$0xff]   ;;  %v2528_v8 = vld [vmem:[%s3559_s0 + $0x8] ss:$16 sps:$4 sm:$0xff]   ;;  %v2934_v9 = vld [vmem:[%s3560_s4 + $0x24] ss:$8 sps:$4 sm:$0xff]  }
  0x19   :  { %628 = vmatprep.subr.bf16.mxu1 %v2466_v26  ;;  %v2537_v10 = vld [vmem:[%s3559_s0 + $0x2c] ss:$16 sps:$4 sm:$0xff]   ;;  %v2944_v11 = vld [vmem:[%s3560_s4 + $0x20] ss:$8 sps:$4 sm:$0xff]   ;;  %v2541_v14 = vld [vmem:[%s3559_s0 + $0x44] ss:$16 sps:$4 sm:$0xff]   ;;  %v133_v26 = vlaneseq }
  0x1a   :  { %v2950_v12 = vld [vmem:[%s3560_s4 + $0x14] ss:$8 sps:$4 sm:$0xff]   ;;  %v2534_v13 = vld [vmem:[%s3559_s0 + $0x20] ss:$16 sps:$4 sm:$0xff]   ;;  %v2540_v16 = vld [vmem:[%s3559_s0 + $0x28] ss:$16 sps:$4 sm:$0xff]  }
  0x1b   :  { %556 = vmatpush1.bf16.msra.mxu0 %v2465_v27  ;;  %v2964_v15 = vld [vmem:[%s3560_s4 + $0x10] ss:$8 sps:$4 sm:$0xff]   ;;  %v2973_v17 = vld [vmem:[%s3560_s4 + $0x4] ss:$8 sps:$4 sm:$0xff]   ;;  %v2984_v19 = vld [vmem:[%s3560_s4] ss:$8 sps:$4 sm:$0xff]  }
  0x1c   :  { %557 = vmatprep.subr.bf16.mxu0 %v2469_v28  ;;  %629 = vmatpush1.bf16.msra.mxu1 %v2468_v29  ;;  %v2546_v18 = vld [vmem:[%s3559_s0 + $0x4c] ss:$16 sps:$4 sm:$0xff]   ;;  %v2543_v20 = vld [vmem:[%s3559_s0 + $0x40] ss:$16 sps:$4 sm:$0xff]   ;;  %v2550_v21 = vld [vmem:[%s3559_s0 + $0x64] ss:$16 sps:$4 sm:$0xff]  }
  0x1d   :  { %630 = vmatprep.subr.bf16.mxu1 %v2472_v30  ;;  %v2549_v22 = vld [vmem:[%s3559_s0 + $0x48] ss:$16 sps:$4 sm:$0xff]   ;;  %v2555_v23 = vld [vmem:[%s3559_s0 + $0x6c] ss:$16 sps:$4 sm:$0xff]   ;;  %v2552_v24 = vld [vmem:[%s3559_s0 + $0x60] ss:$16 sps:$4 sm:$0xff]  }
  0x1e   :  { %v2558_v25 = vld [vmem:[%s3559_s0 + $0x68] ss:$16 sps:$4 sm:$0xff]   ;;  %v3024_v27 = vshrl.u32 %v133_v26, 7  ;;  %v131_v29 = vld [vmem:[%s3561_s3] sm:$0x3]  ;;  %s2625_s2 = smov 96  }
  0x1f   :  { %558 = vmatpush1.bf16.msra.mxu0 %v2471_v31  ;;  %vm1484_vm11 = vcmask 1040384   ;;  %vm1480_vm12 = vcmask 400384  }
  0x20   :  { %559 = vmatprep.subr.bf16.mxu0 %v2475_v32  ;;  %631 = vmatpush1.bf16.msra.mxu1 %v2474_v33  ;;  %v135_v28 = vsub.s32 0, %v3024_v27  ;;  %v139_v31 = vsub.s32 1, %v3024_v27 }
  0x21   :  { %632 = vmatprep.subr.bf16.mxu1 %v2478_v34 }
  0x22   :  { %v136_v34 = vrot.slane %v131_v29, %v135_v28 }
  0x23   :  { %560 = vmatpush2.bf16.msra.mxu0 %v2477_v35 }
  0x24   :  { %561 = vmatprep.subr.bf16.mxu0 %v2481_v36  ;;  %633 = vmatpush2.bf16.msra.mxu1 %v2480_v37  ;;  %v3039_v37 = vrot.slane %v131_v29, %v139_v31 }
  0x25   :  { %634 = vmatprep.subr.bf16.mxu1 %v2484_v38 }
  0x27   :  { %562 = vmatpush2.bf16.msra.mxu0 %v2483_v39 }
  0x28   :  { %563 = vmatprep.subr.bf16.mxu0 %v2487_v40  ;;  %635 = vmatpush2.bf16.msra.mxu1 %v2486_v41 }
  0x29   :  { %636 = vmatprep.subr.bf16.mxu1 %v2490_v42 }
  0x2b   :  { %564 = vmatpush2.bf16.msra.mxu0 %v2489_v43 }
  0x2c   :  { %565 = vmatprep.subr.bf16.mxu0 %v2493_v44  ;;  %637 = vmatpush2.bf16.msra.mxu1 %v2492_v45 }
  0x2d   :  { %638 = vmatprep.subr.bf16.mxu1 %v2496_v46 }
  0x2f   :  { %566 = vmatpush2.bf16.msra.mxu0 %v2495_v47 }
  0x30   :  { %567 = vmatprep.subr.bf16.mxu0 %v2499_v49  ;;  %639 = vmatpush2.bf16.msra.mxu1 %v2498_v50 }
  0x31   :  { %640 = vmatprep.subr.bf16.mxu1 %v2502_v51 }
  0x33   :  { %568 = vmatpush2.bf16.msra.mxu0 %v2501_v53 }
  0x34   :  { %569 = vmatprep.subr.bf16.mxu0 %v2505_v54  ;;  %641 = vmatpush2.bf16.msra.mxu1 %v2504_v55 }
  0x35   :  { %642 = vmatprep.subr.bf16.mxu1 %v2508_v56 }
  0x37   :  { %570 = vmatpush2.bf16.msra.mxu0 %v2507_v57 }
  0x38   :  { %571 = vmatprep.subr.bf16.mxu0 %v2511_v58  ;;  %643 = vmatpush2.bf16.msra.mxu1 %v2510_v59 }
  0x39   :  { %644 = vmatprep.subr.bf16.mxu1 %v2514_v60 }
  0x3b   :  { %572 = vmatpush2.bf16.msra.mxu0 %v2513_v61 }
  0x3c   :  { %573 = vmatprep.subr.bf16.mxu0 %v2517_v62  ;;  %645 = vmatpush2.bf16.msra.mxu1 %v2516_v63 }
  0x3d   :  { %646 = vmatprep.subr.bf16.mxu1 %v2520_v0 }
  0x3f   :  { %574 = vmatpush2.bf16.msra.mxu0 %v2519_v2 }
  0x40   :  { %750 = vmatprep.subr.bf16.mxu0 %v2911_v3  ;;  %647 = vmatpush2.bf16.msra.mxu1 %v2525_v4 }
  0x41   :  { %827 = vmatprep.subr.bf16.mxu1 %v2911_v3 }
  0x42   :  { %576 = vmatmul.mubr.bf16.vlgmr.msra.gmra.mxu0 %v2522_v5 }
  0x43   :  { %751 = vmatpush1.bf16.msra.mxu0 %v2922_v6  ;;  %585 = vmatprep.mubr.bf16.mxu0 %v2532_v7 }
  0x44   :  { %649 = vmatmul.mubr.bf16.vlgmr.msra.gmra.mxu1 %v2528_v8  ;;  %752 = vmatprep.subr.bf16.mxu0 %v2934_v9 }
  0x45   :  { %658 = vmatprep.mubr.bf16.mxu1 %v2537_v10  ;;  %828 = vmatpush1.bf16.msra.mxu1 %v2922_v6 }
  0x46   :  { %829 = vmatprep.subr.bf16.mxu1 %v2934_v9 }
  0x47   :  { %753 = vmatpush1.bf16.msra.mxu0 %v2944_v11 }
  0x48   :  { %754 = vmatprep.subr.bf16.mxu0 %v2950_v12 }
  0x49   :  { %830 = vmatpush1.bf16.msra.mxu1 %v2944_v11 }
  0x4a   :  { %586 = vmatmul.mubr.bf16.gmra.mxu0 %v2534_v13  ;;  %831 = vmatprep.subr.bf16.mxu1 %v2950_v12 }
  0x4b   :  { %595 = vmatprep.mubr.bf16.mxu0 %v2541_v14  ;;  %755 = vmatpush1.bf16.msra.mxu0 %v2964_v15 }
  0x4c   :  { %659 = vmatmul.mubr.bf16.gmra.mxu1 %v2540_v16  ;;  %756 = vmatprep.subr.bf16.mxu0 %v2973_v17 }
  0x4d   :  { %668 = vmatprep.mubr.bf16.mxu1 %v2546_v18  ;;  %832 = vmatpush1.bf16.msra.mxu1 %v2964_v15 }
  0x4e   :  { %833 = vmatprep.subr.bf16.mxu1 %v2973_v17 }
  0x4f   :  { %757 = vmatpush1.bf16.msra.mxu0 %v2984_v19 }
  0x50   :  { %903 = vmatprep.subr.bf16.mxu0 %v2911_v3 }
  0x51   :  { %834 = vmatpush1.bf16.msra.mxu1 %v2984_v19 }
  0x52   :  { %596 = vmatmul.mubr.bf16.gmra.mxu0 %v2543_v20  ;;  %979 = vmatprep.subr.bf16.mxu1 %v2911_v3 }
  0x53   :  { %605 = vmatprep.mubr.bf16.mxu0 %v2550_v21 }
  0x54   :  { %669 = vmatmul.mubr.bf16.gmra.mxu1 %v2549_v22 }
  0x55   :  { %678 = vmatprep.mubr.bf16.mxu1 %v2555_v23 }
  0x5a   :  { %606 = vmatmul.mubr.bf16.gmra.mxu0 %v2552_v24 }
  0x5b   :  { %774 = vmatprep.mubr.bf16.mxu0 %v2623_v1 }
  0x5c   :  { %679 = vmatmul.mubr.bf16.gmra.mxu1 %v2558_v25 }
  0x5d   :  { %851 = vmatprep.mubr.bf16.mxu1 %v2623_v1 }
  0x62   :  { %775 = vmatmul.mubr.bf16.vlgmr.msra.gmra.mxu0 %v2623_v1 }
  0x63   :  { %904 = vmatpush1.bf16.msra.mxu0 %v2922_v6  ;;  %927 = vmatprep.mubr.bf16.mxu0 %v2623_v1 }
  0x64   :  { %905 = vmatprep.subr.bf16.mxu0 %v2934_v9 }
  0x67   :  { %906 = vmatpush1.bf16.msra.mxu0 %v2944_v11 }
  0x68   :  { %907 = vmatprep.subr.bf16.mxu0 %v2950_v12 }
  0x6b   :  { %908 = vmatpush1.bf16.msra.mxu0 %v2964_v15 }
  0x6c   :  { %909 = vmatprep.subr.bf16.mxu0 %v2973_v17 }
  0x6f   :  { %910 = vmatpush1.bf16.msra.mxu0 %v2984_v19 }
  0x70   :  { %1055 = vmatprep.subr.bf16.mxu0 %v2911_v3 }
 0x102   :  { %v577_v30 = vpop.f32.mrf.mxu0 }
 0x103   :  { %v578_v24 = vadd.f32 %v577_v30, %v136_v34 }
 0x104   :  { %v3031_v32 = vpop.f32.mrf.mxu0  ;;  %v650_v33 = vpop.f32.mrf.mxu1 }
 0x106   :  { %v581_v35 = vpop.f32.mrf.mxu0  ;;  %v3035_v36 = vpop.f32.mrf.mxu1 }
 0x107   :  { %v3041_v38 = vadd.f32 %v581_v35, %v136_v34 }
 0x108   :  { %v583_v39 = vpop.f32.mrf.mxu0  ;;  %v3043_v40 = vpop.f32.mrf.mxu1 }
 0x109   :  { %v3046_v41 = vadd.f32 %v583_v39, %v3039_v37 }
 0x10a   :  { %v587_v42 = vpop.f32.mrf.mxu0  ;;  %v3048_v43 = vpop.f32.mrf.mxu1 }
 0x10b   :  { %v588_v44 = vadd.f32 %v587_v42, %v136_v34 }
 0x10c   :  { %v589_v45 = vpop.f32.mrf.mxu0  ;;  %v660_v46 = vpop.f32.mrf.mxu1 }
 0x10d   :  { %v590_v47 = vadd.f32 %v589_v45, %v3039_v37  ;;  %v3051_v48 = vadd.f32 %v660_v46, %v588_v44 }
 0x10e   :  { %v591_v49 = vpop.f32.mrf.mxu0  ;;  %v662_v50 = vpop.f32.mrf.mxu1 }
 0x10f   :  { %v592_v51 = vadd.f32 %v591_v49, %v136_v34  ;;  %v3053_v52 = vadd.f32 %v662_v50, %v590_v47  ;;  %v651_v47 = vadd.f32 %v650_v33, %v578_v24  ;;  %v580_v33 = vadd.f32 %v3031_v32, %v3039_v37  ;;  %v808_v32 = vld [vmem:[%s3563_s1] sm:$0xff] }
 0x110   :  { %v593_v53 = vpop.f32.mrf.mxu0  ;;  %v664_v54 = vpop.f32.mrf.mxu1  ;;  %vm809_vm0 = vcmp.gt.f32.partialorder %v808_v32, 0.0 }
 0x111   :  { %v594_v55 = vadd.f32 %v593_v53, %v3039_v37  ;;  %v3056_v56 = vadd.f32 %v664_v54, %v592_v51 }
 0x112   :  { %v597_v57 = vpop.f32.mrf.mxu0  ;;  %v666_v58 = vpop.f32.mrf.mxu1 }
 0x113   :  { %v598_v59 = vadd.f32 %v597_v57, %v136_v34  ;;  %v3058_v60 = vadd.f32 %v666_v58, %v594_v55 }
 0x114   :  { %v599_v61 = vpop.f32.mrf.mxu0  ;;  %v670_v62 = vpop.f32.mrf.mxu1 }
 0x115   :  { %v600_v63 = vadd.f32 %v599_v61, %v3039_v37  ;;  %v3061_v0 = vadd.f32 %v670_v62, %v598_v59 }
 0x116   :  { %v601_v2 = vpop.f32.mrf.mxu0  ;;  %v672_v4 = vpop.f32.mrf.mxu1 }
 0x117   :  { %v602_v5 = vadd.f32 %v601_v2, %v136_v34  ;;  %v3063_v7 = vadd.f32 %v672_v4, %v600_v63  ;;  %v653_v63 = vadd.f32 %v3035_v36, %v580_v33 }
 0x118   :  { %v603_v8 = vpop.f32.mrf.mxu0  ;;  %v674_v10 = vpop.f32.mrf.mxu1 }
 0x119   :  { %v604_v13 = vadd.f32 %v603_v8, %v3039_v37  ;;  %v3066_v14 = vadd.f32 %v674_v10, %v602_v5 }
 0x11a   :  { %v607_v16 = vpop.f32.mrf.mxu0  ;;  %v676_v18 = vpop.f32.mrf.mxu1 }
 0x11b   :  { %v608_v20 = vadd.f32 %v607_v16, %v136_v34  ;;  %v3068_v21 = vadd.f32 %v676_v18, %v604_v13 }
 0x11c   :  { %v609_v22 = vpop.f32.mrf.mxu0  ;;  %v680_v23 = vpop.f32.mrf.mxu1 }
 0x11d   :  { %v610_v25 = vadd.f32 %v609_v22, %v3039_v37  ;;  %v3071_v29 = vadd.f32 %v680_v23, %v608_v20  ;;  %v655_v23 = vadd.f32 %v3043_v40, %v3041_v38 }
 0x11e   :  { %v611_v35 = vpop.f32.mrf.mxu0  ;;  %v682_v39 = vpop.f32.mrf.mxu1 }
 0x11f   :  { %v612_v42 = vadd.f32 %v611_v35, %v136_v34  ;;  %v3073_v44 = vadd.f32 %v682_v39, %v610_v25  ;;  %v3083_v34 = vld [vmem:[%s3562_s5] ss:$0 sm:$0xff] }
 0x120   :  { %v613_v45 = vpop.f32.mrf.mxu0  ;;  %v684_v46 = vpop.f32.mrf.mxu1 }
 0x121   :  { %v3076_v49 = vadd.f32 %v613_v45, %v3039_v37  ;;  %v3078_v50 = vadd.f32 %v684_v46, %v612_v42 }
 0x122   :  { %v776_v51 = vpop.f32.mrf.mxu0  ;;  %v3108_v22 = vpop.f32.mrf.mxu1 }
 0x123   :  { %v783_v53 = vadd.f32 %v776_v51, %v651_v47 }
 0x124   :  { %v778_v30 = vpop.f32.mrf.mxu0 }
 0x125   :  { %v2259_v54 = vmul.f32 -1.442695, %v783_v53  ;;  %v796_v61 = vadd.f32 %v3083_v34, %v778_v30  ;;  %v657_v30 = vadd.f32 %v3048_v43, %v3046_v41  ;;  %v3122_v41 = vld [vmem:[%s3563_s1 + $0x8] sm:$0xff] }
 0x126   :  { %v780_v55 = vpop.f32.mrf.mxu0  ;;  %vm885_vm2 = vcmp.gt.f32.partialorder %v3122_v41, 0.0 }
 0x127   :  { %2571 = vpow2.f32 %v2259_v54 }
 0x128   :  { %v781_v57 = vpop.f32.mrf.mxu0 }
 0x134   :  { %v2572_v58 = vpop.eup %2571 }
 0x135   :  { %v787_v59 = vadd.f32 1.0, %v2572_v58 }
 0x137   :  { %2573 = vrcp.f32 %v787_v59 }
 0x144   :  { %v2574_v62 = vpop.eup %2573 }
 0x145   :  { %v797_v2 = vmul.f32 %v2574_v62, %v796_v61  ;;  %v800_v8 = vsub.f32 1.0, %v2574_v62  ;;  %v806_v13 = vmul.f32 0.0, %v2574_v62 }
 0x147   :  { %v798_v4 = vadd.f32 %v797_v2, %v653_v63 }
 0x149   :  { %2575 = vtanh.f32 %v798_v4 }
 0x156   :  { %v2576_v5 = vpop.eup %2575 }
 0x157   :  { %802 = vrot.lane.b32.xlu0 %v2576_v5, %s2624_s27 }
 0x1c9   :  { %v803_v10 = vpop.permute.xlu0 %802 }
 0x1ca   :  { %v805_v16 = vmul.f32 %v803_v10, %v800_v8 }
 0x1cc   :  { %v807_v18 = vadd.f32 %v806_v13, %v805_v16 }
 0x1ce   :  { %811 = vrot.lane.b32.xlu0 %v807_v18, %s2624_s27 }
 0x240   :  { %v812_v36 = vpop.permute.xlu0 %811 }
 0x241   :  { %v3094_v37 = vsel %vm809_vm0, %v812_v36, 0.0 }
 0x242   :  { %v815_v20 = vpack.c.bf16 %v3094_v37, %v3094_v37 }
 0x244   :  { %2261 = vmatmul.mubr.msk.bf16.vlgmr.msra.gmra.mxu1 %vm738_vm1, %v815_v20 }
 0x245   :  { %980 = vmatpush1.bf16.msra.mxu1 %v2922_v6  ;;  %1003 = vmatprep.mubr.bf16.mxu1 %v2623_v1 }
 0x246   :  { %981 = vmatprep.subr.bf16.mxu1 %v2934_v9 }
 0x249   :  { %982 = vmatpush1.bf16.msra.mxu1 %v2944_v11 }
 0x24a   :  { %983 = vmatprep.subr.bf16.mxu1 %v2950_v12 }
 0x24d   :  { %984 = vmatpush1.bf16.msra.mxu1 %v2964_v15 }
 0x24e   :  { %985 = vmatprep.subr.bf16.mxu1 %v2973_v17 }
 0x251   :  { %986 = vmatpush1.bf16.msra.mxu1 %v2984_v19 }
 0x252   :  { %1131 = vmatprep.subr.bf16.mxu1 %v2911_v3 }
 0x304   :  { %v853_v24 = vpop.f32.mrf.mxu1 }
 0x305   :  { %v860_v25 = vadd.f32 %v853_v24, %v655_v23 }
 0x306   :  { %v855_v35 = vpop.f32.mrf.mxu1 }
 0x307   :  { %v2262_v39 = vmul.f32 -1.442695, %v860_v25  ;;  %v867_v51 = vadd.f32 %v3083_v34, %v855_v35 }
 0x308   :  { %v857_v42 = vpop.f32.mrf.mxu1 }
 0x309   :  { %2577 = vpow2.f32 %v2262_v39 }
 0x30a   :  { %v858_v45 = vpop.f32.mrf.mxu1 }
 0x316   :  { %v2578_v46 = vpop.eup %2577 }
 0x317   :  { %v864_v47 = vadd.f32 1.0, %v2578_v46  ;;  %v3152_v46 = vld [vmem:[%s3563_s1 + $0x10] sm:$0xff] }
 0x318   :  { %vm961_vm3 = vcmp.gt.f32.partialorder %v3152_v46, 0.0 }
 0x319   :  { %2579 = vrcp.f32 %v864_v47 }
 0x326   :  { %v2580_v53 = vpop.eup %2579 }
 0x327   :  { %v868_v54 = vmul.f32 %v2580_v53, %v867_v51  ;;  %v871_v57 = vsub.f32 1.0, %v2580_v53 }
 0x329   :  { %v869_v55 = vadd.f32 %v868_v54, %v657_v30 }
 0x32b   :  { %2581 = vtanh.f32 %v869_v55 }
 0x338   :  { %v2582_v38 = vpop.eup %2581 }
 0x339   :  { %873 = vrot.lane.b32.xlu1 %v2582_v38, %s2624_s27 }
 0x33d   :  { %878 = vrot.lane.b32.xlu1 %v3094_v37, %s2624_s27 }
 0x3ab   :  { %v874_v40 = vpop.permute.xlu1 %873 }
 0x3ac   :  { %v876_v59 = vmul.f32 %v874_v40, %v871_v57 }
 0x3af   :  { %v879_v58 = vpop.permute.xlu1 %878 }
 0x3b0   :  { %v881_v33 = vmul.f32 %v2580_v53, %v879_v58 }
 0x3b2   :  { %v882_v61 = vadd.f32 %v881_v33, %v876_v59 }
 0x3b4   :  { %887 = vrot.lane.b32.xlu0 %v882_v61, %s2624_s27 }
 0x426   :  { %v888_v43 = vpop.permute.xlu0 %887 }
 0x427   :  { %v3128_v62 = vsel %vm885_vm2, %v888_v43, %v3094_v37 }
 0x428   :  { %v891_v63 = vpack.c.bf16 %v3128_v62, %v3128_v62  ;;  %954 = vrot.lane.b32.xlu0 %v3128_v62, %s2624_s27 }
 0x42a   :  { %2264 = vmatmul.mubr.msk.bf16.vlgmr.msra.gmra.mxu0 %vm738_vm1, %v891_v63 }
 0x42b   :  { %1056 = vmatpush1.bf16.msra.mxu0 %v2922_v6  ;;  %1079 = vmatprep.mubr.bf16.mxu0 %v2623_v1 }
 0x42c   :  { %1057 = vmatprep.subr.bf16.mxu0 %v2934_v9 }
 0x42f   :  { %1058 = vmatpush1.bf16.msra.mxu0 %v2944_v11 }
 0x430   :  { %1059 = vmatprep.subr.bf16.mxu0 %v2950_v12 }
 0x433   :  { %1060 = vmatpush1.bf16.msra.mxu0 %v2964_v15 }
 0x434   :  { %1061 = vmatprep.subr.bf16.mxu0 %v2973_v17 }
 0x437   :  { %1062 = vmatpush1.bf16.msra.mxu0 %v2984_v19 }
 0x438   :  { %1207 = vmatprep.subr.bf16.mxu0 %v2911_v3 }
 0x4ea   :  { %v929_v2 = vpop.f32.mrf.mxu0 }
 0x4eb   :  { %v936_v4 = vadd.f32 %v929_v2, %v3051_v48  ;;  %v955_v48 = vpop.permute.xlu0 %954 }
 0x4ec   :  { %v931_v5 = vpop.f32.mrf.mxu0 }
 0x4ed   :  { %v2265_v8 = vmul.f32 -1.442695, %v936_v4  ;;  %v943_v32 = vadd.f32 %v3083_v34, %v931_v5 }
 0x4ee   :  { %v933_v10 = vpop.f32.mrf.mxu0 }
 0x4ef   :  { %2583 = vpow2.f32 %v2265_v8  ;;  %v3182_v10 = vld [vmem:[%s3563_s1 + $0x18] sm:$0xff] }
 0x4f0   :  { %v934_v13 = vpop.f32.mrf.mxu0  ;;  %vm1037_vm4 = vcmp.gt.f32.partialorder %v3182_v10, 0.0 }
 0x4fc   :  { %v2584_v16 = vpop.eup %2583 }
 0x4fd   :  { %v940_v18 = vadd.f32 1.0, %v2584_v16 }
 0x4ff   :  { %2585 = vrcp.f32 %v940_v18 }
 0x50c   :  { %v2586_v36 = vpop.eup %2585 }
 0x50d   :  { %v944_v20 = vmul.f32 %v2586_v36, %v943_v32  ;;  %v947_v25 = vsub.f32 1.0, %v2586_v36  ;;  %v957_v39 = vmul.f32 %v2586_v36, %v955_v48 }
 0x50f   :  { %v945_v23 = vadd.f32 %v944_v20, %v3053_v52 }
 0x511   :  { %2587 = vtanh.f32 %v945_v23 }
 0x51e   :  { %v2588_v24 = vpop.eup %2587 }
 0x51f   :  { %949 = vrot.lane.b32.xlu1 %v2588_v24, %s2624_s27 }
 0x591   :  { %v950_v35 = vpop.permute.xlu1 %949 }
 0x592   :  { %v952_v42 = vmul.f32 %v950_v35, %v947_v25 }
 0x594   :  { %v958_v45 = vadd.f32 %v957_v39, %v952_v42 }
 0x596   :  { %963 = vrot.lane.b32.xlu1 %v958_v45, %s2624_s27 }
 0x608   :  { %v964_v52 = vpop.permute.xlu1 %963 }
 0x609   :  { %v3158_v47 = vsel %vm961_vm3, %v964_v52, %v3128_v62 }
 0x60a   :  { %v967_v51 = vpack.c.bf16 %v3158_v47, %v3158_v47  ;;  %1030 = vrot.lane.b32.xlu1 %v3158_v47, %s2624_s27 }
 0x60c   :  { %2267 = vmatmul.mubr.msk.bf16.vlgmr.msra.gmra.mxu1 %vm738_vm1, %v967_v51 }
 0x60d   :  { %1132 = vmatpush1.bf16.msra.mxu1 %v2922_v6  ;;  %1155 = vmatprep.mubr.bf16.mxu1 %v2623_v1 }
 0x60e   :  { %1133 = vmatprep.subr.bf16.mxu1 %v2934_v9 }
 0x611   :  { %1134 = vmatpush1.bf16.msra.mxu1 %v2944_v11 }
 0x612   :  { %1135 = vmatprep.subr.bf16.mxu1 %v2950_v12 }
 0x615   :  { %1136 = vmatpush1.bf16.msra.mxu1 %v2964_v15 }
 0x616   :  { %1137 = vmatprep.subr.bf16.mxu1 %v2973_v17 }
 0x619   :  { %1138 = vmatpush1.bf16.msra.mxu1 %v2984_v19 }
 0x61a   :  { %1283 = vmatprep.subr.bf16.mxu1 %v2911_v3 }
 0x6cc   :  { %v1005_v53 = vpop.f32.mrf.mxu1 }
 0x6cd   :  { %v1012_v30 = vadd.f32 %v1005_v53, %v3056_v56  ;;  %v1031_v56 = vpop.permute.xlu1 %1030 }
 0x6ce   :  { %v1007_v54 = vpop.f32.mrf.mxu1 }
 0x6cf   :  { %v2268_v55 = vmul.f32 -1.442695, %v1012_v30  ;;  %v1019_v59 = vadd.f32 %v3083_v34, %v1007_v54 }
 0x6d0   :  { %v1009_v38 = vpop.f32.mrf.mxu1 }
 0x6d1   :  { %2589 = vpow2.f32 %v2268_v55  ;;  %v3211_v38 = vld [vmem:[%s3563_s1 + $0x20] sm:$0xff] }
 0x6d2   :  { %v1010_v40 = vpop.f32.mrf.mxu1  ;;  %vm1113_vm5 = vcmp.gt.f32.partialorder %v3211_v38, 0.0 }
 0x6de   :  { %v2590_v57 = vpop.eup %2589 }
 0x6df   :  { %v1016_v58 = vadd.f32 1.0, %v2590_v57 }
 0x6e1   :  { %2591 = vrcp.f32 %v1016_v58 }
 0x6ee   :  { %v2592_v33 = vpop.eup %2591 }
 0x6ef   :  { %v1020_v61 = vmul.f32 %v2592_v33, %v1019_v59  ;;  %v1023_v3 = vsub.f32 1.0, %v2592_v33  ;;  %v1033_v4 = vmul.f32 %v2592_v33, %v1031_v56 }
 0x6f1   :  { %v1021_v43 = vadd.f32 %v1020_v61, %v3058_v60 }
 0x6f3   :  { %2593 = vtanh.f32 %v1021_v43 }
 0x700   :  { %v2594_v63 = vpop.eup %2593 }
 0x701   :  { %1025 = vrot.lane.b32.xlu0 %v2594_v63, %s2624_s27 }
 0x773   :  { %v1026_v2 = vpop.permute.xlu0 %1025 }
 0x774   :  { %v1028_v5 = vmul.f32 %v1026_v2, %v1023_v3 }
 0x776   :  { %v1034_v8 = vadd.f32 %v1033_v4, %v1028_v5 }
 0x778   :  { %1039 = vrot.lane.b32.xlu0 %v1034_v8, %s2624_s27  ;;  %v3240_v8 = vld [vmem:[%s3563_s1 + $0x28] sm:$0xff] }
 0x779   :  { %vm1189_vm6 = vcmp.gt.f32.partialorder %v3240_v8, 0.0 }
 0x7ea   :  { %v1040_v60 = vpop.permute.xlu0 %1039 }
 0x7eb   :  { %v3188_v13 = vsel %vm1037_vm4, %v1040_v60, %v3158_v47 }
 0x7ec   :  { %v1043_v16 = vpack.c.bf16 %v3188_v13, %v3188_v13  ;;  %1106 = vrot.lane.b32.xlu0 %v3188_v13, %s2624_s27 }
 0x7ee   :  { %2270 = vmatmul.mubr.msk.bf16.vlgmr.msra.gmra.mxu0 %vm738_vm1, %v1043_v16 }
 0x7ef   :  { %1208 = vmatpush1.bf16.msra.mxu0 %v2922_v6  ;;  %1231 = vmatprep.mubr.bf16.mxu0 %v2623_v1 }
 0x7f0   :  { %1209 = vmatprep.subr.bf16.mxu0 %v2934_v9 }
 0x7f3   :  { %1210 = vmatpush1.bf16.msra.mxu0 %v2944_v11 }
 0x7f4   :  { %1211 = vmatprep.subr.bf16.mxu0 %v2950_v12 }
 0x7f7   :  { %1212 = vmatpush1.bf16.msra.mxu0 %v2964_v15 }
 0x7f8   :  { %1213 = vmatprep.subr.bf16.mxu0 %v2973_v17 }
 0x7fb   :  { %1214 = vmatpush1.bf16.msra.mxu0 %v2984_v19 }
 0x8ae   :  { %v1081_v18 = vpop.f32.mrf.mxu0 }
 0x8af   :  { %v1088_v32 = vadd.f32 %v1081_v18, %v3061_v0  ;;  %v1107_v0 = vpop.permute.xlu0 %1106 }
 0x8b0   :  { %v1083_v36 = vpop.f32.mrf.mxu0 }
 0x8b1   :  { %v2271_v20 = vmul.f32 -1.442695, %v1088_v32  ;;  %v1095_v35 = vadd.f32 %v3083_v34, %v1083_v36 }
 0x8b2   :  { %v1085_v23 = vpop.f32.mrf.mxu0 }
 0x8b3   :  { %2595 = vpow2.f32 %v2271_v20 }
 0x8b4   :  { %v1086_v24 = vpop.f32.mrf.mxu0 }
 0x8c0   :  { %v2596_v25 = vpop.eup %2595 }
 0x8c1   :  { %v1092_v48 = vadd.f32 1.0, %v2596_v25 }
 0x8c3   :  { %2597 = vrcp.f32 %v1092_v48 }
 0x8d0   :  { %v2598_v39 = vpop.eup %2597 }
 0x8d1   :  { %v1096_v42 = vmul.f32 %v2598_v39, %v1095_v35  ;;  %v1099_v51 = vsub.f32 1.0, %v2598_v39  ;;  %v1109_v30 = vmul.f32 %v2598_v39, %v1107_v0 }
 0x8d3   :  { %v1097_v45 = vadd.f32 %v1096_v42, %v3063_v7 }
 0x8d5   :  { %2599 = vtanh.f32 %v1097_v45 }
 0x8e2   :  { %v2600_v52 = vpop.eup %2599 }
 0x8e3   :  { %1101 = vrot.lane.b32.xlu1 %v2600_v52, %s2624_s27 }
 0x955   :  { %v1102_v53 = vpop.permute.xlu1 %1101 }
 0x956   :  { %v1104_v54 = vmul.f32 %v1102_v53, %v1099_v51 }
 0x958   :  { %v1110_v55 = vadd.f32 %v1109_v30, %v1104_v54 }
 0x95a   :  { %1115 = vrot.lane.b32.xlu1 %v1110_v55, %s2624_s27  ;;  %v3261_v55 = vld [vmem:[%s3563_s1 + $0x30] sm:$0xff] }
 0x95b   :  { %vm1265_vm7 = vcmp.gt.f32.partialorder %v3261_v55, 0.0 }
 0x9cc   :  { %v1116_v7 = vpop.permute.xlu1 %1115 }
 0x9cd   :  { %v3217_v40 = vsel %vm1113_vm5, %v1116_v7, %v3188_v13 }
 0x9ce   :  { %v1119_v57 = vpack.c.bf16 %v3217_v40, %v3217_v40  ;;  %1182 = vrot.lane.b32.xlu1 %v3217_v40, %s2624_s27 }
 0x9d0   :  { %2273 = vmatmul.mubr.msk.bf16.vlgmr.msra.gmra.mxu1 %vm738_vm1, %v1119_v57 }
 0x9d1   :  { %1284 = vmatpush1.bf16.msra.mxu1 %v2922_v6  ;;  %1307 = vmatprep.mubr.bf16.mxu1 %v2623_v1 }
 0x9d2   :  { %1285 = vmatprep.subr.bf16.mxu1 %v2934_v9 }
 0x9d5   :  { %1286 = vmatpush1.bf16.msra.mxu1 %v2944_v11 }
 0x9d6   :  { %1287 = vmatprep.subr.bf16.mxu1 %v2950_v12 }
 0x9d9   :  { %1288 = vmatpush1.bf16.msra.mxu1 %v2964_v15 }
 0x9da   :  { %1289 = vmatprep.subr.bf16.mxu1 %v2973_v17 }
 0x9dd   :  { %1290 = vmatpush1.bf16.msra.mxu1 %v2984_v19 }
 0xa90   :  { %v1157_v58 = vpop.f32.mrf.mxu1 }
 0xa91   :  { %v1164_v59 = vadd.f32 %v1157_v58, %v3066_v14  ;;  %v1183_v14 = vpop.permute.xlu1 %1182  ;;  %v3276_v58 = vpack.c.bf16 %v3128_v62, %v3094_v37 }
 0xa92   :  { %v1159_v33 = vpop.f32.mrf.mxu1 }
 0xa93   :  { %v2274_v61 = vmul.f32 -1.442695, %v1164_v59  ;;  %v1171_v11 = vadd.f32 %v3083_v34, %v1159_v33 }
 0xa94   :  { %v1161_v6 = vpop.f32.mrf.mxu1 }
 0xa95   :  { %2601 = vpow2.f32 %v2274_v61 }
 0xa96   :  { %v1162_v43 = vpop.f32.mrf.mxu1 }
 0xaa2   :  { %v2602_v63 = vpop.eup %2601 }
 0xaa3   :  { %v1168_v9 = vadd.f32 1.0, %v2602_v63 }
 0xaa5   :  { %2603 = vrcp.f32 %v1168_v9 }
 0xab2   :  { %v2604_v12 = vpop.eup %2603 }
 0xab3   :  { %v1172_v3 = vmul.f32 %v2604_v12, %v1171_v11  ;;  %v1175_v19 = vsub.f32 1.0, %v2604_v12  ;;  %v1185_v2 = vmul.f32 %v2604_v12, %v1183_v14 }
 0xab5   :  { %v1173_v15 = vadd.f32 %v1172_v3, %v3068_v21 }
 0xab7   :  { %2605 = vtanh.f32 %v1173_v15 }
 0xac4   :  { %v2606_v17 = vpop.eup %2605 }
 0xac5   :  { %1177 = vrot.lane.b32.xlu0 %v2606_v17, %s2624_s27  ;;  %v687_v17 = vadd.f32 %v3108_v22, %v3076_v49  ;;  %v2561_v49 = vld [vmem:[%s3564_s6 + $0x8] sm:$0xff]   ;;  %v2562_v22 = vld [vmem:[%s3564_s6] sm:$0xff]  }
 0xb37   :  { %v1178_v56 = vpop.permute.xlu0 %1177 }
 0xb38   :  { %v1180_v4 = vmul.f32 %v1178_v56, %v1175_v19  ;;  %v2626_v56 = vmov 0.0  }
 0xb39   :  { %2331 = vmatprep.subr.bf16.mxu0 %v2626_v56  ;;  %2343 = vmatprep.subr.bf16.mxu1 %v2626_v56 }
 0xb3a   :  { %v1186_v5 = vadd.f32 %v1185_v2, %v1180_v4  ;;  %v2563_v4 = vld [vmem:[%s3565_s8 + $0x8] sm:$0xff]  }
 0xb3c   :  { %1191 = vrot.lane.b32.xlu0 %v1186_v5, %s2624_s27 }
 0xbae   :  { %v1192_v21 = vpop.permute.xlu0 %1191 }
 0xbaf   :  { %v3246_v60 = vsel %vm1189_vm6, %v1192_v21, %v3217_v40 }
 0xbb0   :  { %v1195_v16 = vpack.c.bf16 %v3246_v60, %v3246_v60  ;;  %1258 = vrot.lane.b32.xlu0 %v3246_v60, %s2624_s27  ;;  %v3282_v59 = vpack.c.bf16 %v3246_v60, %v3217_v40 }
 0xbb2   :  { %2276 = vmatmul.mubr.msk.bf16.vlgmr.msra.gmra.mxu0 %vm738_vm1, %v1195_v16 }
 0xbb3   :  { %2339 = vmatprep.mubr.msk.bf16.mxu0 %vm2627_vm8, %v2626_v56 }
 0xc72   :  { %v1233_v18 = vpop.f32.mrf.mxu0 }
 0xc73   :  { %v1240_v32 = vadd.f32 %v1233_v18, %v3071_v29  ;;  %v1259_v29 = vpop.permute.xlu0 %1258 }
 0xc74   :  { %v1235_v36 = vpop.f32.mrf.mxu0 }
 0xc75   :  { %v2277_v20 = vmul.f32 -1.442695, %v1240_v32  ;;  %v1247_v35 = vadd.f32 %v3083_v34, %v1235_v36 }
 0xc76   :  { %v1237_v23 = vpop.f32.mrf.mxu0 }
 0xc77   :  { %2607 = vpow2.f32 %v2277_v20  ;;  %v1531_v20 = vpack.c.bf16 %v3188_v13, %v3158_v47  ;;  %v1347_v23 = vadd.f32 %v3128_v62, %v3094_v37 }
 0xc78   :  { %v1238_v24 = vpop.f32.mrf.mxu0 }
 0xc79   :  { %v1348_v24 = vadd.f32 %v1347_v23, %v3158_v47 }
 0xc84   :  { %v2608_v25 = vpop.eup %2607 }
 0xc85   :  { %v1244_v48 = vadd.f32 1.0, %v2608_v25  ;;  %v1349_v25 = vadd.f32 %v1348_v24, %v3188_v13 }
 0xc87   :  { %2609 = vrcp.f32 %v1244_v48  ;;  %v3324_v48 = vld [vmem:[%s3563_s1 + $0x38] sm:$0xff] }
 0xc88   :  { %vm1341_vm9 = vcmp.gt.f32.partialorder %v3324_v48, 0.0 }
 0xc94   :  { %v2610_v39 = vpop.eup %2609 }
 0xc95   :  { %v1248_v42 = vmul.f32 %v2610_v39, %v1247_v35  ;;  %v1251_v51 = vsub.f32 1.0, %v2610_v39  ;;  %v1261_v53 = vmul.f32 %v2610_v39, %v1259_v29  ;;  %v1350_v35 = vadd.f32 %v1349_v25, %v3217_v40  ;;  %v2564_v40 = vld [vmem:[%s3565_s8] sm:$0xff]  }
 0xc97   :  { %v1249_v45 = vadd.f32 %v1248_v42, %v3073_v44  ;;  %v1351_v39 = vadd.f32 %v1350_v35, %v3246_v60 }
 0xc99   :  { %2611 = vtanh.f32 %v1249_v45 }
 0xca6   :  { %v2612_v52 = vpop.eup %2611 }
 0xca7   :  { %1253 = vrot.lane.b32.xlu1 %v2612_v52, %s2624_s27 }
 0xd19   :  { %v1254_v0 = vpop.permute.xlu1 %1253 }
 0xd1a   :  { %v1256_v30 = vmul.f32 %v1254_v0, %v1251_v51  ;;  %v1486_v51 = vsel %vm1484_vm11, 65535, %v2623_v1  ;;  %v2566_v0 = vld [vmem:[%s3566_s10 + $0x10] sm:$0xff]  }
 0xd1c   :  { %v1262_v54 = vadd.f32 %v1261_v53, %v1256_v30  ;;  %v2567_v53 = vld [vmem:[%s3566_s10 + $0x8] sm:$0xff]   ;;  %v2568_v30 = vld [vmem:[%s3566_s10] sm:$0xff]  }
 0xd1e   :  { %1267 = vrot.lane.b32.xlu1 %v1262_v54, %s2624_s27  ;;  %v2569_v54 = vld [vmem:[%s3567_s9 + $0x8] sm:$0xff]  }
 0xd90   :  { %v1268_v44 = vpop.permute.xlu1 %1267 }
 0xd91   :  { %v3267_v7 = vsel %vm1265_vm7, %v1268_v44, %v3246_v60  ;;  %v2565_v60 = vld [vmem:[%s3566_s10 + $0x18] ss:$0 sps:$4 sm:$0x11]   ;;  %v2282_v44 = vld [vmem:[%s3568_s7] ss:$0 sm:$0xff] }
 0xd92   :  { %v1271_v57 = vpack.c.bf16 %v3267_v7, %v3267_v7  ;;  %1334 = vrot.lane.b32.xlu1 %v3267_v7, %s2624_s27  ;;  %v1352_v42 = vadd.f32 %v1351_v39, %v3267_v7  ;;  %v1488_v29 = vand.u32 %v2565_v60, %v1486_v51 }
 0xd94   :  { %2279 = vmatmul.mubr.msk.bf16.vlgmr.msra.gmra.mxu1 %vm738_vm1, %v1271_v57 }
 0xd95   :  { %2351 = vmatprep.mubr.msk.bf16.mxu1 %vm2627_vm8, %v2626_v56  ;;  %2344 = vmatpush3.bf16.msra.mxu1 %v1488_v29 }
 0xd96   :  { %1636 = vrot.lane.b32.xlu1 %v3276_v58, %s2625_s2  ;;  %2345 = vmatprep.subr.bf16.mxu1 %v2626_v56 }
 0xd99   :  { %2346 = vmatpush3.bf16.msra.mxu1 %v2566_v0 }
 0xd9a   :  { %1640 = vrot.lane.b32.xlu1 %v3282_v59, %s2625_s2  ;;  %2347 = vmatprep.subr.bf16.mxu1 %v2626_v56 }
 0xd9d   :  { %2348 = vmatpush3.bf16.msra.mxu1 %v2567_v53 }
 0xd9e   :  { %2349 = vmatprep.subr.bf16.mxu1 %v2626_v56 }
 0xda1   :  { %2350 = vmatpush3.bf16.msra.mxu1 %v2568_v30 }
 0xda2   :  { %2367 = vmatprep.subr.bf16.mxu1 %v2569_v54 }
 0xe04   :  { %v1335_v21 = vpop.permute.xlu1 %1334 }
 0xe54   :  { %v1309_v33 = vpop.f32.mrf.mxu1 }
 0xe55   :  { %v1316_v61 = vadd.f32 %v1309_v33, %v3078_v50  ;;  %v2559_v50 = vld [vmem:[%s3564_s6 + $0x18] sm:$0xff]  }
 0xe56   :  { %v1311_v6 = vpop.f32.mrf.mxu1  ;;  %2332 = vmatpush3.bf16.msra.mxu0 %v2559_v50 }
 0xe57   :  { %v2280_v43 = vmul.f32 -1.442695, %v1316_v61  ;;  %v1323_v3 = vadd.f32 %v3083_v34, %v1311_v6  ;;  %v2560_v34 = vld [vmem:[%s3564_s6 + $0x10] sm:$0xff]   ;;  %2333 = vmatprep.subr.bf16.mxu0 %v2626_v56 }
 0xe58   :  { %v1313_v63 = vpop.f32.mrf.mxu1 }
 0xe59   :  { %2613 = vpow2.f32 %v2280_v43 }
 0xe5a   :  { %v1314_v9 = vpop.f32.mrf.mxu1  ;;  %2334 = vmatpush3.bf16.msra.mxu0 %v2560_v34 }
 0xe5b   :  { %2335 = vmatprep.subr.bf16.mxu0 %v2626_v56 }
 0xe5e   :  { %2336 = vmatpush3.bf16.msra.mxu0 %v2561_v49 }
 0xe5f   :  { %2337 = vmatprep.subr.bf16.mxu0 %v2626_v56 }
 0xe62   :  { %2338 = vmatpush3.bf16.msra.mxu0 %v2562_v22 }
 0xe63   :  { %2355 = vmatprep.subr.bf16.mxu0 %v2563_v4 }
 0xe66   :  { %v2614_v11 = vpop.eup %2613 }
 0xe67   :  { %v1320_v12 = vadd.f32 1.0, %v2614_v11  ;;  %v2570_v11 = vld [vmem:[%s3567_s9] sm:$0xff]  }
 0xe69   :  { %2615 = vrcp.f32 %v1320_v12  ;;  %v1637_v12 = vpop.permute.xlu1 %1636 }
 0xe76   :  { %v2616_v15 = vpop.eup %2615 }
 0xe77   :  { %v1324_v19 = vmul.f32 %v2616_v15, %v1323_v3  ;;  %v1327_v5 = vsub.f32 1.0, %v2616_v15  ;;  %v1337_v18 = vmul.f32 %v2616_v15, %v1335_v21  ;;  %v1641_v15 = vpop.permute.xlu1 %1640 }
 0xe79   :  { %v1325_v14 = vadd.f32 %v1324_v19, %v687_v17  ;;  %v2628_v19 = vmov 1  }
 0xe7a   :  { %2391 = vset.pattern.permute.xlu0 %v2628_v19 }
 0xe7b   :  { %2617 = vtanh.f32 %v1325_v14 }
 0xe88   :  { %v2618_v2 = vpop.eup %2617 }
 0xe89   :  { %1329 = vrot.lane.b32.xlu0 %v2618_v2, %s2624_s27 }
 0xefb   :  { %v1330_v16 = vpop.permute.xlu0 %1329 }
 0xefc   :  { %v1332_v32 = vmul.f32 %v1330_v16, %v1327_v5 }
 0xefe   :  { %v1338_v36 = vadd.f32 %v1337_v18, %v1332_v32  ;;  %v2289_v18 = vld [vmem:[%s3569_s11] ss:$0 sm:$0xff] }
 0xf00   :  { %1343 = vrot.lane.b32.xlu0 %v1338_v36, %s2624_s27 }
 0xf04   :  { %1638 = vrot.lane.b32.xlu0 %v1531_v20, %s2625_s2 }
 0xf72   :  { %v1344_v45 = vpop.permute.xlu0 %1343 }
 0xf73   :  { %v1346_v37 = vsel %vm1341_vm9, %v1344_v45, %v3267_v7 }
 0xf74   :  { %v1353_v62 = vadd.f32 %v1352_v42, %v1346_v37  ;;  %v1533_v47 = vpack.c.bf16 %v1346_v37, %v3267_v7 }
 0xf76   :  { %v1354_v13 = vmul.f32 0.125, %v1353_v62  ;;  %1642 = vrot.lane.b32.xlu0 %v1533_v47, %s2625_s2  ;;  %v1639_v3 = vpop.permute.xlu0 %1638 }
 0xf78   :  { %v1355_v52 = vpack.c.bf16 %v1354_v13, %v1354_v13 }
 0xf7a   :  { %2340 = vmatmul.mubr.msk.bf16.vlgmr.msra.gmra.mxu0 %vm738_vm1, %v1355_v52 }
 0xf7b   :  { %2356 = vmatpush3.bf16.msra.mxu0 %v2563_v4  ;;  %2359 = vmatprep.mubr.msk.bf16.mxu0 %vm1550_vm10, %v3276_v58 }
 0xf7c   :  { %2357 = vmatprep.subr.bf16.mxu0 %v2564_v40 }
 0xf7f   :  { %2358 = vmatpush3.bf16.msra.mxu0 %v2564_v40 }
 0xf82   :  { %2360 = vmatmul.mubr.msk.bf16.vlgmr.msra.gmra.mxu0 %vm1550_vm10, %v1531_v20 }
 0xf83   :  { %2363 = vmatprep.mubr.msk.bf16.mxu0 %vm1550_vm10, %v3282_v59 }
 0xf8a   :  { %2364 = vmatmul.mubr.msk.bf16.gmra.mxu0 %vm1550_vm10, %v1533_v47 }
 0xfe8   :  { %v1643_v17 = vpop.permute.xlu0 %1642 }
0x103a   :  { %v1432_v7 = vpop.f32.mrf.mxu0 }
0x103b   :  { %v1433_v57 = vadd.f32 %v2282_v44, %v1432_v7  ;;  %v2307_v44 = vld [vmem:[%s3570_s12] ss:$0 sm:$0xff] }
0x103c   :  { %v2341_v58 = vpop.f32.mrf.mxu0 }
0x103d   :  { %v2288_v59 = vmul.f32 -1.442695, %v1433_v57  ;;  %v2629_v58 = vmov 4  }
0x103e   :  { %v1435_v33 = vpop.f32.mrf.mxu0 }
0x103f   :  { %2619 = vpow2.f32 %v2288_v59  ;;  %v2630_v59 = vmov 2   ;;  %v2631_v33 = vmov 3  }
0x1040   :  { %v2342_v61 = vpop.f32.mrf.mxu0 }
0x1041   :  { %v1808_v61 = vsel %vm885_vm2, 1, %v2623_v1 }
0x1042   :  { %v3375_v14 = vpop.f32.mrf.mxu0 }
0x1044   :  { %v1597_v50 = vpop.f32.mrf.mxu0 }
0x1046   :  { %v2362_v34 = vpop.f32.mrf.mxu0 }
0x1048   :  { %v1600_v2 = vpop.f32.mrf.mxu0 }
0x104a   :  { %v2365_v49 = vpop.f32.mrf.mxu0 }
0x104c   :  { %v2620_v6 = vpop.eup %2619  ;;  %v1613_v22 = vpop.f32.mrf.mxu0 }
0x104d   :  { %v1441_v43 = vadd.f32 1.0, %v2620_v6  ;;  %v1733_v6 = vld [vmem:[%s3571_s14] sm:$0x1f] }
0x104e   :  { %v2366_v21 = vpop.f32.mrf.mxu0 }
0x104f   :  { %2621 = vrcp.f32 %v1441_v43  ;;  %v3415_v43 = vrot.slane %v1733_v6, %v139_v31  ;;  %v1799_v31 = vsub.s32 4, %v3024_v27 }
0x1050   :  { %v1616_v36 = vpop.f32.mrf.mxu0 }
0x105c   :  { %v2622_v63 = vpop.eup %2621 }
0x105d   :  { %v1444_v9 = vpack.c.bf16 %v2622_v63, %v2622_v63  ;;  %v3419_v63 = vrot.slane %v1733_v6, %v135_v28 }
0x105f   :  { %2352 = vmatmul.mubr.msk.bf16.vlgmr.msra.gmra.mxu1 %vm1480_vm12, %v1444_v9  ;;  %v1775_v9 = vsub.s32 2, %v3024_v27 }
0x1060   :  { %2368 = vmatpush3.bf16.msra.mxu1 %v2569_v54  ;;  %2371 = vmatprep.mubr.msk.bf16.mxu1 %vm1550_vm10, %v1637_v12 }
0x1061   :  { %2369 = vmatprep.subr.bf16.mxu1 %v2570_v11 }
0x1064   :  { %2370 = vmatpush3.bf16.msra.mxu1 %v2570_v11 }
0x1067   :  { %2372 = vmatmul.mubr.msk.bf16.vlgmr.msra.gmra.mxu1 %vm1550_vm10, %v1639_v3 }
0x1068   :  { %2375 = vmatprep.mubr.msk.bf16.mxu1 %vm1550_vm10, %v1641_v15  ;;  %v3424_v15 = vrot.slane %v1733_v6, %v1775_v9 }
0x106f   :  { %2376 = vmatmul.mubr.msk.bf16.gmra.mxu1 %vm1550_vm10, %v1643_v17  ;;  %v1787_v17 = vsub.s32 3, %v3024_v27 }
0x111f   :  { %v1524_v4 = vpop.f32.mrf.mxu1 }
0x1120   :  { %v3380_v23 = vadd.f32 %v2289_v18, %v1524_v4 }
0x1121   :  { %v2353_v5 = vpop.f32.mrf.mxu1 }
0x1123   :  { %v1527_v16 = vpop.f32.mrf.mxu1 }
0x1125   :  { %v2354_v32 = vpop.f32.mrf.mxu1 }
0x1127   :  { %v2373_v20 = vpop.f32.mrf.mxu1 }
0x1128   :  { %v1993_v24 = vadd.f32 %v2373_v20, %v1616_v36 }
0x1129   :  { %v1702_v25 = vpop.f32.mrf.mxu1 }
0x112a   :  { %v3383_v35 = vadd.f32 %v1993_v24, %v3380_v23  ;;  %v2087_v39 = vadd.f32 %v2366_v21, %v1702_v25 }
0x112b   :  { %v2374_v42 = vpop.f32.mrf.mxu1 }
0x112c   :  { %v3386_v45 = vadd.f32 %v2087_v39, %v3380_v23  ;;  %v1946_v37 = vadd.f32 %v2374_v42, %v1613_v22  ;;  %v3432_v22 = vrot.slane %v1733_v6, %v1799_v31 }
0x112d   :  { %v1705_v62 = vpop.f32.mrf.mxu1 }
0x112e   :  { %v3389_v47 = vadd.f32 %v1946_v37, %v3380_v23  ;;  %v2040_v13 = vadd.f32 %v2365_v49, %v1705_v62  ;;  %v1855_v37 = vsel %vm961_vm3, 1, %v2623_v1 }
0x112f   :  { %v2377_v52 = vpop.f32.mrf.mxu1 }
0x1130   :  { %v3392_v40 = vadd.f32 %v2040_v13, %v3380_v23  ;;  %v1805_v60 = vadd.f32 %v2377_v52, %v1600_v2  ;;  %v3429_v2 = vrot.slane %v1733_v6, %v1787_v17 }
0x1131   :  { %v1718_v51 = vpop.f32.mrf.mxu1 }
0x1132   :  { %v1806_v29 = vadd.f32 %v1805_v60, %v3380_v23  ;;  %v1899_v0 = vadd.f32 %v2362_v34, %v1718_v51 }
0x1133   :  { %v2378_v53 = vpop.f32.mrf.mxu1 }
0x1134   :  { %v3396_v30 = vadd.f32 %v1899_v0, %v3380_v23  ;;  %v1738_v54 = vadd.f32 %v2378_v53, %v1597_v50 }
0x1135   :  { %v1721_v53 = vpop.f32.mrf.mxu1 }
0x1136   :  { %v1739_v7 = vadd.f32 %v1738_v54, %v3380_v23 }
0x1138   :  { %v1746_v57 = vadd.f32 %v2307_v44, %v1739_v7 }
0x113a   :  { %1758 = vperm.xlu0 %2391, %v1746_v57   ;;  %1749 = vperm.xlu1 %2390, %v1746_v57  }
0x113e   :  { %2394 = vset.pattern.permute.xlu0 %v2629_v58  ;;  %2392 = vset.pattern.permute.xlu1 %v2630_v59 }
0x113f   :  { %1794 = vperm.xlu0 %2394, %v1746_v57   ;;  %1770 = vperm.xlu1 %2392, %v1746_v57  }
0x1143   :  { %2393 = vset.pattern.permute.xlu1 %v2631_v33  ;;  %2396 = vset.pattern.permute.xlu0 %v2628_v19 }
0x1144   :  { %1782 = vperm.xlu1 %2393, %v1746_v57  }
0x1148   :  { %2395 = vset.pattern.permute.xlu1 %v2623_v1 }
0x1149   :  { %1810 = vperm.xlu1 %2395, %v1808_v61  }
0x11b5   :  { %v1759_v11 = vpop.permute.xlu0 %1758  ;;  %v1750_v41 = vpop.permute.xlu1 %1749 }
0x11b6   :  { %v1765_v12 = vadd.f32 %v3415_v43, %v1759_v11  ;;  %v1756_v3 = vadd.f32 %v3419_v63, %v1750_v41 }
0x11b8   :  { %vm1766_vm13 = vcmp.gt.f32.partialorder %v1765_v12, %v1756_v3 }
0x11b9   :  { %v1767_v28 = vsel %vm1766_vm13, %v1765_v12, %v1756_v3  ;;  %v1768_v49 = vsel %vm1766_vm13, 1.0, %v2626_v56 }
0x11ba   :  { %v1771_v50 = vpop.permute.xlu1 %1770  ;;  %v1795_v5 = vpop.permute.xlu0 %1794 }
0x11bb   :  { %v1777_v34 = vadd.f32 %v3424_v15, %v1771_v50  ;;  %v1801_v32 = vadd.f32 %v3432_v22, %v1795_v5 }
0x11bd   :  { %vm1778_vm14 = vcmp.gt.f32.partialorder %v1777_v34, %v1767_v28 }
0x11be   :  { %v1780_v4 = vsel %vm1778_vm14, 2.0, %v1768_v49  ;;  %v1779_v18 = vsel %vm1778_vm14, %v1777_v34, %v1767_v28 }
0x11bf   :  { %v1783_v21 = vpop.permute.xlu1 %1782 }
0x11c0   :  { %v1789_v16 = vadd.f32 %v3429_v2, %v1783_v21 }
0x11c2   :  { %vm1790_vm15 = vcmp.gt.f32.partialorder %v1789_v16, %v1779_v18 }
0x11c3   :  { %v1791_v27 = vsel %vm1790_vm15, %v1789_v16, %v1779_v18  ;;  %v1792_v36 = vsel %vm1790_vm15, 3.0, %v1780_v4 }
0x11c4   :  { %vm1802_vm0 = vcmp.gt.f32.partialorder %v1801_v32, %v1791_v27  ;;  %v1811_v20 = vpop.permute.xlu1 %1810 }
0x11c5   :  { %v1803_v24 = vsel %vm1802_vm0, %v1801_v32, %v1791_v27  ;;  %vm1812_vm1 = vcmp.eq.s32.totalorder %v1811_v20, 1  ;;  %v3436_v25 = vsel %vm1802_vm0, 4.0, %v1792_v36 }
0x11c6   :  { %v1807_v39 = vadd.f32 %v1806_v29, %v1803_v24 }
0x11c8   :  { %v1813_v42 = vsel %vm1812_vm1, %v1807_v39, %v1746_v57  ;;  %v1852_v57 = vadd.f32 %v3375_v14, %v1721_v53  ;;  %v1902_v14 = vsel %vm1037_vm4, 1, %v2623_v1 }
0x11c9   :  { %1821 = vperm.xlu0 %2396, %v1813_v42   ;;  %1816 = vperm.xlu1 %2395, %v1813_v42  }
0x11ca   :  { %v1853_v12 = vadd.f32 %v1852_v57, %v3380_v23 }
0x11cd   :  { %2399 = vset.pattern.permute.xlu0 %v2629_v58  ;;  %2397 = vset.pattern.permute.xlu1 %v2630_v59 }
0x11ce   :  { %1845 = vperm.xlu0 %2399, %v1813_v42   ;;  %1829 = vperm.xlu1 %2397, %v1813_v42  }
0x11d2   :  { %2398 = vset.pattern.permute.xlu1 %v2631_v33  ;;  %2401 = vset.pattern.permute.xlu0 %v2628_v19 }
0x11d3   :  { %1837 = vperm.xlu1 %2398, %v1813_v42  }
0x11d7   :  { %2400 = vset.pattern.permute.xlu1 %v2623_v1 }
0x11d8   :  { %1857 = vperm.xlu1 %2400, %v1855_v37  }
0x1244   :  { %v1822_v62 = vpop.permute.xlu0 %1821  ;;  %v1817_v13 = vpop.permute.xlu1 %1816 }
0x1245   :  { %v1824_v52 = vadd.f32 %v1822_v62, %v3415_v43  ;;  %v1819_v60 = vadd.f32 %v1817_v13, %v3419_v63 }
0x1247   :  { %vm1825_vm2 = vcmp.gt.f32.partialorder %v1824_v52, %v1819_v60 }
0x1248   :  { %v1826_v0 = vsel %vm1825_vm2, %v1824_v52, %v1819_v60  ;;  %v1827_v54 = vsel %vm1825_vm2, 1.0, %v2626_v56 }
0x1249   :  { %v1830_v51 = vpop.permute.xlu1 %1829  ;;  %v1846_v44 = vpop.permute.xlu0 %1845 }
0x124a   :  { %v1832_v29 = vadd.f32 %v1830_v51, %v3424_v15  ;;  %v1848_v9 = vadd.f32 %v1846_v44, %v3432_v22  ;;  %v1949_v51 = vsel %vm1113_vm5, 1, %v2623_v1 }
0x124c   :  { %vm1833_vm8 = vcmp.gt.f32.partialorder %v1832_v29, %v1826_v0 }
0x124d   :  { %v1835_v46 = vsel %vm1833_vm8, 2.0, %v1827_v54  ;;  %v1834_v6 = vsel %vm1833_vm8, %v1832_v29, %v1826_v0 }
0x124e   :  { %v1838_v7 = vpop.permute.xlu1 %1837 }
0x124f   :  { %v1840_v61 = vadd.f32 %v1838_v7, %v3429_v2 }
0x1251   :  { %vm1841_vm3 = vcmp.gt.f32.partialorder %v1840_v61, %v1834_v6 }
0x1252   :  { %v1842_v11 = vsel %vm1841_vm3, %v1840_v61, %v1834_v6  ;;  %v1843_v41 = vsel %vm1841_vm3, 3.0, %v1835_v46 }
0x1253   :  { %vm1849_vm10 = vcmp.gt.f32.partialorder %v1848_v9, %v1842_v11  ;;  %v1858_v3 = vpop.permute.xlu1 %1857 }
0x1254   :  { %v1850_v17 = vsel %vm1849_vm10, %v1848_v9, %v1842_v11  ;;  %vm1859_vm11 = vcmp.eq.s32.totalorder %v1858_v3, 1  ;;  %v3454_v31 = vsel %vm1849_vm10, 4.0, %v1843_v41 }
0x1255   :  { %v1854_v50 = vadd.f32 %v1853_v12, %v1850_v17 }
0x1257   :  { %v1860_v34 = vsel %vm1859_vm11, %v1854_v50, %v1813_v42 }
0x1258   :  { %1868 = vperm.xlu0 %2401, %v1860_v34   ;;  %1863 = vperm.xlu1 %2400, %v1860_v34  }
0x125c   :  { %2404 = vset.pattern.permute.xlu0 %v2629_v58  ;;  %2402 = vset.pattern.permute.xlu1 %v2630_v59 }
0x125d   :  { %1892 = vperm.xlu0 %2404, %v1860_v34   ;;  %1876 = vperm.xlu1 %2402, %v1860_v34  }
0x1261   :  { %2403 = vset.pattern.permute.xlu1 %v2631_v33  ;;  %2406 = vset.pattern.permute.xlu0 %v2628_v19 }
0x1262   :  { %1884 = vperm.xlu1 %2403, %v1860_v34  }
0x1266   :  { %2405 = vset.pattern.permute.xlu1 %v2623_v1 }
0x1267   :  { %1904 = vperm.xlu1 %2405, %v1902_v14  }
0x12d3   :  { %v1869_v23 = vpop.permute.xlu0 %1868  ;;  %v1864_v28 = vpop.permute.xlu1 %1863 }
0x12d4   :  { %v1871_v49 = vadd.f32 %v1869_v23, %v3415_v43  ;;  %v1866_v4 = vadd.f32 %v1864_v28, %v3419_v63  ;;  %v1996_v23 = vsel %vm1189_vm6, 1, %v2623_v1 }
0x12d6   :  { %vm1872_vm12 = vcmp.gt.f32.partialorder %v1871_v49, %v1866_v4 }
0x12d7   :  { %v1873_v16 = vsel %vm1872_vm12, %v1871_v49, %v1866_v4  ;;  %v1874_v18 = vsel %vm1872_vm12, 1.0, %v2626_v56 }
0x12d8   :  { %v1877_v5 = vpop.permute.xlu1 %1876  ;;  %v1893_v10 = vpop.permute.xlu0 %1892 }
0x12d9   :  { %v1879_v21 = vadd.f32 %v1877_v5, %v3424_v15  ;;  %v1895_v24 = vadd.f32 %v1893_v10, %v3432_v22 }
0x12db   :  { %vm1880_vm13 = vcmp.gt.f32.partialorder %v1879_v21, %v1873_v16 }
0x12dc   :  { %v1882_v32 = vsel %vm1880_vm13, 2.0, %v1874_v18  ;;  %v1881_v20 = vsel %vm1880_vm13, %v1879_v21, %v1873_v16 }
0x12dd   :  { %v1885_v27 = vpop.permute.xlu1 %1884 }
0x12de   :  { %v1887_v36 = vadd.f32 %v1885_v27, %v3429_v2 }
0x12e0   :  { %vm1888_vm4 = vcmp.gt.f32.partialorder %v1887_v36, %v1881_v20 }
0x12e1   :  { %v1889_v39 = vsel %vm1888_vm4, %v1887_v36, %v1881_v20  ;;  %v1890_v42 = vsel %vm1888_vm4, 3.0, %v1882_v32 }
0x12e2   :  { %vm1896_vm14 = vcmp.gt.f32.partialorder %v1895_v24, %v1889_v39  ;;  %v1905_v37 = vpop.permute.xlu1 %1904 }
0x12e3   :  { %v1897_v62 = vsel %vm1896_vm14, %v1895_v24, %v1889_v39  ;;  %vm1906_vm15 = vcmp.eq.s32.totalorder %v1905_v37, 1  ;;  %v3470_v13 = vsel %vm1896_vm14, 4.0, %v1890_v42 }
0x12e4   :  { %v1901_v52 = vadd.f32 %v3396_v30, %v1897_v62 }
0x12e6   :  { %v1907_v60 = vsel %vm1906_vm15, %v1901_v52, %v1860_v34 }
0x12e7   :  { %1915 = vperm.xlu0 %2406, %v1907_v60   ;;  %1910 = vperm.xlu1 %2405, %v1907_v60  }
0x12eb   :  { %2409 = vset.pattern.permute.xlu0 %v2629_v58  ;;  %2407 = vset.pattern.permute.xlu1 %v2630_v59 }
0x12ec   :  { %1939 = vperm.xlu0 %2409, %v1907_v60   ;;  %1923 = vperm.xlu1 %2407, %v1907_v60  }
0x12f0   :  { %2408 = vset.pattern.permute.xlu1 %v2631_v33  ;;  %2411 = vset.pattern.permute.xlu0 %v2628_v19 }
0x12f1   :  { %1931 = vperm.xlu1 %2408, %v1907_v60  }
0x12f5   :  { %2410 = vset.pattern.permute.xlu1 %v2623_v1 }
0x12f6   :  { %1951 = vperm.xlu1 %2410, %v1949_v51   ;;  %v2043_v51 = vsel %vm1265_vm7, 1, %v2623_v1 }
0x1362   :  { %v1916_v30 = vpop.permute.xlu0 %1915  ;;  %v1911_v29 = vpop.permute.xlu1 %1910 }
0x1363   :  { %v1918_v0 = vadd.f32 %v1916_v30, %v3415_v43  ;;  %v1913_v53 = vadd.f32 %v1911_v29, %v3419_v63 }
0x1365   :  { %vm1919_vm0 = vcmp.gt.f32.partialorder %v1918_v0, %v1913_v53 }
0x1366   :  { %v1920_v44 = vsel %vm1919_vm0, %v1918_v0, %v1913_v53  ;;  %v1921_v7 = vsel %vm1919_vm0, 1.0, %v2626_v56 }
0x1367   :  { %v1924_v54 = vpop.permute.xlu1 %1923  ;;  %v1940_v38 = vpop.permute.xlu0 %1939 }
0x1368   :  { %v1926_v46 = vadd.f32 %v1924_v54, %v3424_v15  ;;  %v1942_v11 = vadd.f32 %v1940_v38, %v3432_v22 }
0x136a   :  { %vm1927_vm1 = vcmp.gt.f32.partialorder %v1926_v46, %v1920_v44 }
0x136b   :  { %v1929_v57 = vsel %vm1927_vm1, 2.0, %v1921_v7  ;;  %v1928_v9 = vsel %vm1927_vm1, %v1926_v46, %v1920_v44 }
0x136c   :  { %v1932_v61 = vpop.permute.xlu1 %1931 }
0x136d   :  { %v1934_v6 = vadd.f32 %v1932_v61, %v3429_v2 }
0x136f   :  { %vm1935_vm5 = vcmp.gt.f32.partialorder %v1934_v6, %v1928_v9 }
0x1370   :  { %v1936_v41 = vsel %vm1935_vm5, %v1934_v6, %v1928_v9  ;;  %v1937_v12 = vsel %vm1935_vm5, 3.0, %v1929_v57 }
0x1371   :  { %vm1943_vm2 = vcmp.gt.f32.partialorder %v1942_v11, %v1936_v41  ;;  %v1952_v3 = vpop.permute.xlu1 %1951 }
0x1372   :  { %v1944_v17 = vsel %vm1943_vm2, %v1942_v11, %v1936_v41  ;;  %vm1953_vm8 = vcmp.eq.s32.totalorder %v1952_v3, 1  ;;  %v3487_v50 = vsel %vm1943_vm2, 4.0, %v1937_v12 }
0x1373   :  { %v1948_v34 = vadd.f32 %v3389_v47, %v1944_v17 }
0x1375   :  { %v1954_v14 = vsel %vm1953_vm8, %v1948_v34, %v1907_v60  ;;  %v2090_v34 = vsel %vm1341_vm9, 1, %v2623_v1  ;;  %vm2104_vm8 = vcmask 39936  }
0x1376   :  { %1962 = vperm.xlu0 %2411, %v1954_v14   ;;  %1957 = vperm.xlu1 %2410, %v1954_v14  }
0x137a   :  { %2414 = vset.pattern.permute.xlu0 %v2629_v58  ;;  %2412 = vset.pattern.permute.xlu1 %v2630_v59 }
0x137b   :  { %1986 = vperm.xlu0 %2414, %v1954_v14   ;;  %1970 = vperm.xlu1 %2412, %v1954_v14  }
0x137f   :  { %2413 = vset.pattern.permute.xlu1 %v2631_v33  ;;  %2416 = vset.pattern.permute.xlu0 %v2628_v19 }
0x1380   :  { %1978 = vperm.xlu1 %2413, %v1954_v14  }
0x1384   :  { %2415 = vset.pattern.permute.xlu1 %v2623_v1 }
0x1385   :  { %1998 = vperm.xlu1 %2415, %v1996_v23  }
0x13f1   :  { %v1963_v47 = vpop.permute.xlu0 %1962  ;;  %v1958_v28 = vpop.permute.xlu1 %1957 }
0x13f2   :  { %v1965_v49 = vadd.f32 %v1963_v47, %v3415_v43  ;;  %v1960_v4 = vadd.f32 %v1958_v28, %v3419_v63 }
0x13f4   :  { %vm1966_vm3 = vcmp.gt.f32.partialorder %v1965_v49, %v1960_v4 }
0x13f5   :  { %v1967_v16 = vsel %vm1966_vm3, %v1965_v49, %v1960_v4  ;;  %v1968_v18 = vsel %vm1966_vm3, 1.0, %v2626_v56 }
0x13f6   :  { %v1971_v5 = vpop.permute.xlu1 %1970  ;;  %v1987_v8 = vpop.permute.xlu0 %1986 }
0x13f7   :  { %v1973_v21 = vadd.f32 %v1971_v5, %v3424_v15  ;;  %v1989_v20 = vadd.f32 %v1987_v8, %v3432_v22 }
0x13f9   :  { %vm1974_vm10 = vcmp.gt.f32.partialorder %v1973_v21, %v1967_v16 }
0x13fa   :  { %v1976_v32 = vsel %vm1974_vm10, 2.0, %v1968_v18  ;;  %v1975_v36 = vsel %vm1974_vm10, %v1973_v21, %v1967_v16 }
0x13fb   :  { %v1979_v10 = vpop.permute.xlu1 %1978 }
0x13fc   :  { %v1981_v27 = vadd.f32 %v1979_v10, %v3429_v2 }
0x13fe   :  { %vm1982_vm6 = vcmp.gt.f32.partialorder %v1981_v27, %v1975_v36 }
0x13ff   :  { %v1983_v24 = vsel %vm1982_vm6, %v1981_v27, %v1975_v36  ;;  %v1984_v39 = vsel %vm1982_vm6, 3.0, %v1976_v32 }
0x1400   :  { %vm1990_vm11 = vcmp.gt.f32.partialorder %v1989_v20, %v1983_v24  ;;  %v1999_v42 = vpop.permute.xlu1 %1998 }
0x1401   :  { %v1991_v37 = vsel %vm1990_vm11, %v1989_v20, %v1983_v24  ;;  %vm2000_vm12 = vcmp.eq.s32.totalorder %v1999_v42, 1  ;;  %v3504_v62 = vsel %vm1990_vm11, 4.0, %v1984_v39 }
0x1402   :  { %v1995_v52 = vadd.f32 %v3383_v35, %v1991_v37 }
0x1404   :  { %v2001_v60 = vsel %vm2000_vm12, %v1995_v52, %v1954_v14 }
0x1405   :  { %2009 = vperm.xlu0 %2416, %v2001_v60   ;;  %2004 = vperm.xlu1 %2415, %v2001_v60  }
0x1409   :  { %2419 = vset.pattern.permute.xlu0 %v2629_v58  ;;  %2417 = vset.pattern.permute.xlu1 %v2630_v59 }
0x140a   :  { %2033 = vperm.xlu0 %2419, %v2001_v60   ;;  %2017 = vperm.xlu1 %2417, %v2001_v60  }
0x140e   :  { %2418 = vset.pattern.permute.xlu1 %v2631_v33  ;;  %2421 = vset.pattern.permute.xlu0 %v2628_v19 }
0x140f   :  { %2025 = vperm.xlu1 %2418, %v2001_v60  }
0x1413   :  { %2420 = vset.pattern.permute.xlu1 %v2623_v1 }
0x1414   :  { %2045 = vperm.xlu1 %2420, %v2043_v51  }
0x1480   :  { %v2010_v35 = vpop.permute.xlu0 %2009  ;;  %v2005_v30 = vpop.permute.xlu1 %2004 }
0x1481   :  { %v2012_v29 = vadd.f32 %v2010_v35, %v3415_v43  ;;  %v2007_v0 = vadd.f32 %v2005_v30, %v3419_v63 }
0x1483   :  { %vm2013_vm13 = vcmp.gt.f32.partialorder %v2012_v29, %v2007_v0 }
0x1484   :  { %v2014_v46 = vsel %vm2013_vm13, %v2012_v29, %v2007_v0  ;;  %v2015_v19 = vsel %vm2013_vm13, 1.0, %v2626_v56 }
0x1485   :  { %v2018_v53 = vpop.permute.xlu1 %2017  ;;  %v2034_v55 = vpop.permute.xlu0 %2033 }
0x1486   :  { %v2020_v54 = vadd.f32 %v2018_v53, %v3424_v15  ;;  %v2036_v61 = vadd.f32 %v2034_v55, %v3432_v22 }
0x1488   :  { %vm2021_vm4 = vcmp.gt.f32.partialorder %v2020_v54, %v2014_v46 }
0x1489   :  { %v2023_v44 = vsel %vm2021_vm4, 2.0, %v2015_v19  ;;  %v2022_v38 = vsel %vm2021_vm4, %v2020_v54, %v2014_v46 }
0x148a   :  { %v2026_v7 = vpop.permute.xlu1 %2025 }
0x148b   :  { %v2028_v57 = vadd.f32 %v2026_v7, %v3429_v2 }
0x148d   :  { %vm2029_vm7 = vcmp.gt.f32.partialorder %v2028_v57, %v2022_v38 }
0x148e   :  { %v2030_v6 = vsel %vm2029_vm7, %v2028_v57, %v2022_v38  ;;  %v2031_v9 = vsel %vm2029_vm7, 3.0, %v2023_v44 }
0x148f   :  { %vm2037_vm14 = vcmp.gt.f32.partialorder %v2036_v61, %v2030_v6  ;;  %v2046_v11 = vpop.permute.xlu1 %2045 }
0x1490   :  { %v2038_v41 = vsel %vm2037_vm14, %v2036_v61, %v2030_v6  ;;  %vm2047_vm15 = vcmp.eq.s32.totalorder %v2046_v11, 1  ;;  %v2039_v12 = vsel %vm2037_vm14, 4.0, %v2031_v9 }
0x1491   :  { %v2042_v3 = vadd.f32 %v3392_v40, %v2038_v41 }
0x1493   :  { %v2048_v17 = vsel %vm2047_vm15, %v2042_v3, %v2001_v60 }
0x1494   :  { %2056 = vperm.xlu0 %2421, %v2048_v17   ;;  %2051 = vperm.xlu1 %2420, %v2048_v17  }
0x1498   :  { %2424 = vset.pattern.permute.xlu0 %v2629_v58  ;;  %2422 = vset.pattern.permute.xlu1 %v2630_v59 }
0x1499   :  { %2080 = vperm.xlu0 %2424, %v2048_v17   ;;  %2064 = vperm.xlu1 %2422, %v2048_v17  }
0x149d   :  { %2423 = vset.pattern.permute.xlu1 %v2631_v33  ;;  %2426 = vset.pattern.permute.xlu0 %v2623_v1 }
0x149e   :  { %2072 = vperm.xlu1 %2423, %v2048_v17  }
0x14a2   :  { %2425 = vset.pattern.permute.xlu1 %v2623_v1 }
0x14a3   :  { %2092 = vperm.xlu1 %2425, %v2090_v34  }
0x150f   :  { %v2057_v40 = vpop.permute.xlu0 %2056  ;;  %v2052_v14 = vpop.permute.xlu1 %2051 }
0x1510   :  { %v2059_v58 = vadd.f32 %v2057_v40, %v3415_v43  ;;  %v2054_v59 = vadd.f32 %v2052_v14, %v3419_v63 }
0x1512   :  { %vm2060_vm0 = vcmp.gt.f32.partialorder %v2059_v58, %v2054_v59 }
0x1513   :  { %v2061_v47 = vsel %vm2060_vm0, %v2059_v58, %v2054_v59  ;;  %v2062_v28 = vsel %vm2060_vm0, 1.0, %v2626_v56  ;;  %v2308_v56 = vld [vmem:[%s3572_s13] ss:$0 sm:$0xff] }
0x1514   :  { %v2065_v23 = vpop.permute.xlu1 %2064  ;;  %v2081_v48 = vpop.permute.xlu0 %2080 }
0x1515   :  { %v2067_v33 = vadd.f32 %v2065_v23, %v3424_v15  ;;  %v2083_v21 = vadd.f32 %v2081_v48, %v3432_v22  ;;  %v1735_v22 = vand.u32 127, %v133_v26 }
0x1517   :  { %vm2068_vm1 = vcmp.gt.f32.partialorder %v2067_v33, %v2061_v47  ;;  %v1736_v27 = vcvt.s32.f32 %v1735_v22  ;;  %vm2113_vm14 = vcmp.eq.s32.totalorder %v1735_v22, 7  ;;  %vm2120_vm15 = vcmp.eq.s32.totalorder %v1735_v22, 6 }
0x1518   :  { %v2070_v49 = vsel %vm2068_vm1, 2.0, %v2062_v28  ;;  %v2069_v5 = vsel %vm2068_vm1, %v2067_v33, %v2061_v47  ;;  %vm2127_vm0 = vcmp.eq.s32.totalorder %v1735_v22, 5  ;;  %vm2134_vm1 = vcmp.eq.s32.totalorder %v1735_v22, 4 }
0x1519   :  { %v2073_v4 = vpop.permute.xlu1 %2072 }
0x151a   :  { %v2075_v1 = vadd.f32 %v2073_v4, %v3429_v2 }
0x151c   :  { %vm2076_vm9 = vcmp.gt.f32.partialorder %v2075_v1, %v2069_v5 }
0x151d   :  { %v2077_v43 = vsel %vm2076_vm9, %v2075_v1, %v2069_v5  ;;  %v2078_v16 = vsel %vm2076_vm9, 3.0, %v2070_v49  ;;  %vm2141_vm9 = vcmp.eq.s32.totalorder %v1735_v22, 3 }
0x151e   :  { %vm2084_vm5 = vcmp.gt.f32.partialorder %v2083_v21, %v2077_v43  ;;  %v2093_v63 = vpop.permute.xlu1 %2092 }
0x151f   :  { %v2085_v18 = vsel %vm2084_vm5, %v2083_v21, %v2077_v43  ;;  %vm2094_vm2 = vcmp.eq.s32.totalorder %v2093_v63, 1  ;;  %v2086_v15 = vsel %vm2084_vm5, 4.0, %v2078_v16  ;;  %vm2148_vm5 = vcmp.eq.s32.totalorder %v1735_v22, 2 }
0x1520   :  { %v2089_v32 = vadd.f32 %v3386_v45, %v2085_v18 }
0x1522   :  { %v2095_v8 = vsel %vm2094_vm2, %v2089_v32, %v2048_v17  ;;  %vm2155_vm2 = vcmp.eq.s32.totalorder %v1735_v22, 1 }
0x1523   :  { %v2103_v2 = vadd.f32 %v2308_v56, %v2095_v8 }
0x1525   :  { %v2105_v10 = vsel %vm2104_vm8, %v2103_v2, -inf }
0x1526   :  { %2106 = vmax.xlane.f32.xlu1 %v2105_v10 }
0x15af   :  { %v2107_v36 = vpop.xlane.xlu1 %2106 }
0x15b0   :  { %vm2108_vm3 = vcmp.eq.f32.partialorder %v2103_v2, %v2107_v36 }
0x15b1   :  { %v2109_v20 = vsel %vm2108_vm3, %v1736_v27, 5.0  ;;  %vm2162_vm3 = vcmp.eq.s32.totalorder %v1735_v22, 0 }
0x15b2   :  { %v2110_v24 = vsel %vm2104_vm8, %v2109_v20, inf }
0x15b3   :  { %2111 = vmin.xlane.f32.xlu0 %v2110_v24 }
0x163c   :  { %v2112_v45 = vpop.xlane.xlu0 %2111 }
0x163d   :  { %vm2115_vm10 = vcmp.eq.f32.partialorder %v1736_v27, %v2112_v45 }
0x163e   :  { %v2116_v39 = vsel %vm2115_vm10, %v2086_v15, 0.0 }
0x163f   :  { %v2117_v42 = vsel %vm2104_vm8, %v2116_v39, 0.0 }
0x1640   :  { %2118 = vadd.xlane.f32.xlu0 %v2117_v42 }
0x16c9   :  { %v2119_v37 = vpop.xlane.xlu0 %2118 }
0x16ca   :  { %vm2122_vm6 = vcmp.eq.f32.partialorder %v1736_v27, %v2119_v37 }
0x16cb   :  { %v2123_v52 = vsel %vm2122_vm6, %v2039_v12, 0.0 }
0x16cc   :  { %v2124_v60 = vsel %vm2104_vm8, %v2123_v52, 0.0 }
0x16cd   :  { %2125 = vadd.xlane.f32.xlu1 %v2124_v60 }
0x1756   :  { %v2126_v26 = vpop.xlane.xlu1 %2125 }
0x1757   :  { %vm2129_vm11 = vcmp.eq.f32.partialorder %v1736_v27, %v2126_v26 }
0x1758   :  { %v2130_v51 = vsel %vm2129_vm11, %v3504_v62, 0.0 }
0x1759   :  { %v2131_v35 = vsel %vm2104_vm8, %v2130_v51, 0.0 }
0x175a   :  { %2132 = vadd.xlane.f32.xlu0 %v2131_v35 }
0x17e3   :  { %v2133_v30 = vpop.xlane.xlu0 %2132 }
0x17e4   :  { %vm2136_vm12 = vcmp.eq.f32.partialorder %v1736_v27, %v2133_v30 }
0x17e5   :  { %v2137_v29 = vsel %vm2136_vm12, %v3487_v50, 0.0 }
0x17e6   :  { %v2138_v0 = vsel %vm2104_vm8, %v2137_v29, 0.0 }
0x17e7   :  { %2139 = vadd.xlane.f32.xlu1 %v2138_v0 }
0x1870   :  { %v2140_v53 = vpop.xlane.xlu1 %2139 }
0x1871   :  { %vm2143_vm13 = vcmp.eq.f32.partialorder %v1736_v27, %v2140_v53 }
0x1872   :  { %v2144_v54 = vsel %vm2143_vm13, %v3470_v13, 0.0  ;;  %v2114_v13 = vsel %vm2113_vm14, %v2112_v45, 0.0 }
0x1873   :  { %v2145_v46 = vsel %vm2104_vm8, %v2144_v54, 0.0  ;;  %v2121_v57 = vsel %vm2120_vm15, %v2119_v37, %v2114_v13 }
0x1874   :  { %2146 = vadd.xlane.f32.xlu0 %v2145_v46  ;;  %v2128_v38 = vsel %vm2127_vm0, %v2126_v26, %v2121_v57 }
0x18fd   :  { %v2147_v19 = vpop.xlane.xlu0 %2146 }
0x18fe   :  { %vm2150_vm4 = vcmp.eq.f32.partialorder %v1736_v27, %v2147_v19 }
0x18ff   :  { %v2151_v62 = vsel %vm2150_vm4, %v3454_v31, 0.0  ;;  %v2135_v31 = vsel %vm2134_vm1, %v2133_v30, %v2128_v38 }
0x1900   :  { %v2152_v44 = vsel %vm2104_vm8, %v2151_v62, 0.0  ;;  %v2142_v61 = vsel %vm2141_vm9, %v2140_v53, %v2135_v31 }
0x1901   :  { %2153 = vadd.xlane.f32.xlu1 %v2152_v44  ;;  %v2149_v6 = vsel %vm2148_vm5, %v2147_v19, %v2142_v61 }
0x198a   :  { %v2154_v55 = vpop.xlane.xlu1 %2153 }
0x198b   :  { %vm2157_vm7 = vcmp.eq.f32.partialorder %v1736_v27, %v2154_v55  ;;  %v2156_v9 = vsel %vm2155_vm2, %v2154_v55, %v2149_v6 }
0x198c   :  { %v2158_v50 = vsel %vm2157_vm7, %v3436_v25, 0.0 }
0x198d   :  { %v2159_v7 = vsel %vm2104_vm8, %v2158_v50, 0.0  ;;  %vm2165_vm8 = vcmask 64512  }
0x198e   :  { %2160 = vadd.xlane.f32.xlu0 %v2159_v7 }
0x1a17   :  { %v2161_v11 = vpop.xlane.xlu0 %2160 }
0x1a18   :  { %v2163_v25 = vsel %vm2162_vm3, %v2161_v11, %v2156_v9 }
0x1a19   :  { %v2379_v41 = vtrunc.f32 %v2163_v25 }
0x1a1b   :  { %v2380_v12 = vcvt.f32.s32 %v2379_v41 }
0x1a1d   :  { %2166 = vst.msk [vmem:[%s3573_s15] sm:$0xff] %vm2165_vm8, %v2380_v12 }

</bundles_post_ra>
